<compile_context>
chip_gen: v5e
topology: v5e:2x2
jax: 0.10.0
libtpu: 0.0.40
codegen_flags: <defaults>
</compile_context>

<pallas_src>
import functools

import jax
import jax.numpy as jnp
from jax import lax
from jax.experimental import pallas as pl
from jax.experimental.pallas import tpu as pltpu


def discriminator_kernel(padding_value,
                         t_ref, h_ref,
                         w_ih_ref, w_hh_ref, b_ih_ref, b_hh_ref,
                         w_out_ref, b_out_ref,
                         out_ref,
                         seq_buf, gi_r_buf, gi_z_buf, gi_n_buf, h_buf):
    """Multi-layer GRU (pack/pad semantics) + Linear(E, 1) head, one batch tile.

    t_ref    : (TB, 1)      int32  valid lengths for this batch tile (VMEM)
    h_ref    : (S, TB, E)   f32    latent sequence, time-major
    w_ih_ref : (L, 3, E, E) f32    input->hidden weights, gate-major, (E_in, E_out)
    w_hh_ref : (L, 3, E, E) f32    hidden->hidden weights, gate-major, (E_in, E_out)
    b_ih_ref : (L, 3, 1, E) f32
    b_hh_ref : (L, 3, 1, E) f32
    w_out_ref: (1, E)       f32    linear head weight
    b_out_ref: (1, 1)       f32    linear head bias (SMEM scalar)
    out_ref  : (TB, S)      f32    logits for this batch tile
    seq_buf  : (S, TB, E)   f32    scratch: current layer's output sequence
    gi_*_buf : (S, TB, E)   f32    scratch: hoisted input projection per gate
    h_buf    : (TB, E)      f32    scratch: recurrent hidden state
    """
    S, TB, E = h_ref.shape
    L = w_ih_ref.shape[0]

    lens = t_ref[...]                                   # (TB, 1) int32
    gi_bufs = (gi_r_buf, gi_z_buf, gi_n_buf)

    unroll = True if S <= 16 else 8                     # guard instruction blow-up

    for layer in range(L):                              # static unroll over layers
        # ---- hoisted input projection: one (S*TB, E) @ (E, E) matmul per
        #      gate, off the serial critical path, stored time-major. ----
        if layer == 0:
            x2d = h_ref[...].reshape(S * TB, E)         # read input in place
        else:
            x2d = seq_buf[...].reshape(S * TB, E)       # previous layer output
        for g in range(3):
            gi = jnp.dot(x2d, w_ih_ref[layer, g],
                         preferred_element_type=jnp.float32)
            gi_bufs[g][...] = (gi + b_ih_ref[layer, g]).reshape(S, TB, E)

        # per-layer recurrent weights/biases, gate-major (no lane slicing)
        w_hh_r = w_hh_ref[layer, 0]
        w_hh_z = w_hh_ref[layer, 1]
        w_hh_n = w_hh_ref[layer, 2]
        b_hh_r = b_hh_ref[layer, 0]
        b_hh_z = b_hh_ref[layer, 1]
        b_hh_n = b_hh_ref[layer, 2]

        h_buf[...] = jnp.zeros_like(h_buf)

        def step(t, carry, w_hh_r=w_hh_r, w_hh_z=w_hh_z, w_hh_n=w_hh_n,
                 b_hh_r=b_hh_r, b_hh_z=b_hh_z, b_hh_n=b_hh_n):
            h = h_buf[...]                              # (TB, E)
            gh_r = jnp.dot(h, w_hh_r, preferred_element_type=jnp.float32) + b_hh_r
            gh_z = jnp.dot(h, w_hh_z, preferred_element_type=jnp.float32) + b_hh_z
            gh_n = jnp.dot(h, w_hh_n, preferred_element_type=jnp.float32) + b_hh_n
            r = jax.nn.sigmoid(gi_r_buf[t] + gh_r)
            z = jax.nn.sigmoid(gi_z_buf[t] + gh_z)
            n = jnp.tanh(gi_n_buf[t] + r * gh_n)
            h_new = (1.0 - z) * n + z * h
            valid = t < lens                            # packed-seq: no update past T[b]
            h_upd = jnp.where(valid, h_new, h)
            h_buf[...] = h_upd
            seq_buf[t] = h_upd                          # layer output at time t
            return carry

        lax.fori_loop(0, S, step, 0, unroll=unroll)

    # ---- fused epilogue: pad_packed_sequence masking + Linear(E, 1) head ----
    time_idx = lax.broadcasted_iota(jnp.int32, (S, TB, 1), 0)
    valid = time_idx < lens[None, :, :]                 # (S, TB, 1)
    h_masked = jnp.where(valid, seq_buf[...], jnp.float32(padding_value))
    # N=1 head -> VPU multiply + lane reduce instead of S tiny MXU matmuls.
    w_vec = w_out_ref[...].reshape(1, 1, E)
    logits = jnp.sum(h_masked * w_vec, axis=-1) + b_out_ref[0, 0]   # (S, TB)
    out_ref[...] = jnp.transpose(logits, (1, 0))        # single lane-dense store


def discriminator_forward(H, T, params, padding_value, max_seq_len,
                          batch_tile=None):
    """H: (B, S, E) float, T: (B,) int lengths. Returns logits (B, S)."""
    B, S, E = H.shape
    assert S == max_seq_len
    L = params["w_ih"].shape[0]

    if batch_tile is None:
        batch_tile = next(tb for tb in range(min(B, 8), 0, -1) if B % tb == 0)
    assert B % batch_tile == 0
    TB = batch_tile
    nb = B // TB

    # (nb, S, TB, E): batch grouped into tiles, time-major inside each tile.
    H_t = (H.astype(jnp.float32)
             .reshape(nb, TB, S, E)
             .transpose(0, 2, 1, 3))
    T_t = T.astype(jnp.int32).reshape(nb, TB, 1)

    # gate-major, pre-transposed weights: w[l, g] is (E_in, E_out) so x @ w = x @ W_g^T
    w_ih_t = jnp.transpose(params["w_ih"].reshape(L, 3, E, E), (0, 1, 3, 2)).astype(jnp.float32)
    w_hh_t = jnp.transpose(params["w_hh"].reshape(L, 3, E, E), (0, 1, 3, 2)).astype(jnp.float32)
    b_ih = params["b_ih"].reshape(L, 3, 1, E).astype(jnp.float32)
    b_hh = params["b_hh"].reshape(L, 3, 1, E).astype(jnp.float32)
    w_out = params["w_lin"].reshape(1, E).astype(jnp.float32)
    b_out = params["b_lin"].reshape(1, 1).astype(jnp.float32)

    kernel = functools.partial(discriminator_kernel, float(padding_value))

    out = pl.pallas_call(
        kernel,
        out_shape=jax.ShapeDtypeStruct((nb, TB, S), jnp.float32),
        grid=(nb,),
        in_specs=[
            pl.BlockSpec((None, TB, 1), lambda b: (b, 0, 0)),        # T (batch tile)
            pl.BlockSpec((None, S, TB, E), lambda b: (b, 0, 0, 0)),  # H (batch tile)
            pl.BlockSpec((L, 3, E, E), lambda b: (0, 0, 0, 0)),      # w_ih (resident)
            pl.BlockSpec((L, 3, E, E), lambda b: (0, 0, 0, 0)),      # w_hh (resident)
            pl.BlockSpec((L, 3, 1, E), lambda b: (0, 0, 0, 0)),      # b_ih
            pl.BlockSpec((L, 3, 1, E), lambda b: (0, 0, 0, 0)),      # b_hh
            pl.BlockSpec((1, E), lambda b: (0, 0)),                  # w_out
            pl.BlockSpec(memory_space=pltpu.MemorySpace.SMEM),       # b_out scalar
        ],
        out_specs=pl.BlockSpec((None, TB, S), lambda b: (b, 0, 0)),
        scratch_shapes=[
            pltpu.VMEM((S, TB, E), jnp.float32),   # seq_buf (layer output sequence)
            pltpu.VMEM((S, TB, E), jnp.float32),   # gi_r (hoisted input projection)
            pltpu.VMEM((S, TB, E), jnp.float32),   # gi_z
            pltpu.VMEM((S, TB, E), jnp.float32),   # gi_n
            pltpu.VMEM((TB, E), jnp.float32),      # h_buf (recurrent state)
        ],
        compiler_params=pltpu.CompilerParams(
            dimension_semantics=("parallel",),     # batch tiles are independent
            vmem_limit_bytes=32 * 1024 * 1024,
        ),
    )(T_t, H_t, w_ih_t, w_hh_t, b_ih, b_hh, w_out, b_out)

    return out.reshape(B, S)


def reference_forward(H, T, params, padding_value):
    """Pure-JAX reference mirroring torch GRU(pack/pad) + Linear + squeeze."""
    B, S, E = H.shape
    L = params["w_ih"].shape[0]
    lens = T.astype(jnp.int32)
    x = H.astype(jnp.float32)
    for layer in range(L):
        w_ih = params["w_ih"][layer]
        w_hh = params["w_hh"][layer]
        b_ih = params["b_ih"][layer]
        b_hh = params["b_hh"][layer]
        h = jnp.zeros((B, E), jnp.float32)
        outs = []
        for t in range(S):
            xt = x[:, t, :]
            gi = xt @ w_ih.T + b_ih
            gh = h @ w_hh.T + b_hh
            r = jax.nn.sigmoid(gi[:, :E] + gh[:, :E])
            z = jax.nn.sigmoid(gi[:, E:2 * E] + gh[:, E:2 * E])
            n = jnp.tanh(gi[:, 2 * E:] + r * gh[:, 2 * E:])
            h_new = (1.0 - z) * n + z * h
            valid = (t < lens)[:, None]
            h = jnp.where(valid, h_new, h)
            outs.append(h)
        x = jnp.stack(outs, axis=1)
    mask = (jnp.arange(S)[None, :] < lens[:, None])[:, :, None]
    x = jnp.where(mask, x, jnp.float32(padding_value))
    logits = x @ params["w_lin"].T + params["b_lin"]             # (B, S, 1)
    return logits[..., 0]


def xavier_uniform(key, shape, fan_in, fan_out):
    bound = (6.0 / (fan_in + fan_out)) ** 0.5
    return jax.random.uniform(key, shape, jnp.float32, -bound, bound)


def init_params(key, hidden_dim, num_layers):
    E, L = hidden_dim, num_layers
    k = jax.random.split(key, 2 * L + 1)
    # torch GRU init from the module: xavier_uniform weights, bias_ih=1, bias_hh=0.
    w_ih = jnp.stack([xavier_uniform(k[i], (3 * E, E), E, 3 * E) for i in range(L)])
    w_hh = jnp.stack([xavier_uniform(k[L + i], (3 * E, E), E, 3 * E) for i in range(L)])
    b_ih = jnp.ones((L, 3 * E), jnp.float32)
    b_hh = jnp.zeros((L, 3 * E), jnp.float32)
    # Linear(hidden_dim, 1): xavier_uniform weight, zero bias.
    w_lin = xavier_uniform(k[2 * L], (1, E), E, 1)
    b_lin = jnp.zeros((1,), jnp.float32)
    return {"w_ih": w_ih, "w_hh": w_hh, "b_ih": b_ih, "b_hh": b_hh,
            "w_lin": w_lin, "b_lin": b_lin}


if __name__ == "__main__":
    # Small, deterministic config consistent with the module.
    hidden_dim = 32
    num_layers = 2
    max_seq_len = 8
    padding_value = -1.0
    batch = 2

    key = jax.random.PRNGKey(0)
    k_param, k_h = jax.random.split(key)
    params = init_params(k_param, hidden_dim, num_layers)

    H = jax.random.normal(k_h, (batch, max_seq_len, hidden_dim), jnp.float32)
    T = jnp.array([max_seq_len, 5], dtype=jnp.int32)   # valid lengths per batch

    # batch_tile=1 exercises the batch-parallel grid (2 programs, "parallel").
    logits = discriminator_forward(H, T, params, padding_value, max_seq_len,
                                   batch_tile=1)
    logits = jax.block_until_ready(logits)

    ref = reference_forward(H, T, params, padding_value)
    assert logits.shape == (batch, max_seq_len)
    assert jnp.allclose(logits, ref, atol=1e-4, rtol=1e-4), (
        f"max abs err = {jnp.max(jnp.abs(logits - ref))}")

    print("KERNEL_OK")
</pallas_src>

<mosaic_0001>
module attributes {stable_mosaic.version = 11 : i64} {
  func.func @discriminator_kernel(%arg0: i32, %arg1: memref<1x1x1xi32, #tpu.memory_space<vmem>>, %arg2: memref<1x8x1x32xf32, #tpu.memory_space<vmem>>, %arg3: memref<2x3x32x32xf32, #tpu.memory_space<vmem>>, %arg4: memref<2x3x32x32xf32, #tpu.memory_space<vmem>>, %arg5: memref<2x3x1x32xf32, #tpu.memory_space<vmem>>, %arg6: memref<2x3x1x32xf32, #tpu.memory_space<vmem>>, %arg7: memref<1x32xf32, #tpu.memory_space<vmem>>, %arg8: memref<1x1xf32, #tpu.memory_space<smem>>, %arg9: memref<1x1x8xf32, #tpu.memory_space<vmem>>, %arg10: memref<8x1x32xf32, #tpu.memory_space<vmem>>, %arg11: memref<8x1x32xf32, #tpu.memory_space<vmem>>, %arg12: memref<8x1x32xf32, #tpu.memory_space<vmem>>, %arg13: memref<8x1x32xf32, #tpu.memory_space<vmem>>, %arg14: memref<1x32xf32, #tpu.memory_space<vmem>>) attributes {dimension_semantics = [#tpu.dimension_semantics<parallel>], iteration_bounds = array<i64: 2>, scalar_prefetch = 0 : i64, scratch_operands = 5 : i64, tpu.core_type = #tpu.core_type<tc>, window_params = [{transform_indices = @transform_0, window_bounds = array<i64: 1, 1, 1>}, {transform_indices = @transform_1, window_bounds = array<i64: 1, 8, 1, 32>}, {pipeline_mode = #tpu.pipeline_mode<synchronous>, transform_indices = @transform_2, window_bounds = array<i64: 2, 3, 32, 32>}, {pipeline_mode = #tpu.pipeline_mode<synchronous>, transform_indices = @transform_3, window_bounds = array<i64: 2, 3, 32, 32>}, {pipeline_mode = #tpu.pipeline_mode<synchronous>, transform_indices = @transform_4, window_bounds = array<i64: 2, 3, 1, 32>}, {pipeline_mode = #tpu.pipeline_mode<synchronous>, transform_indices = @transform_5, window_bounds = array<i64: 2, 3, 1, 32>}, {pipeline_mode = #tpu.pipeline_mode<synchronous>, transform_indices = @transform_6, window_bounds = array<i64: 1, 32>}, {transform_indices = @transform_7, window_bounds = array<i64: 1, 1>}, {transform_indices = @transform_8, window_bounds = array<i64: 1, 1, 8>}]} {
    %c0 = arith.constant 0 : index
    %c0_0 = arith.constant 0 : index
    %c0_1 = arith.constant 0 : index
    %0 = vector.load %arg1[%c0, %c0_0, %c0_1] : memref<1x1x1xi32, #tpu.memory_space<vmem>>, vector<1x1x1xi32>
    %1 = vector.shape_cast %0 : vector<1x1x1xi32> to vector<1x1xi32>
    %c0_2 = arith.constant 0 : index
    %c0_3 = arith.constant 0 : index
    %c0_4 = arith.constant 0 : index
    %c0_5 = arith.constant 0 : index
    %2 = vector.load %arg2[%c0_2, %c0_3, %c0_4, %c0_5] : memref<1x8x1x32xf32, #tpu.memory_space<vmem>>, vector<1x8x1x32xf32>
    %3 = vector.shape_cast %2 : vector<1x8x1x32xf32> to vector<8x1x32xf32>
    %4 = vector.shape_cast %3 : vector<8x1x32xf32> to vector<8x32xf32>
    %c0_6 = arith.constant 0 : index
    %c0_7 = arith.constant 0 : index
    %c0_8 = arith.constant 0 : index
    %c0_9 = arith.constant 0 : index
    %5 = vector.load %arg3[%c0_6, %c0_7, %c0_8, %c0_9] : memref<2x3x32x32xf32, #tpu.memory_space<vmem>>, vector<1x1x32x32xf32>
    %6 = vector.shape_cast %5 : vector<1x1x32x32xf32> to vector<32x32xf32>
    %cst = arith.constant dense<0.000000e+00> : vector<8x32xf32>
    %7 = tpu.matmul %4, %6, %cst {dimension_numbers = #tpu.dot_dimension_numbers<[1], [0], [0], [1], [0, 0, 1, 1], [], []>} : vector<8x32xf32>, vector<32x32xf32>, vector<8x32xf32> -> vector<8x32xf32>
    %c0_10 = arith.constant 0 : index
    %c0_11 = arith.constant 0 : index
    %c0_12 = arith.constant 0 : index
    %c0_13 = arith.constant 0 : index
    %8 = vector.load %arg5[%c0_10, %c0_11, %c0_12, %c0_13] : memref<2x3x1x32xf32, #tpu.memory_space<vmem>>, vector<1x1x1x32xf32>
    %9 = vector.shape_cast %8 : vector<1x1x1x32xf32> to vector<1x32xf32>
    %10 = vector.broadcast %9 : vector<1x32xf32> to vector<8x32xf32>
    %11 = arith.addf %7, %10 : vector<8x32xf32>
    %12 = vector.shape_cast %11 : vector<8x32xf32> to vector<8x1x32xf32>
    %c0_14 = arith.constant 0 : index
    %c0_15 = arith.constant 0 : index
    %c0_16 = arith.constant 0 : index
    %13 = vector.load %arg11[%c0_14, %c0_15, %c0_16] : memref<8x1x32xf32, #tpu.memory_space<vmem>>, vector<8x1x32xf32>
    tpu.vector_store %arg11[%c0_14, %c0_15, %c0_16], %12 {strides = array<i32>} : memref<8x1x32xf32, #tpu.memory_space<vmem>>, vector<8x1x32xf32>,
    %c0_17 = arith.constant 0 : index
    %c1 = arith.constant 1 : index
    %c0_18 = arith.constant 0 : index
    %c0_19 = arith.constant 0 : index
    %14 = vector.load %arg3[%c0_17, %c1, %c0_18, %c0_19] : memref<2x3x32x32xf32, #tpu.memory_space<vmem>>, vector<1x1x32x32xf32>
    %15 = vector.shape_cast %14 : vector<1x1x32x32xf32> to vector<32x32xf32>
    %cst_20 = arith.constant dense<0.000000e+00> : vector<8x32xf32>
    %16 = tpu.matmul %4, %15, %cst_20 {dimension_numbers = #tpu.dot_dimension_numbers<[1], [0], [0], [1], [0, 0, 1, 1], [], []>} : vector<8x32xf32>, vector<32x32xf32>, vector<8x32xf32> -> vector<8x32xf32>
    %c0_21 = arith.constant 0 : index
    %c1_22 = arith.constant 1 : index
    %c0_23 = arith.constant 0 : index
    %c0_24 = arith.constant 0 : index
    %17 = vector.load %arg5[%c0_21, %c1_22, %c0_23, %c0_24] : memref<2x3x1x32xf32, #tpu.memory_space<vmem>>, vector<1x1x1x32xf32>
    %18 = vector.shape_cast %17 : vector<1x1x1x32xf32> to vector<1x32xf32>
    %19 = vector.broadcast %18 : vector<1x32xf32> to vector<8x32xf32>
    %20 = arith.addf %16, %19 : vector<8x32xf32>
    %21 = vector.shape_cast %20 : vector<8x32xf32> to vector<8x1x32xf32>
    %c0_25 = arith.constant 0 : index
    %c0_26 = arith.constant 0 : index
    %c0_27 = arith.constant 0 : index
    %22 = vector.load %arg12[%c0_25, %c0_26, %c0_27] : memref<8x1x32xf32, #tpu.memory_space<vmem>>, vector<8x1x32xf32>
    tpu.vector_store %arg12[%c0_25, %c0_26, %c0_27], %21 {strides = array<i32>} : memref<8x1x32xf32, #tpu.memory_space<vmem>>, vector<8x1x32xf32>,
    %c0_28 = arith.constant 0 : index
    %c2 = arith.constant 2 : index
    %c0_29 = arith.constant 0 : index
    %c0_30 = arith.constant 0 : index
    %23 = vector.load %arg3[%c0_28, %c2, %c0_29, %c0_30] : memref<2x3x32x32xf32, #tpu.memory_space<vmem>>, vector<1x1x32x32xf32>
    %24 = vector.shape_cast %23 : vector<1x1x32x32xf32> to vector<32x32xf32>
    %cst_31 = arith.constant dense<0.000000e+00> : vector<8x32xf32>
    %25 = tpu.matmul %4, %24, %cst_31 {dimension_numbers = #tpu.dot_dimension_numbers<[1], [0], [0], [1], [0, 0, 1, 1], [], []>} : vector<8x32xf32>, vector<32x32xf32>, vector<8x32xf32> -> vector<8x32xf32>
    %c0_32 = arith.constant 0 : index
    %c2_33 = arith.constant 2 : index
    %c0_34 = arith.constant 0 : index
    %c0_35 = arith.constant 0 : index
    %26 = vector.load %arg5[%c0_32, %c2_33, %c0_34, %c0_35] : memref<2x3x1x32xf32, #tpu.memory_space<vmem>>, vector<1x1x1x32xf32>
    %27 = vector.shape_cast %26 : vector<1x1x1x32xf32> to vector<1x32xf32>
    %28 = vector.broadcast %27 : vector<1x32xf32> to vector<8x32xf32>
    %29 = arith.addf %25, %28 : vector<8x32xf32>
    %30 = vector.shape_cast %29 : vector<8x32xf32> to vector<8x1x32xf32>
    %c0_36 = arith.constant 0 : index
    %c0_37 = arith.constant 0 : index
    %c0_38 = arith.constant 0 : index
    %31 = vector.load %arg13[%c0_36, %c0_37, %c0_38] : memref<8x1x32xf32, #tpu.memory_space<vmem>>, vector<8x1x32xf32>
    tpu.vector_store %arg13[%c0_36, %c0_37, %c0_38], %30 {strides = array<i32>} : memref<8x1x32xf32, #tpu.memory_space<vmem>>, vector<8x1x32xf32>,
    %c0_39 = arith.constant 0 : index
    %c0_40 = arith.constant 0 : index
    %c0_41 = arith.constant 0 : index
    %c0_42 = arith.constant 0 : index
    %32 = vector.load %arg4[%c0_39, %c0_40, %c0_41, %c0_42] : memref<2x3x32x32xf32, #tpu.memory_space<vmem>>, vector<1x1x32x32xf32>
    %33 = vector.shape_cast %32 : vector<1x1x32x32xf32> to vector<32x32xf32>
    %c0_43 = arith.constant 0 : index
    %c1_44 = arith.constant 1 : index
    %c0_45 = arith.constant 0 : index
    %c0_46 = arith.constant 0 : index
    %34 = vector.load %arg4[%c0_43, %c1_44, %c0_45, %c0_46] : memref<2x3x32x32xf32, #tpu.memory_space<vmem>>, vector<1x1x32x32xf32>
    %35 = vector.shape_cast %34 : vector<1x1x32x32xf32> to vector<32x32xf32>
    %c0_47 = arith.constant 0 : index
    %c2_48 = arith.constant 2 : index
    %c0_49 = arith.constant 0 : index
    %c0_50 = arith.constant 0 : index
    %36 = vector.load %arg4[%c0_47, %c2_48, %c0_49, %c0_50] : memref<2x3x32x32xf32, #tpu.memory_space<vmem>>, vector<1x1x32x32xf32>
    %37 = vector.shape_cast %36 : vector<1x1x32x32xf32> to vector<32x32xf32>
    %c0_51 = arith.constant 0 : index
    %c0_52 = arith.constant 0 : index
    %c0_53 = arith.constant 0 : index
    %c0_54 = arith.constant 0 : index
    %38 = vector.load %arg6[%c0_51, %c0_52, %c0_53, %c0_54] : memref<2x3x1x32xf32, #tpu.memory_space<vmem>>, vector<1x1x1x32xf32>
    %39 = vector.shape_cast %38 : vector<1x1x1x32xf32> to vector<1x32xf32>
    %c0_55 = arith.constant 0 : index
    %c1_56 = arith.constant 1 : index
    %c0_57 = arith.constant 0 : index
    %c0_58 = arith.constant 0 : index
    %40 = vector.load %arg6[%c0_55, %c1_56, %c0_57, %c0_58] : memref<2x3x1x32xf32, #tpu.memory_space<vmem>>, vector<1x1x1x32xf32>
    %41 = vector.shape_cast %40 : vector<1x1x1x32xf32> to vector<1x32xf32>
    %c0_59 = arith.constant 0 : index
    %c2_60 = arith.constant 2 : index
    %c0_61 = arith.constant 0 : index
    %c0_62 = arith.constant 0 : index
    %42 = vector.load %arg6[%c0_59, %c2_60, %c0_61, %c0_62] : memref<2x3x1x32xf32, #tpu.memory_space<vmem>>, vector<1x1x1x32xf32>
    %43 = vector.shape_cast %42 : vector<1x1x1x32xf32> to vector<1x32xf32>
    %cst_63 = arith.constant 0.000000e+00 : f32
    %44 = vector.broadcast %cst_63 : f32 to vector<1x32xf32>
    %c0_64 = arith.constant 0 : index
    %c0_65 = arith.constant 0 : index
    %45 = vector.load %arg14[%c0_64, %c0_65] : memref<1x32xf32, #tpu.memory_space<vmem>>, vector<1x32xf32>
    tpu.vector_store %arg14[%c0_64, %c0_65], %44 {strides = array<i32>} : memref<1x32xf32, #tpu.memory_space<vmem>>, vector<1x32xf32>,
    %c0_i32 = arith.constant 0 : i32
    %c0_66 = arith.constant 0 : index
    %c0_67 = arith.constant 0 : index
    %46 = vector.load %arg14[%c0_66, %c0_67] : memref<1x32xf32, #tpu.memory_space<vmem>>, vector<1x32xf32>
    %cst_68 = arith.constant dense<0.000000e+00> : vector<1x32xf32>
    %47 = tpu.matmul %46, %33, %cst_68 {dimension_numbers = #tpu.dot_dimension_numbers<[1], [0], [0], [1], [0, 0, 1, 1], [], []>} : vector<1x32xf32>, vector<32x32xf32>, vector<1x32xf32> -> vector<1x32xf32>
    %48 = arith.addf %47, %39 : vector<1x32xf32>
    %cst_69 = arith.constant dense<0.000000e+00> : vector<1x32xf32>
    %49 = tpu.matmul %46, %35, %cst_69 {dimension_numbers = #tpu.dot_dimension_numbers<[1], [0], [0], [1], [0, 0, 1, 1], [], []>} : vector<1x32xf32>, vector<32x32xf32>, vector<1x32xf32> -> vector<1x32xf32>
    %50 = arith.addf %49, %41 : vector<1x32xf32>
    %cst_70 = arith.constant dense<0.000000e+00> : vector<1x32xf32>
    %51 = tpu.matmul %46, %37, %cst_70 {dimension_numbers = #tpu.dot_dimension_numbers<[1], [0], [0], [1], [0, 0, 1, 1], [], []>} : vector<1x32xf32>, vector<32x32xf32>, vector<1x32xf32> -> vector<1x32xf32>
    %52 = arith.addf %51, %43 : vector<1x32xf32>
    %53 = arith.index_cast %c0_i32 : i32 to index
    %c0_71 = arith.constant 0 : index
    %c0_72 = arith.constant 0 : index
    %54 = vector.load %arg11[%53, %c0_71, %c0_72] : memref<8x1x32xf32, #tpu.memory_space<vmem>>, vector<1x1x32xf32>
    %55 = vector.shape_cast %54 : vector<1x1x32xf32> to vector<1x32xf32>
    %56 = arith.addf %55, %48 : vector<1x32xf32>
    %57 = arith.negf %56 : vector<1x32xf32>
    %58 = math.exp %57 : vector<1x32xf32>
    %cst_73 = arith.constant 1.000000e+00 : f32
    %59 = vector.broadcast %cst_73 : f32 to vector<1x32xf32>
    %60 = arith.addf %59, %58 : vector<1x32xf32>
    %61 = arith.divf %59, %60 : vector<1x32xf32>
    %62 = arith.index_cast %c0_i32 : i32 to index
    %c0_74 = arith.constant 0 : index
    %c0_75 = arith.constant 0 : index
    %63 = vector.load %arg12[%62, %c0_74, %c0_75] : memref<8x1x32xf32, #tpu.memory_space<vmem>>, vector<1x1x32xf32>
    %64 = vector.shape_cast %63 : vector<1x1x32xf32> to vector<1x32xf32>
    %65 = arith.addf %64, %50 : vector<1x32xf32>
    %66 = arith.negf %65 : vector<1x32xf32>
    %67 = math.exp %66 : vector<1x32xf32>
    %cst_76 = arith.constant 1.000000e+00 : f32
    %68 = vector.broadcast %cst_76 : f32 to vector<1x32xf32>
    %69 = arith.addf %68, %67 : vector<1x32xf32>
    %70 = arith.divf %68, %69 : vector<1x32xf32>
    %71 = arith.index_cast %c0_i32 : i32 to index
    %c0_77 = arith.constant 0 : index
    %c0_78 = arith.constant 0 : index
    %72 = vector.load %arg13[%71, %c0_77, %c0_78] : memref<8x1x32xf32, #tpu.memory_space<vmem>>, vector<1x1x32xf32>
    %73 = vector.shape_cast %72 : vector<1x1x32xf32> to vector<1x32xf32>
    %74 = arith.mulf %61, %52 : vector<1x32xf32>
    %75 = arith.addf %73, %74 : vector<1x32xf32>
    %76 = math.tanh %75 : vector<1x32xf32>
    %cst_79 = arith.constant 1.000000e+00 : f32
    %77 = vector.broadcast %cst_79 : f32 to vector<1x32xf32>
    %78 = arith.subf %77, %70 : vector<1x32xf32>
    %79 = arith.mulf %78, %76 : vector<1x32xf32>
    %80 = arith.mulf %70, %46 : vector<1x32xf32>
    %81 = arith.addf %79, %80 : vector<1x32xf32>
    %82 = vector.broadcast %c0_i32 : i32 to vector<1x1xi32>
    %83 = arith.cmpi slt, %82, %1 : vector<1x1xi32>
    %84 = vector.shape_cast %83 : vector<1x1xi1> to vector<1x1xi1>
    %85 = vector.broadcast %84 : vector<1x1xi1> to vector<1x32xi1>
    %86 = arith.select %85, %81, %46 : vector<1x32xi1>, vector<1x32xf32>
    %c0_80 = arith.constant 0 : index
    %c0_81 = arith.constant 0 : index
    %87 = vector.load %arg14[%c0_80, %c0_81] : memref<1x32xf32, #tpu.memory_space<vmem>>, vector<1x32xf32>
    tpu.vector_store %arg14[%c0_80, %c0_81], %86 {strides = array<i32>} : memref<1x32xf32, #tpu.memory_space<vmem>>, vector<1x32xf32>,
    %88 = arith.index_cast %c0_i32 : i32 to index
    %c0_82 = arith.constant 0 : index
    %c0_83 = arith.constant 0 : index
    %89 = vector.load %arg10[%88, %c0_82, %c0_83] : memref<8x1x32xf32, #tpu.memory_space<vmem>>, vector<1x1x32xf32>
    %90 = vector.shape_cast %89 : vector<1x1x32xf32> to vector<1x32xf32>
    %91 = vector.shape_cast %86 : vector<1x32xf32> to vector<1x1x32xf32>
    tpu.vector_store %arg10[%88, %c0_82, %c0_83], %91 {strides = array<i32>} : memref<8x1x32xf32, #tpu.memory_space<vmem>>, vector<1x1x32xf32>,
    %c1_i32 = arith.constant 1 : i32
    %c0_84 = arith.constant 0 : index
    %c0_85 = arith.constant 0 : index
    %92 = vector.load %arg14[%c0_84, %c0_85] : memref<1x32xf32, #tpu.memory_space<vmem>>, vector<1x32xf32>
    %cst_86 = arith.constant dense<0.000000e+00> : vector<1x32xf32>
    %93 = tpu.matmul %92, %33, %cst_86 {dimension_numbers = #tpu.dot_dimension_numbers<[1], [0], [0], [1], [0, 0, 1, 1], [], []>} : vector<1x32xf32>, vector<32x32xf32>, vector<1x32xf32> -> vector<1x32xf32>
    %94 = arith.addf %93, %39 : vector<1x32xf32>
    %cst_87 = arith.constant dense<0.000000e+00> : vector<1x32xf32>
    %95 = tpu.matmul %92, %35, %cst_87 {dimension_numbers = #tpu.dot_dimension_numbers<[1], [0], [0], [1], [0, 0, 1, 1], [], []>} : vector<1x32xf32>, vector<32x32xf32>, vector<1x32xf32> -> vector<1x32xf32>
    %96 = arith.addf %95, %41 : vector<1x32xf32>
    %cst_88 = arith.constant dense<0.000000e+00> : vector<1x32xf32>
    %97 = tpu.matmul %92, %37, %cst_88 {dimension_numbers = #tpu.dot_dimension_numbers<[1], [0], [0], [1], [0, 0, 1, 1], [], []>} : vector<1x32xf32>, vector<32x32xf32>, vector<1x32xf32> -> vector<1x32xf32>
    %98 = arith.addf %97, %43 : vector<1x32xf32>
    %99 = arith.index_cast %c1_i32 : i32 to index
    %c0_89 = arith.constant 0 : index
    %c0_90 = arith.constant 0 : index
    %100 = vector.load %arg11[%99, %c0_89, %c0_90] : memref<8x1x32xf32, #tpu.memory_space<vmem>>, vector<1x1x32xf32>
    %101 = vector.shape_cast %100 : vector<1x1x32xf32> to vector<1x32xf32>
    %102 = arith.addf %101, %94 : vector<1x32xf32>
    %103 = arith.negf %102 : vector<1x32xf32>
    %104 = math.exp %103 : vector<1x32xf32>
    %cst_91 = arith.constant 1.000000e+00 : f32
    %105 = vector.broadcast %cst_91 : f32 to vector<1x32xf32>
    %106 = arith.addf %105, %104 : vector<1x32xf32>
    %107 = arith.divf %105, %106 : vector<1x32xf32>
    %108 = arith.index_cast %c1_i32 : i32 to index
    %c0_92 = arith.constant 0 : index
    %c0_93 = arith.constant 0 : index
    %109 = vector.load %arg12[%108, %c0_92, %c0_93] : memref<8x1x32xf32, #tpu.memory_space<vmem>>, vector<1x1x32xf32>
    %110 = vector.shape_cast %109 : vector<1x1x32xf32> to vector<1x32xf32>
    %111 = arith.addf %110, %96 : vector<1x32xf32>
    %112 = arith.negf %111 : vector<1x32xf32>
    %113 = math.exp %112 : vector<1x32xf32>
    %cst_94 = arith.constant 1.000000e+00 : f32
    %114 = vector.broadcast %cst_94 : f32 to vector<1x32xf32>
    %115 = arith.addf %114, %113 : vector<1x32xf32>
    %116 = arith.divf %114, %115 : vector<1x32xf32>
    %117 = arith.index_cast %c1_i32 : i32 to index
    %c0_95 = arith.constant 0 : index
    %c0_96 = arith.constant 0 : index
    %118 = vector.load %arg13[%117, %c0_95, %c0_96] : memref<8x1x32xf32, #tpu.memory_space<vmem>>, vector<1x1x32xf32>
    %119 = vector.shape_cast %118 : vector<1x1x32xf32> to vector<1x32xf32>
    %120 = arith.mulf %107, %98 : vector<1x32xf32>
    %121 = arith.addf %119, %120 : vector<1x32xf32>
    %122 = math.tanh %121 : vector<1x32xf32>
    %cst_97 = arith.constant 1.000000e+00 : f32
    %123 = vector.broadcast %cst_97 : f32 to vector<1x32xf32>
    %124 = arith.subf %123, %116 : vector<1x32xf32>
    %125 = arith.mulf %124, %122 : vector<1x32xf32>
    %126 = arith.mulf %116, %92 : vector<1x32xf32>
    %127 = arith.addf %125, %126 : vector<1x32xf32>
    %128 = vector.broadcast %c1_i32 : i32 to vector<1x1xi32>
    %129 = arith.cmpi slt, %128, %1 : vector<1x1xi32>
    %130 = vector.shape_cast %129 : vector<1x1xi1> to vector<1x1xi1>
    %131 = vector.broadcast %130 : vector<1x1xi1> to vector<1x32xi1>
    %132 = arith.select %131, %127, %92 : vector<1x32xi1>, vector<1x32xf32>
    %c0_98 = arith.constant 0 : index
    %c0_99 = arith.constant 0 : index
    %133 = vector.load %arg14[%c0_98, %c0_99] : memref<1x32xf32, #tpu.memory_space<vmem>>, vector<1x32xf32>
    tpu.vector_store %arg14[%c0_98, %c0_99], %132 {strides = array<i32>} : memref<1x32xf32, #tpu.memory_space<vmem>>, vector<1x32xf32>,
    %134 = arith.index_cast %c1_i32 : i32 to index
    %c0_100 = arith.constant 0 : index
    %c0_101 = arith.constant 0 : index
    %135 = vector.load %arg10[%134, %c0_100, %c0_101] : memref<8x1x32xf32, #tpu.memory_space<vmem>>, vector<1x1x32xf32>
    %136 = vector.shape_cast %135 : vector<1x1x32xf32> to vector<1x32xf32>
    %137 = vector.shape_cast %132 : vector<1x32xf32> to vector<1x1x32xf32>
    tpu.vector_store %arg10[%134, %c0_100, %c0_101], %137 {strides = array<i32>} : memref<8x1x32xf32, #tpu.memory_space<vmem>>, vector<1x1x32xf32>,
    %c2_i32 = arith.constant 2 : i32
    %c0_102 = arith.constant 0 : index
    %c0_103 = arith.constant 0 : index
    %138 = vector.load %arg14[%c0_102, %c0_103] : memref<1x32xf32, #tpu.memory_space<vmem>>, vector<1x32xf32>
    %cst_104 = arith.constant dense<0.000000e+00> : vector<1x32xf32>
    %139 = tpu.matmul %138, %33, %cst_104 {dimension_numbers = #tpu.dot_dimension_numbers<[1], [0], [0], [1], [0, 0, 1, 1], [], []>} : vector<1x32xf32>, vector<32x32xf32>, vector<1x32xf32> -> vector<1x32xf32>
    %140 = arith.addf %139, %39 : vector<1x32xf32>
    %cst_105 = arith.constant dense<0.000000e+00> : vector<1x32xf32>
    %141 = tpu.matmul %138, %35, %cst_105 {dimension_numbers = #tpu.dot_dimension_numbers<[1], [0], [0], [1], [0, 0, 1, 1], [], []>} : vector<1x32xf32>, vector<32x32xf32>, vector<1x32xf32> -> vector<1x32xf32>
    %142 = arith.addf %141, %41 : vector<1x32xf32>
    %cst_106 = arith.constant dense<0.000000e+00> : vector<1x32xf32>
    %143 = tpu.matmul %138, %37, %cst_106 {dimension_numbers = #tpu.dot_dimension_numbers<[1], [0], [0], [1], [0, 0, 1, 1], [], []>} : vector<1x32xf32>, vector<32x32xf32>, vector<1x32xf32> -> vector<1x32xf32>
    %144 = arith.addf %143, %43 : vector<1x32xf32>
    %145 = arith.index_cast %c2_i32 : i32 to index
    %c0_107 = arith.constant 0 : index
    %c0_108 = arith.constant 0 : index
    %146 = vector.load %arg11[%145, %c0_107, %c0_108] : memref<8x1x32xf32, #tpu.memory_space<vmem>>, vector<1x1x32xf32>
    %147 = vector.shape_cast %146 : vector<1x1x32xf32> to vector<1x32xf32>
    %148 = arith.addf %147, %140 : vector<1x32xf32>
    %149 = arith.negf %148 : vector<1x32xf32>
    %150 = math.exp %149 : vector<1x32xf32>
    %cst_109 = arith.constant 1.000000e+00 : f32
    %151 = vector.broadcast %cst_109 : f32 to vector<1x32xf32>
    %152 = arith.addf %151, %150 : vector<1x32xf32>
    %153 = arith.divf %151, %152 : vector<1x32xf32>
    %154 = arith.index_cast %c2_i32 : i32 to index
    %c0_110 = arith.constant 0 : index
    %c0_111 = arith.constant 0 : index
    %155 = vector.load %arg12[%154, %c0_110, %c0_111] : memref<8x1x32xf32, #tpu.memory_space<vmem>>, vector<1x1x32xf32>
    %156 = vector.shape_cast %155 : vector<1x1x32xf32> to vector<1x32xf32>
    %157 = arith.addf %156, %142 : vector<1x32xf32>
    %158 = arith.negf %157 : vector<1x32xf32>
    %159 = math.exp %158 : vector<1x32xf32>
    %cst_112 = arith.constant 1.000000e+00 : f32
    %160 = vector.broadcast %cst_112 : f32 to vector<1x32xf32>
    %161 = arith.addf %160, %159 : vector<1x32xf32>
    %162 = arith.divf %160, %161 : vector<1x32xf32>
    %163 = arith.index_cast %c2_i32 : i32 to index
    %c0_113 = arith.constant 0 : index
    %c0_114 = arith.constant 0 : index
    %164 = vector.load %arg13[%163, %c0_113, %c0_114] : memref<8x1x32xf32, #tpu.memory_space<vmem>>, vector<1x1x32xf32>
    %165 = vector.shape_cast %164 : vector<1x1x32xf32> to vector<1x32xf32>
    %166 = arith.mulf %153, %144 : vector<1x32xf32>
    %167 = arith.addf %165, %166 : vector<1x32xf32>
    %168 = math.tanh %167 : vector<1x32xf32>
    %cst_115 = arith.constant 1.000000e+00 : f32
    %169 = vector.broadcast %cst_115 : f32 to vector<1x32xf32>
    %170 = arith.subf %169, %162 : vector<1x32xf32>
    %171 = arith.mulf %170, %168 : vector<1x32xf32>
    %172 = arith.mulf %162, %138 : vector<1x32xf32>
    %173 = arith.addf %171, %172 : vector<1x32xf32>
    %174 = vector.broadcast %c2_i32 : i32 to vector<1x1xi32>
    %175 = arith.cmpi slt, %174, %1 : vector<1x1xi32>
    %176 = vector.shape_cast %175 : vector<1x1xi1> to vector<1x1xi1>
    %177 = vector.broadcast %176 : vector<1x1xi1> to vector<1x32xi1>
    %178 = arith.select %177, %173, %138 : vector<1x32xi1>, vector<1x32xf32>
    %c0_116 = arith.constant 0 : index
    %c0_117 = arith.constant 0 : index
    %179 = vector.load %arg14[%c0_116, %c0_117] : memref<1x32xf32, #tpu.memory_space<vmem>>, vector<1x32xf32>
    tpu.vector_store %arg14[%c0_116, %c0_117], %178 {strides = array<i32>} : memref<1x32xf32, #tpu.memory_space<vmem>>, vector<1x32xf32>,
    %180 = arith.index_cast %c2_i32 : i32 to index
    %c0_118 = arith.constant 0 : index
    %c0_119 = arith.constant 0 : index
    %181 = vector.load %arg10[%180, %c0_118, %c0_119] : memref<8x1x32xf32, #tpu.memory_space<vmem>>, vector<1x1x32xf32>
    %182 = vector.shape_cast %181 : vector<1x1x32xf32> to vector<1x32xf32>
    %183 = vector.shape_cast %178 : vector<1x32xf32> to vector<1x1x32xf32>
    tpu.vector_store %arg10[%180, %c0_118, %c0_119], %183 {strides = array<i32>} : memref<8x1x32xf32, #tpu.memory_space<vmem>>, vector<1x1x32xf32>,
    %c3_i32 = arith.constant 3 : i32
    %c0_120 = arith.constant 0 : index
    %c0_121 = arith.constant 0 : index
    %184 = vector.load %arg14[%c0_120, %c0_121] : memref<1x32xf32, #tpu.memory_space<vmem>>, vector<1x32xf32>
    %cst_122 = arith.constant dense<0.000000e+00> : vector<1x32xf32>
    %185 = tpu.matmul %184, %33, %cst_122 {dimension_numbers = #tpu.dot_dimension_numbers<[1], [0], [0], [1], [0, 0, 1, 1], [], []>} : vector<1x32xf32>, vector<32x32xf32>, vector<1x32xf32> -> vector<1x32xf32>
    %186 = arith.addf %185, %39 : vector<1x32xf32>
    %cst_123 = arith.constant dense<0.000000e+00> : vector<1x32xf32>
    %187 = tpu.matmul %184, %35, %cst_123 {dimension_numbers = #tpu.dot_dimension_numbers<[1], [0], [0], [1], [0, 0, 1, 1], [], []>} : vector<1x32xf32>, vector<32x32xf32>, vector<1x32xf32> -> vector<1x32xf32>
    %188 = arith.addf %187, %41 : vector<1x32xf32>
    %cst_124 = arith.constant dense<0.000000e+00> : vector<1x32xf32>
    %189 = tpu.matmul %184, %37, %cst_124 {dimension_numbers = #tpu.dot_dimension_numbers<[1], [0], [0], [1], [0, 0, 1, 1], [], []>} : vector<1x32xf32>, vector<32x32xf32>, vector<1x32xf32> -> vector<1x32xf32>
    %190 = arith.addf %189, %43 : vector<1x32xf32>
    %191 = arith.index_cast %c3_i32 : i32 to index
    %c0_125 = arith.constant 0 : index
    %c0_126 = arith.constant 0 : index
    %192 = vector.load %arg11[%191, %c0_125, %c0_126] : memref<8x1x32xf32, #tpu.memory_space<vmem>>, vector<1x1x32xf32>
    %193 = vector.shape_cast %192 : vector<1x1x32xf32> to vector<1x32xf32>
    %194 = arith.addf %193, %186 : vector<1x32xf32>
    %195 = arith.negf %194 : vector<1x32xf32>
    %196 = math.exp %195 : vector<1x32xf32>
    %cst_127 = arith.constant 1.000000e+00 : f32
    %197 = vector.broadcast %cst_127 : f32 to vector<1x32xf32>
    %198 = arith.addf %197, %196 : vector<1x32xf32>
    %199 = arith.divf %197, %198 : vector<1x32xf32>
    %200 = arith.index_cast %c3_i32 : i32 to index
    %c0_128 = arith.constant 0 : index
    %c0_129 = arith.constant 0 : index
    %201 = vector.load %arg12[%200, %c0_128, %c0_129] : memref<8x1x32xf32, #tpu.memory_space<vmem>>, vector<1x1x32xf32>
    %202 = vector.shape_cast %201 : vector<1x1x32xf32> to vector<1x32xf32>
    %203 = arith.addf %202, %188 : vector<1x32xf32>
    %204 = arith.negf %203 : vector<1x32xf32>
    %205 = math.exp %204 : vector<1x32xf32>
    %cst_130 = arith.constant 1.000000e+00 : f32
    %206 = vector.broadcast %cst_130 : f32 to vector<1x32xf32>
    %207 = arith.addf %206, %205 : vector<1x32xf32>
    %208 = arith.divf %206, %207 : vector<1x32xf32>
    %209 = arith.index_cast %c3_i32 : i32 to index
    %c0_131 = arith.constant 0 : index
    %c0_132 = arith.constant 0 : index
    %210 = vector.load %arg13[%209, %c0_131, %c0_132] : memref<8x1x32xf32, #tpu.memory_space<vmem>>, vector<1x1x32xf32>
    %211 = vector.shape_cast %210 : vector<1x1x32xf32> to vector<1x32xf32>
    %212 = arith.mulf %199, %190 : vector<1x32xf32>
    %213 = arith.addf %211, %212 : vector<1x32xf32>
    %214 = math.tanh %213 : vector<1x32xf32>
    %cst_133 = arith.constant 1.000000e+00 : f32
    %215 = vector.broadcast %cst_133 : f32 to vector<1x32xf32>
    %216 = arith.subf %215, %208 : vector<1x32xf32>
    %217 = arith.mulf %216, %214 : vector<1x32xf32>
    %218 = arith.mulf %208, %184 : vector<1x32xf32>
    %219 = arith.addf %217, %218 : vector<1x32xf32>
    %220 = vector.broadcast %c3_i32 : i32 to vector<1x1xi32>
    %221 = arith.cmpi slt, %220, %1 : vector<1x1xi32>
    %222 = vector.shape_cast %221 : vector<1x1xi1> to vector<1x1xi1>
    %223 = vector.broadcast %222 : vector<1x1xi1> to vector<1x32xi1>
    %224 = arith.select %223, %219, %184 : vector<1x32xi1>, vector<1x32xf32>
    %c0_134 = arith.constant 0 : index
    %c0_135 = arith.constant 0 : index
    %225 = vector.load %arg14[%c0_134, %c0_135] : memref<1x32xf32, #tpu.memory_space<vmem>>, vector<1x32xf32>
    tpu.vector_store %arg14[%c0_134, %c0_135], %224 {strides = array<i32>} : memref<1x32xf32, #tpu.memory_space<vmem>>, vector<1x32xf32>,
    %226 = arith.index_cast %c3_i32 : i32 to index
    %c0_136 = arith.constant 0 : index
    %c0_137 = arith.constant 0 : index
    %227 = vector.load %arg10[%226, %c0_136, %c0_137] : memref<8x1x32xf32, #tpu.memory_space<vmem>>, vector<1x1x32xf32>
    %228 = vector.shape_cast %227 : vector<1x1x32xf32> to vector<1x32xf32>
    %229 = vector.shape_cast %224 : vector<1x32xf32> to vector<1x1x32xf32>
    tpu.vector_store %arg10[%226, %c0_136, %c0_137], %229 {strides = array<i32>} : memref<8x1x32xf32, #tpu.memory_space<vmem>>, vector<1x1x32xf32>,
    %c4_i32 = arith.constant 4 : i32
    %c0_138 = arith.constant 0 : index
    %c0_139 = arith.constant 0 : index
    %230 = vector.load %arg14[%c0_138, %c0_139] : memref<1x32xf32, #tpu.memory_space<vmem>>, vector<1x32xf32>
    %cst_140 = arith.constant dense<0.000000e+00> : vector<1x32xf32>
    %231 = tpu.matmul %230, %33, %cst_140 {dimension_numbers = #tpu.dot_dimension_numbers<[1], [0], [0], [1], [0, 0, 1, 1], [], []>} : vector<1x32xf32>, vector<32x32xf32>, vector<1x32xf32> -> vector<1x32xf32>
    %232 = arith.addf %231, %39 : vector<1x32xf32>
    %cst_141 = arith.constant dense<0.000000e+00> : vector<1x32xf32>
    %233 = tpu.matmul %230, %35, %cst_141 {dimension_numbers = #tpu.dot_dimension_numbers<[1], [0], [0], [1], [0, 0, 1, 1], [], []>} : vector<1x32xf32>, vector<32x32xf32>, vector<1x32xf32> -> vector<1x32xf32>
    %234 = arith.addf %233, %41 : vector<1x32xf32>
    %cst_142 = arith.constant dense<0.000000e+00> : vector<1x32xf32>
    %235 = tpu.matmul %230, %37, %cst_142 {dimension_numbers = #tpu.dot_dimension_numbers<[1], [0], [0], [1], [0, 0, 1, 1], [], []>} : vector<1x32xf32>, vector<32x32xf32>, vector<1x32xf32> -> vector<1x32xf32>
    %236 = arith.addf %235, %43 : vector<1x32xf32>
    %237 = arith.index_cast %c4_i32 : i32 to index
    %c0_143 = arith.constant 0 : index
    %c0_144 = arith.constant 0 : index
    %238 = vector.load %arg11[%237, %c0_143, %c0_144] : memref<8x1x32xf32, #tpu.memory_space<vmem>>, vector<1x1x32xf32>
    %239 = vector.shape_cast %238 : vector<1x1x32xf32> to vector<1x32xf32>
    %240 = arith.addf %239, %232 : vector<1x32xf32>
    %241 = arith.negf %240 : vector<1x32xf32>
    %242 = math.exp %241 : vector<1x32xf32>
    %cst_145 = arith.constant 1.000000e+00 : f32
    %243 = vector.broadcast %cst_145 : f32 to vector<1x32xf32>
    %244 = arith.addf %243, %242 : vector<1x32xf32>
    %245 = arith.divf %243, %244 : vector<1x32xf32>
    %246 = arith.index_cast %c4_i32 : i32 to index
    %c0_146 = arith.constant 0 : index
    %c0_147 = arith.constant 0 : index
    %247 = vector.load %arg12[%246, %c0_146, %c0_147] : memref<8x1x32xf32, #tpu.memory_space<vmem>>, vector<1x1x32xf32>
    %248 = vector.shape_cast %247 : vector<1x1x32xf32> to vector<1x32xf32>
    %249 = arith.addf %248, %234 : vector<1x32xf32>
    %250 = arith.negf %249 : vector<1x32xf32>
    %251 = math.exp %250 : vector<1x32xf32>
    %cst_148 = arith.constant 1.000000e+00 : f32
    %252 = vector.broadcast %cst_148 : f32 to vector<1x32xf32>
    %253 = arith.addf %252, %251 : vector<1x32xf32>
    %254 = arith.divf %252, %253 : vector<1x32xf32>
    %255 = arith.index_cast %c4_i32 : i32 to index
    %c0_149 = arith.constant 0 : index
    %c0_150 = arith.constant 0 : index
    %256 = vector.load %arg13[%255, %c0_149, %c0_150] : memref<8x1x32xf32, #tpu.memory_space<vmem>>, vector<1x1x32xf32>
    %257 = vector.shape_cast %256 : vector<1x1x32xf32> to vector<1x32xf32>
    %258 = arith.mulf %245, %236 : vector<1x32xf32>
    %259 = arith.addf %257, %258 : vector<1x32xf32>
    %260 = math.tanh %259 : vector<1x32xf32>
    %cst_151 = arith.constant 1.000000e+00 : f32
    %261 = vector.broadcast %cst_151 : f32 to vector<1x32xf32>
    %262 = arith.subf %261, %254 : vector<1x32xf32>
    %263 = arith.mulf %262, %260 : vector<1x32xf32>
    %264 = arith.mulf %254, %230 : vector<1x32xf32>
    %265 = arith.addf %263, %264 : vector<1x32xf32>
    %266 = vector.broadcast %c4_i32 : i32 to vector<1x1xi32>
    %267 = arith.cmpi slt, %266, %1 : vector<1x1xi32>
    %268 = vector.shape_cast %267 : vector<1x1xi1> to vector<1x1xi1>
    %269 = vector.broadcast %268 : vector<1x1xi1> to vector<1x32xi1>
    %270 = arith.select %269, %265, %230 : vector<1x32xi1>, vector<1x32xf32>
    %c0_152 = arith.constant 0 : index
    %c0_153 = arith.constant 0 : index
    %271 = vector.load %arg14[%c0_152, %c0_153] : memref<1x32xf32, #tpu.memory_space<vmem>>, vector<1x32xf32>
    tpu.vector_store %arg14[%c0_152, %c0_153], %270 {strides = array<i32>} : memref<1x32xf32, #tpu.memory_space<vmem>>, vector<1x32xf32>,
    %272 = arith.index_cast %c4_i32 : i32 to index
    %c0_154 = arith.constant 0 : index
    %c0_155 = arith.constant 0 : index
    %273 = vector.load %arg10[%272, %c0_154, %c0_155] : memref<8x1x32xf32, #tpu.memory_space<vmem>>, vector<1x1x32xf32>
    %274 = vector.shape_cast %273 : vector<1x1x32xf32> to vector<1x32xf32>
    %275 = vector.shape_cast %270 : vector<1x32xf32> to vector<1x1x32xf32>
    tpu.vector_store %arg10[%272, %c0_154, %c0_155], %275 {strides = array<i32>} : memref<8x1x32xf32, #tpu.memory_space<vmem>>, vector<1x1x32xf32>,
    %c5_i32 = arith.constant 5 : i32
    %c0_156 = arith.constant 0 : index
    %c0_157 = arith.constant 0 : index
    %276 = vector.load %arg14[%c0_156, %c0_157] : memref<1x32xf32, #tpu.memory_space<vmem>>, vector<1x32xf32>
    %cst_158 = arith.constant dense<0.000000e+00> : vector<1x32xf32>
    %277 = tpu.matmul %276, %33, %cst_158 {dimension_numbers = #tpu.dot_dimension_numbers<[1], [0], [0], [1], [0, 0, 1, 1], [], []>} : vector<1x32xf32>, vector<32x32xf32>, vector<1x32xf32> -> vector<1x32xf32>
    %278 = arith.addf %277, %39 : vector<1x32xf32>
    %cst_159 = arith.constant dense<0.000000e+00> : vector<1x32xf32>
    %279 = tpu.matmul %276, %35, %cst_159 {dimension_numbers = #tpu.dot_dimension_numbers<[1], [0], [0], [1], [0, 0, 1, 1], [], []>} : vector<1x32xf32>, vector<32x32xf32>, vector<1x32xf32> -> vector<1x32xf32>
    %280 = arith.addf %279, %41 : vector<1x32xf32>
    %cst_160 = arith.constant dense<0.000000e+00> : vector<1x32xf32>
    %281 = tpu.matmul %276, %37, %cst_160 {dimension_numbers = #tpu.dot_dimension_numbers<[1], [0], [0], [1], [0, 0, 1, 1], [], []>} : vector<1x32xf32>, vector<32x32xf32>, vector<1x32xf32> -> vector<1x32xf32>
    %282 = arith.addf %281, %43 : vector<1x32xf32>
    %283 = arith.index_cast %c5_i32 : i32 to index
    %c0_161 = arith.constant 0 : index
    %c0_162 = arith.constant 0 : index
    %284 = vector.load %arg11[%283, %c0_161, %c0_162] : memref<8x1x32xf32, #tpu.memory_space<vmem>>, vector<1x1x32xf32>
    %285 = vector.shape_cast %284 : vector<1x1x32xf32> to vector<1x32xf32>
    %286 = arith.addf %285, %278 : vector<1x32xf32>
    %287 = arith.negf %286 : vector<1x32xf32>
    %288 = math.exp %287 : vector<1x32xf32>
    %cst_163 = arith.constant 1.000000e+00 : f32
    %289 = vector.broadcast %cst_163 : f32 to vector<1x32xf32>
    %290 = arith.addf %289, %288 : vector<1x32xf32>
    %291 = arith.divf %289, %290 : vector<1x32xf32>
    %292 = arith.index_cast %c5_i32 : i32 to index
    %c0_164 = arith.constant 0 : index
    %c0_165 = arith.constant 0 : index
    %293 = vector.load %arg12[%292, %c0_164, %c0_165] : memref<8x1x32xf32, #tpu.memory_space<vmem>>, vector<1x1x32xf32>
    %294 = vector.shape_cast %293 : vector<1x1x32xf32> to vector<1x32xf32>
    %295 = arith.addf %294, %280 : vector<1x32xf32>
    %296 = arith.negf %295 : vector<1x32xf32>
    %297 = math.exp %296 : vector<1x32xf32>
    %cst_166 = arith.constant 1.000000e+00 : f32
    %298 = vector.broadcast %cst_166 : f32 to vector<1x32xf32>
    %299 = arith.addf %298, %297 : vector<1x32xf32>
    %300 = arith.divf %298, %299 : vector<1x32xf32>
    %301 = arith.index_cast %c5_i32 : i32 to index
    %c0_167 = arith.constant 0 : index
    %c0_168 = arith.constant 0 : index
    %302 = vector.load %arg13[%301, %c0_167, %c0_168] : memref<8x1x32xf32, #tpu.memory_space<vmem>>, vector<1x1x32xf32>
    %303 = vector.shape_cast %302 : vector<1x1x32xf32> to vector<1x32xf32>
    %304 = arith.mulf %291, %282 : vector<1x32xf32>
    %305 = arith.addf %303, %304 : vector<1x32xf32>
    %306 = math.tanh %305 : vector<1x32xf32>
    %cst_169 = arith.constant 1.000000e+00 : f32
    %307 = vector.broadcast %cst_169 : f32 to vector<1x32xf32>
    %308 = arith.subf %307, %300 : vector<1x32xf32>
    %309 = arith.mulf %308, %306 : vector<1x32xf32>
    %310 = arith.mulf %300, %276 : vector<1x32xf32>
    %311 = arith.addf %309, %310 : vector<1x32xf32>
    %312 = vector.broadcast %c5_i32 : i32 to vector<1x1xi32>
    %313 = arith.cmpi slt, %312, %1 : vector<1x1xi32>
    %314 = vector.shape_cast %313 : vector<1x1xi1> to vector<1x1xi1>
    %315 = vector.broadcast %314 : vector<1x1xi1> to vector<1x32xi1>
    %316 = arith.select %315, %311, %276 : vector<1x32xi1>, vector<1x32xf32>
    %c0_170 = arith.constant 0 : index
    %c0_171 = arith.constant 0 : index
    %317 = vector.load %arg14[%c0_170, %c0_171] : memref<1x32xf32, #tpu.memory_space<vmem>>, vector<1x32xf32>
    tpu.vector_store %arg14[%c0_170, %c0_171], %316 {strides = array<i32>} : memref<1x32xf32, #tpu.memory_space<vmem>>, vector<1x32xf32>,
    %318 = arith.index_cast %c5_i32 : i32 to index
    %c0_172 = arith.constant 0 : index
    %c0_173 = arith.constant 0 : index
    %319 = vector.load %arg10[%318, %c0_172, %c0_173] : memref<8x1x32xf32, #tpu.memory_space<vmem>>, vector<1x1x32xf32>
    %320 = vector.shape_cast %319 : vector<1x1x32xf32> to vector<1x32xf32>
    %321 = vector.shape_cast %316 : vector<1x32xf32> to vector<1x1x32xf32>
    tpu.vector_store %arg10[%318, %c0_172, %c0_173], %321 {strides = array<i32>} : memref<8x1x32xf32, #tpu.memory_space<vmem>>, vector<1x1x32xf32>,
    %c6_i32 = arith.constant 6 : i32
    %c0_174 = arith.constant 0 : index
    %c0_175 = arith.constant 0 : index
    %322 = vector.load %arg14[%c0_174, %c0_175] : memref<1x32xf32, #tpu.memory_space<vmem>>, vector<1x32xf32>
    %cst_176 = arith.constant dense<0.000000e+00> : vector<1x32xf32>
    %323 = tpu.matmul %322, %33, %cst_176 {dimension_numbers = #tpu.dot_dimension_numbers<[1], [0], [0], [1], [0, 0, 1, 1], [], []>} : vector<1x32xf32>, vector<32x32xf32>, vector<1x32xf32> -> vector<1x32xf32>
    %324 = arith.addf %323, %39 : vector<1x32xf32>
    %cst_177 = arith.constant dense<0.000000e+00> : vector<1x32xf32>
    %325 = tpu.matmul %322, %35, %cst_177 {dimension_numbers = #tpu.dot_dimension_numbers<[1], [0], [0], [1], [0, 0, 1, 1], [], []>} : vector<1x32xf32>, vector<32x32xf32>, vector<1x32xf32> -> vector<1x32xf32>
    %326 = arith.addf %325, %41 : vector<1x32xf32>
    %cst_178 = arith.constant dense<0.000000e+00> : vector<1x32xf32>
    %327 = tpu.matmul %322, %37, %cst_178 {dimension_numbers = #tpu.dot_dimension_numbers<[1], [0], [0], [1], [0, 0, 1, 1], [], []>} : vector<1x32xf32>, vector<32x32xf32>, vector<1x32xf32> -> vector<1x32xf32>
    %328 = arith.addf %327, %43 : vector<1x32xf32>
    %329 = arith.index_cast %c6_i32 : i32 to index
    %c0_179 = arith.constant 0 : index
    %c0_180 = arith.constant 0 : index
    %330 = vector.load %arg11[%329, %c0_179, %c0_180] : memref<8x1x32xf32, #tpu.memory_space<vmem>>, vector<1x1x32xf32>
    %331 = vector.shape_cast %330 : vector<1x1x32xf32> to vector<1x32xf32>
    %332 = arith.addf %331, %324 : vector<1x32xf32>
    %333 = arith.negf %332 : vector<1x32xf32>
    %334 = math.exp %333 : vector<1x32xf32>
    %cst_181 = arith.constant 1.000000e+00 : f32
    %335 = vector.broadcast %cst_181 : f32 to vector<1x32xf32>
    %336 = arith.addf %335, %334 : vector<1x32xf32>
    %337 = arith.divf %335, %336 : vector<1x32xf32>
    %338 = arith.index_cast %c6_i32 : i32 to index
    %c0_182 = arith.constant 0 : index
    %c0_183 = arith.constant 0 : index
    %339 = vector.load %arg12[%338, %c0_182, %c0_183] : memref<8x1x32xf32, #tpu.memory_space<vmem>>, vector<1x1x32xf32>
    %340 = vector.shape_cast %339 : vector<1x1x32xf32> to vector<1x32xf32>
    %341 = arith.addf %340, %326 : vector<1x32xf32>
    %342 = arith.negf %341 : vector<1x32xf32>
    %343 = math.exp %342 : vector<1x32xf32>
    %cst_184 = arith.constant 1.000000e+00 : f32
    %344 = vector.broadcast %cst_184 : f32 to vector<1x32xf32>
    %345 = arith.addf %344, %343 : vector<1x32xf32>
    %346 = arith.divf %344, %345 : vector<1x32xf32>
    %347 = arith.index_cast %c6_i32 : i32 to index
    %c0_185 = arith.constant 0 : index
    %c0_186 = arith.constant 0 : index
    %348 = vector.load %arg13[%347, %c0_185, %c0_186] : memref<8x1x32xf32, #tpu.memory_space<vmem>>, vector<1x1x32xf32>
    %349 = vector.shape_cast %348 : vector<1x1x32xf32> to vector<1x32xf32>
    %350 = arith.mulf %337, %328 : vector<1x32xf32>
    %351 = arith.addf %349, %350 : vector<1x32xf32>
    %352 = math.tanh %351 : vector<1x32xf32>
    %cst_187 = arith.constant 1.000000e+00 : f32
    %353 = vector.broadcast %cst_187 : f32 to vector<1x32xf32>
    %354 = arith.subf %353, %346 : vector<1x32xf32>
    %355 = arith.mulf %354, %352 : vector<1x32xf32>
    %356 = arith.mulf %346, %322 : vector<1x32xf32>
    %357 = arith.addf %355, %356 : vector<1x32xf32>
    %358 = vector.broadcast %c6_i32 : i32 to vector<1x1xi32>
    %359 = arith.cmpi slt, %358, %1 : vector<1x1xi32>
    %360 = vector.shape_cast %359 : vector<1x1xi1> to vector<1x1xi1>
    %361 = vector.broadcast %360 : vector<1x1xi1> to vector<1x32xi1>
    %362 = arith.select %361, %357, %322 : vector<1x32xi1>, vector<1x32xf32>
    %c0_188 = arith.constant 0 : index
    %c0_189 = arith.constant 0 : index
    %363 = vector.load %arg14[%c0_188, %c0_189] : memref<1x32xf32, #tpu.memory_space<vmem>>, vector<1x32xf32>
    tpu.vector_store %arg14[%c0_188, %c0_189], %362 {strides = array<i32>} : memref<1x32xf32, #tpu.memory_space<vmem>>, vector<1x32xf32>,
    %364 = arith.index_cast %c6_i32 : i32 to index
    %c0_190 = arith.constant 0 : index
    %c0_191 = arith.constant 0 : index
    %365 = vector.load %arg10[%364, %c0_190, %c0_191] : memref<8x1x32xf32, #tpu.memory_space<vmem>>, vector<1x1x32xf32>
    %366 = vector.shape_cast %365 : vector<1x1x32xf32> to vector<1x32xf32>
    %367 = vector.shape_cast %362 : vector<1x32xf32> to vector<1x1x32xf32>
    tpu.vector_store %arg10[%364, %c0_190, %c0_191], %367 {strides = array<i32>} : memref<8x1x32xf32, #tpu.memory_space<vmem>>, vector<1x1x32xf32>,
    %c7_i32 = arith.constant 7 : i32
    %c0_192 = arith.constant 0 : index
    %c0_193 = arith.constant 0 : index
    %368 = vector.load %arg14[%c0_192, %c0_193] : memref<1x32xf32, #tpu.memory_space<vmem>>, vector<1x32xf32>
    %cst_194 = arith.constant dense<0.000000e+00> : vector<1x32xf32>
    %369 = tpu.matmul %368, %33, %cst_194 {dimension_numbers = #tpu.dot_dimension_numbers<[1], [0], [0], [1], [0, 0, 1, 1], [], []>} : vector<1x32xf32>, vector<32x32xf32>, vector<1x32xf32> -> vector<1x32xf32>
    %370 = arith.addf %369, %39 : vector<1x32xf32>
    %cst_195 = arith.constant dense<0.000000e+00> : vector<1x32xf32>
    %371 = tpu.matmul %368, %35, %cst_195 {dimension_numbers = #tpu.dot_dimension_numbers<[1], [0], [0], [1], [0, 0, 1, 1], [], []>} : vector<1x32xf32>, vector<32x32xf32>, vector<1x32xf32> -> vector<1x32xf32>
    %372 = arith.addf %371, %41 : vector<1x32xf32>
    %cst_196 = arith.constant dense<0.000000e+00> : vector<1x32xf32>
    %373 = tpu.matmul %368, %37, %cst_196 {dimension_numbers = #tpu.dot_dimension_numbers<[1], [0], [0], [1], [0, 0, 1, 1], [], []>} : vector<1x32xf32>, vector<32x32xf32>, vector<1x32xf32> -> vector<1x32xf32>
    %374 = arith.addf %373, %43 : vector<1x32xf32>
    %375 = arith.index_cast %c7_i32 : i32 to index
    %c0_197 = arith.constant 0 : index
    %c0_198 = arith.constant 0 : index
    %376 = vector.load %arg11[%375, %c0_197, %c0_198] : memref<8x1x32xf32, #tpu.memory_space<vmem>>, vector<1x1x32xf32>
    %377 = vector.shape_cast %376 : vector<1x1x32xf32> to vector<1x32xf32>
    %378 = arith.addf %377, %370 : vector<1x32xf32>
    %379 = arith.negf %378 : vector<1x32xf32>
    %380 = math.exp %379 : vector<1x32xf32>
    %cst_199 = arith.constant 1.000000e+00 : f32
    %381 = vector.broadcast %cst_199 : f32 to vector<1x32xf32>
    %382 = arith.addf %381, %380 : vector<1x32xf32>
    %383 = arith.divf %381, %382 : vector<1x32xf32>
    %384 = arith.index_cast %c7_i32 : i32 to index
    %c0_200 = arith.constant 0 : index
    %c0_201 = arith.constant 0 : index
    %385 = vector.load %arg12[%384, %c0_200, %c0_201] : memref<8x1x32xf32, #tpu.memory_space<vmem>>, vector<1x1x32xf32>
    %386 = vector.shape_cast %385 : vector<1x1x32xf32> to vector<1x32xf32>
    %387 = arith.addf %386, %372 : vector<1x32xf32>
    %388 = arith.negf %387 : vector<1x32xf32>
    %389 = math.exp %388 : vector<1x32xf32>
    %cst_202 = arith.constant 1.000000e+00 : f32
    %390 = vector.broadcast %cst_202 : f32 to vector<1x32xf32>
    %391 = arith.addf %390, %389 : vector<1x32xf32>
    %392 = arith.divf %390, %391 : vector<1x32xf32>
    %393 = arith.index_cast %c7_i32 : i32 to index
    %c0_203 = arith.constant 0 : index
    %c0_204 = arith.constant 0 : index
    %394 = vector.load %arg13[%393, %c0_203, %c0_204] : memref<8x1x32xf32, #tpu.memory_space<vmem>>, vector<1x1x32xf32>
    %395 = vector.shape_cast %394 : vector<1x1x32xf32> to vector<1x32xf32>
    %396 = arith.mulf %383, %374 : vector<1x32xf32>
    %397 = arith.addf %395, %396 : vector<1x32xf32>
    %398 = math.tanh %397 : vector<1x32xf32>
    %cst_205 = arith.constant 1.000000e+00 : f32
    %399 = vector.broadcast %cst_205 : f32 to vector<1x32xf32>
    %400 = arith.subf %399, %392 : vector<1x32xf32>
    %401 = arith.mulf %400, %398 : vector<1x32xf32>
    %402 = arith.mulf %392, %368 : vector<1x32xf32>
    %403 = arith.addf %401, %402 : vector<1x32xf32>
    %404 = vector.broadcast %c7_i32 : i32 to vector<1x1xi32>
    %405 = arith.cmpi slt, %404, %1 : vector<1x1xi32>
    %406 = vector.shape_cast %405 : vector<1x1xi1> to vector<1x1xi1>
    %407 = vector.broadcast %406 : vector<1x1xi1> to vector<1x32xi1>
    %408 = arith.select %407, %403, %368 : vector<1x32xi1>, vector<1x32xf32>
    %c0_206 = arith.constant 0 : index
    %c0_207 = arith.constant 0 : index
    %409 = vector.load %arg14[%c0_206, %c0_207] : memref<1x32xf32, #tpu.memory_space<vmem>>, vector<1x32xf32>
    tpu.vector_store %arg14[%c0_206, %c0_207], %408 {strides = array<i32>} : memref<1x32xf32, #tpu.memory_space<vmem>>, vector<1x32xf32>,
    %410 = arith.index_cast %c7_i32 : i32 to index
    %c0_208 = arith.constant 0 : index
    %c0_209 = arith.constant 0 : index
    %411 = vector.load %arg10[%410, %c0_208, %c0_209] : memref<8x1x32xf32, #tpu.memory_space<vmem>>, vector<1x1x32xf32>
    %412 = vector.shape_cast %411 : vector<1x1x32xf32> to vector<1x32xf32>
    %413 = vector.shape_cast %408 : vector<1x32xf32> to vector<1x1x32xf32>
    tpu.vector_store %arg10[%410, %c0_208, %c0_209], %413 {strides = array<i32>} : memref<8x1x32xf32, #tpu.memory_space<vmem>>, vector<1x1x32xf32>,
    %c8_i32 = arith.constant 8 : i32
    %c0_210 = arith.constant 0 : index
    %c0_211 = arith.constant 0 : index
    %c0_212 = arith.constant 0 : index
    %414 = vector.load %arg10[%c0_210, %c0_211, %c0_212] : memref<8x1x32xf32, #tpu.memory_space<vmem>>, vector<8x1x32xf32>
    %415 = vector.shape_cast %414 : vector<8x1x32xf32> to vector<8x32xf32>
    %c1_213 = arith.constant 1 : index
    %c0_214 = arith.constant 0 : index
    %c0_215 = arith.constant 0 : index
    %c0_216 = arith.constant 0 : index
    %416 = vector.load %arg3[%c1_213, %c0_214, %c0_215, %c0_216] : memref<2x3x32x32xf32, #tpu.memory_space<vmem>>, vector<1x1x32x32xf32>
    %417 = vector.shape_cast %416 : vector<1x1x32x32xf32> to vector<32x32xf32>
    %cst_217 = arith.constant dense<0.000000e+00> : vector<8x32xf32>
    %418 = tpu.matmul %415, %417, %cst_217 {dimension_numbers = #tpu.dot_dimension_numbers<[1], [0], [0], [1], [0, 0, 1, 1], [], []>} : vector<8x32xf32>, vector<32x32xf32>, vector<8x32xf32> -> vector<8x32xf32>
    %c1_218 = arith.constant 1 : index
    %c0_219 = arith.constant 0 : index
    %c0_220 = arith.constant 0 : index
    %c0_221 = arith.constant 0 : index
    %419 = vector.load %arg5[%c1_218, %c0_219, %c0_220, %c0_221] : memref<2x3x1x32xf32, #tpu.memory_space<vmem>>, vector<1x1x1x32xf32>
    %420 = vector.shape_cast %419 : vector<1x1x1x32xf32> to vector<1x32xf32>
    %421 = vector.broadcast %420 : vector<1x32xf32> to vector<8x32xf32>
    %422 = arith.addf %418, %421 : vector<8x32xf32>
    %423 = vector.shape_cast %422 : vector<8x32xf32> to vector<8x1x32xf32>
    %c0_222 = arith.constant 0 : index
    %c0_223 = arith.constant 0 : index
    %c0_224 = arith.constant 0 : index
    %424 = vector.load %arg11[%c0_222, %c0_223, %c0_224] : memref<8x1x32xf32, #tpu.memory_space<vmem>>, vector<8x1x32xf32>
    tpu.vector_store %arg11[%c0_222, %c0_223, %c0_224], %423 {strides = array<i32>} : memref<8x1x32xf32, #tpu.memory_space<vmem>>, vector<8x1x32xf32>,
    %c1_225 = arith.constant 1 : index
    %c1_226 = arith.constant 1 : index
    %c0_227 = arith.constant 0 : index
    %c0_228 = arith.constant 0 : index
    %425 = vector.load %arg3[%c1_225, %c1_226, %c0_227, %c0_228] : memref<2x3x32x32xf32, #tpu.memory_space<vmem>>, vector<1x1x32x32xf32>
    %426 = vector.shape_cast %425 : vector<1x1x32x32xf32> to vector<32x32xf32>
    %cst_229 = arith.constant dense<0.000000e+00> : vector<8x32xf32>
    %427 = tpu.matmul %415, %426, %cst_229 {dimension_numbers = #tpu.dot_dimension_numbers<[1], [0], [0], [1], [0, 0, 1, 1], [], []>} : vector<8x32xf32>, vector<32x32xf32>, vector<8x32xf32> -> vector<8x32xf32>
    %c1_230 = arith.constant 1 : index
    %c1_231 = arith.constant 1 : index
    %c0_232 = arith.constant 0 : index
    %c0_233 = arith.constant 0 : index
    %428 = vector.load %arg5[%c1_230, %c1_231, %c0_232, %c0_233] : memref<2x3x1x32xf32, #tpu.memory_space<vmem>>, vector<1x1x1x32xf32>
    %429 = vector.shape_cast %428 : vector<1x1x1x32xf32> to vector<1x32xf32>
    %430 = vector.broadcast %429 : vector<1x32xf32> to vector<8x32xf32>
    %431 = arith.addf %427, %430 : vector<8x32xf32>
    %432 = vector.shape_cast %431 : vector<8x32xf32> to vector<8x1x32xf32>
    %c0_234 = arith.constant 0 : index
    %c0_235 = arith.constant 0 : index
    %c0_236 = arith.constant 0 : index
    %433 = vector.load %arg12[%c0_234, %c0_235, %c0_236] : memref<8x1x32xf32, #tpu.memory_space<vmem>>, vector<8x1x32xf32>
    tpu.vector_store %arg12[%c0_234, %c0_235, %c0_236], %432 {strides = array<i32>} : memref<8x1x32xf32, #tpu.memory_space<vmem>>, vector<8x1x32xf32>,
    %c1_237 = arith.constant 1 : index
    %c2_238 = arith.constant 2 : index
    %c0_239 = arith.constant 0 : index
    %c0_240 = arith.constant 0 : index
    %434 = vector.load %arg3[%c1_237, %c2_238, %c0_239, %c0_240] : memref<2x3x32x32xf32, #tpu.memory_space<vmem>>, vector<1x1x32x32xf32>
    %435 = vector.shape_cast %434 : vector<1x1x32x32xf32> to vector<32x32xf32>
    %cst_241 = arith.constant dense<0.000000e+00> : vector<8x32xf32>
    %436 = tpu.matmul %415, %435, %cst_241 {dimension_numbers = #tpu.dot_dimension_numbers<[1], [0], [0], [1], [0, 0, 1, 1], [], []>} : vector<8x32xf32>, vector<32x32xf32>, vector<8x32xf32> -> vector<8x32xf32>
    %c1_242 = arith.constant 1 : index
    %c2_243 = arith.constant 2 : index
    %c0_244 = arith.constant 0 : index
    %c0_245 = arith.constant 0 : index
    %437 = vector.load %arg5[%c1_242, %c2_243, %c0_244, %c0_245] : memref<2x3x1x32xf32, #tpu.memory_space<vmem>>, vector<1x1x1x32xf32>
    %438 = vector.shape_cast %437 : vector<1x1x1x32xf32> to vector<1x32xf32>
    %439 = vector.broadcast %438 : vector<1x32xf32> to vector<8x32xf32>
    %440 = arith.addf %436, %439 : vector<8x32xf32>
    %441 = vector.shape_cast %440 : vector<8x32xf32> to vector<8x1x32xf32>
    %c0_246 = arith.constant 0 : index
    %c0_247 = arith.constant 0 : index
    %c0_248 = arith.constant 0 : index
    %442 = vector.load %arg13[%c0_246, %c0_247, %c0_248] : memref<8x1x32xf32, #tpu.memory_space<vmem>>, vector<8x1x32xf32>
    tpu.vector_store %arg13[%c0_246, %c0_247, %c0_248], %441 {strides = array<i32>} : memref<8x1x32xf32, #tpu.memory_space<vmem>>, vector<8x1x32xf32>,
    %c1_249 = arith.constant 1 : index
    %c0_250 = arith.constant 0 : index
    %c0_251 = arith.constant 0 : index
    %c0_252 = arith.constant 0 : index
    %443 = vector.load %arg4[%c1_249, %c0_250, %c0_251, %c0_252] : memref<2x3x32x32xf32, #tpu.memory_space<vmem>>, vector<1x1x32x32xf32>
    %444 = vector.shape_cast %443 : vector<1x1x32x32xf32> to vector<32x32xf32>
    %c1_253 = arith.constant 1 : index
    %c1_254 = arith.constant 1 : index
    %c0_255 = arith.constant 0 : index
    %c0_256 = arith.constant 0 : index
    %445 = vector.load %arg4[%c1_253, %c1_254, %c0_255, %c0_256] : memref<2x3x32x32xf32, #tpu.memory_space<vmem>>, vector<1x1x32x32xf32>
    %446 = vector.shape_cast %445 : vector<1x1x32x32xf32> to vector<32x32xf32>
    %c1_257 = arith.constant 1 : index
    %c2_258 = arith.constant 2 : index
    %c0_259 = arith.constant 0 : index
    %c0_260 = arith.constant 0 : index
    %447 = vector.load %arg4[%c1_257, %c2_258, %c0_259, %c0_260] : memref<2x3x32x32xf32, #tpu.memory_space<vmem>>, vector<1x1x32x32xf32>
    %448 = vector.shape_cast %447 : vector<1x1x32x32xf32> to vector<32x32xf32>
    %c1_261 = arith.constant 1 : index
    %c0_262 = arith.constant 0 : index
    %c0_263 = arith.constant 0 : index
    %c0_264 = arith.constant 0 : index
    %449 = vector.load %arg6[%c1_261, %c0_262, %c0_263, %c0_264] : memref<2x3x1x32xf32, #tpu.memory_space<vmem>>, vector<1x1x1x32xf32>
    %450 = vector.shape_cast %449 : vector<1x1x1x32xf32> to vector<1x32xf32>
    %c1_265 = arith.constant 1 : index
    %c1_266 = arith.constant 1 : index
    %c0_267 = arith.constant 0 : index
    %c0_268 = arith.constant 0 : index
    %451 = vector.load %arg6[%c1_265, %c1_266, %c0_267, %c0_268] : memref<2x3x1x32xf32, #tpu.memory_space<vmem>>, vector<1x1x1x32xf32>
    %452 = vector.shape_cast %451 : vector<1x1x1x32xf32> to vector<1x32xf32>
    %c1_269 = arith.constant 1 : index
    %c2_270 = arith.constant 2 : index
    %c0_271 = arith.constant 0 : index
    %c0_272 = arith.constant 0 : index
    %453 = vector.load %arg6[%c1_269, %c2_270, %c0_271, %c0_272] : memref<2x3x1x32xf32, #tpu.memory_space<vmem>>, vector<1x1x1x32xf32>
    %454 = vector.shape_cast %453 : vector<1x1x1x32xf32> to vector<1x32xf32>
    %cst_273 = arith.constant 0.000000e+00 : f32
    %455 = vector.broadcast %cst_273 : f32 to vector<1x32xf32>
    %c0_274 = arith.constant 0 : index
    %c0_275 = arith.constant 0 : index
    %456 = vector.load %arg14[%c0_274, %c0_275] : memref<1x32xf32, #tpu.memory_space<vmem>>, vector<1x32xf32>
    tpu.vector_store %arg14[%c0_274, %c0_275], %455 {strides = array<i32>} : memref<1x32xf32, #tpu.memory_space<vmem>>, vector<1x32xf32>,
    %c0_i32_276 = arith.constant 0 : i32
    %c0_277 = arith.constant 0 : index
    %c0_278 = arith.constant 0 : index
    %457 = vector.load %arg14[%c0_277, %c0_278] : memref<1x32xf32, #tpu.memory_space<vmem>>, vector<1x32xf32>
    %cst_279 = arith.constant dense<0.000000e+00> : vector<1x32xf32>
    %458 = tpu.matmul %457, %444, %cst_279 {dimension_numbers = #tpu.dot_dimension_numbers<[1], [0], [0], [1], [0, 0, 1, 1], [], []>} : vector<1x32xf32>, vector<32x32xf32>, vector<1x32xf32> -> vector<1x32xf32>
    %459 = arith.addf %458, %450 : vector<1x32xf32>
    %cst_280 = arith.constant dense<0.000000e+00> : vector<1x32xf32>
    %460 = tpu.matmul %457, %446, %cst_280 {dimension_numbers = #tpu.dot_dimension_numbers<[1], [0], [0], [1], [0, 0, 1, 1], [], []>} : vector<1x32xf32>, vector<32x32xf32>, vector<1x32xf32> -> vector<1x32xf32>
    %461 = arith.addf %460, %452 : vector<1x32xf32>
    %cst_281 = arith.constant dense<0.000000e+00> : vector<1x32xf32>
    %462 = tpu.matmul %457, %448, %cst_281 {dimension_numbers = #tpu.dot_dimension_numbers<[1], [0], [0], [1], [0, 0, 1, 1], [], []>} : vector<1x32xf32>, vector<32x32xf32>, vector<1x32xf32> -> vector<1x32xf32>
    %463 = arith.addf %462, %454 : vector<1x32xf32>
    %464 = arith.index_cast %c0_i32_276 : i32 to index
    %c0_282 = arith.constant 0 : index
    %c0_283 = arith.constant 0 : index
    %465 = vector.load %arg11[%464, %c0_282, %c0_283] : memref<8x1x32xf32, #tpu.memory_space<vmem>>, vector<1x1x32xf32>
    %466 = vector.shape_cast %465 : vector<1x1x32xf32> to vector<1x32xf32>
    %467 = arith.addf %466, %459 : vector<1x32xf32>
    %468 = arith.negf %467 : vector<1x32xf32>
    %469 = math.exp %468 : vector<1x32xf32>
    %cst_284 = arith.constant 1.000000e+00 : f32
    %470 = vector.broadcast %cst_284 : f32 to vector<1x32xf32>
    %471 = arith.addf %470, %469 : vector<1x32xf32>
    %472 = arith.divf %470, %471 : vector<1x32xf32>
    %473 = arith.index_cast %c0_i32_276 : i32 to index
    %c0_285 = arith.constant 0 : index
    %c0_286 = arith.constant 0 : index
    %474 = vector.load %arg12[%473, %c0_285, %c0_286] : memref<8x1x32xf32, #tpu.memory_space<vmem>>, vector<1x1x32xf32>
    %475 = vector.shape_cast %474 : vector<1x1x32xf32> to vector<1x32xf32>
    %476 = arith.addf %475, %461 : vector<1x32xf32>
    %477 = arith.negf %476 : vector<1x32xf32>
    %478 = math.exp %477 : vector<1x32xf32>
    %cst_287 = arith.constant 1.000000e+00 : f32
    %479 = vector.broadcast %cst_287 : f32 to vector<1x32xf32>
    %480 = arith.addf %479, %478 : vector<1x32xf32>
    %481 = arith.divf %479, %480 : vector<1x32xf32>
    %482 = arith.index_cast %c0_i32_276 : i32 to index
    %c0_288 = arith.constant 0 : index
    %c0_289 = arith.constant 0 : index
    %483 = vector.load %arg13[%482, %c0_288, %c0_289] : memref<8x1x32xf32, #tpu.memory_space<vmem>>, vector<1x1x32xf32>
    %484 = vector.shape_cast %483 : vector<1x1x32xf32> to vector<1x32xf32>
    %485 = arith.mulf %472, %463 : vector<1x32xf32>
    %486 = arith.addf %484, %485 : vector<1x32xf32>
    %487 = math.tanh %486 : vector<1x32xf32>
    %cst_290 = arith.constant 1.000000e+00 : f32
    %488 = vector.broadcast %cst_290 : f32 to vector<1x32xf32>
    %489 = arith.subf %488, %481 : vector<1x32xf32>
    %490 = arith.mulf %489, %487 : vector<1x32xf32>
    %491 = arith.mulf %481, %457 : vector<1x32xf32>
    %492 = arith.addf %490, %491 : vector<1x32xf32>
    %493 = vector.broadcast %c0_i32_276 : i32 to vector<1x1xi32>
    %494 = arith.cmpi slt, %493, %1 : vector<1x1xi32>
    %495 = vector.shape_cast %494 : vector<1x1xi1> to vector<1x1xi1>
    %496 = vector.broadcast %495 : vector<1x1xi1> to vector<1x32xi1>
    %497 = arith.select %496, %492, %457 : vector<1x32xi1>, vector<1x32xf32>
    %c0_291 = arith.constant 0 : index
    %c0_292 = arith.constant 0 : index
    %498 = vector.load %arg14[%c0_291, %c0_292] : memref<1x32xf32, #tpu.memory_space<vmem>>, vector<1x32xf32>
    tpu.vector_store %arg14[%c0_291, %c0_292], %497 {strides = array<i32>} : memref<1x32xf32, #tpu.memory_space<vmem>>, vector<1x32xf32>,
    %499 = arith.index_cast %c0_i32_276 : i32 to index
    %c0_293 = arith.constant 0 : index
    %c0_294 = arith.constant 0 : index
    %500 = vector.load %arg10[%499, %c0_293, %c0_294] : memref<8x1x32xf32, #tpu.memory_space<vmem>>, vector<1x1x32xf32>
    %501 = vector.shape_cast %500 : vector<1x1x32xf32> to vector<1x32xf32>
    %502 = vector.shape_cast %497 : vector<1x32xf32> to vector<1x1x32xf32>
    tpu.vector_store %arg10[%499, %c0_293, %c0_294], %502 {strides = array<i32>} : memref<8x1x32xf32, #tpu.memory_space<vmem>>, vector<1x1x32xf32>,
    %c1_i32_295 = arith.constant 1 : i32
    %c0_296 = arith.constant 0 : index
    %c0_297 = arith.constant 0 : index
    %503 = vector.load %arg14[%c0_296, %c0_297] : memref<1x32xf32, #tpu.memory_space<vmem>>, vector<1x32xf32>
    %cst_298 = arith.constant dense<0.000000e+00> : vector<1x32xf32>
    %504 = tpu.matmul %503, %444, %cst_298 {dimension_numbers = #tpu.dot_dimension_numbers<[1], [0], [0], [1], [0, 0, 1, 1], [], []>} : vector<1x32xf32>, vector<32x32xf32>, vector<1x32xf32> -> vector<1x32xf32>
    %505 = arith.addf %504, %450 : vector<1x32xf32>
    %cst_299 = arith.constant dense<0.000000e+00> : vector<1x32xf32>
    %506 = tpu.matmul %503, %446, %cst_299 {dimension_numbers = #tpu.dot_dimension_numbers<[1], [0], [0], [1], [0, 0, 1, 1], [], []>} : vector<1x32xf32>, vector<32x32xf32>, vector<1x32xf32> -> vector<1x32xf32>
    %507 = arith.addf %506, %452 : vector<1x32xf32>
    %cst_300 = arith.constant dense<0.000000e+00> : vector<1x32xf32>
    %508 = tpu.matmul %503, %448, %cst_300 {dimension_numbers = #tpu.dot_dimension_numbers<[1], [0], [0], [1], [0, 0, 1, 1], [], []>} : vector<1x32xf32>, vector<32x32xf32>, vector<1x32xf32> -> vector<1x32xf32>
    %509 = arith.addf %508, %454 : vector<1x32xf32>
    %510 = arith.index_cast %c1_i32_295 : i32 to index
    %c0_301 = arith.constant 0 : index
    %c0_302 = arith.constant 0 : index
    %511 = vector.load %arg11[%510, %c0_301, %c0_302] : memref<8x1x32xf32, #tpu.memory_space<vmem>>, vector<1x1x32xf32>
    %512 = vector.shape_cast %511 : vector<1x1x32xf32> to vector<1x32xf32>
    %513 = arith.addf %512, %505 : vector<1x32xf32>
    %514 = arith.negf %513 : vector<1x32xf32>
    %515 = math.exp %514 : vector<1x32xf32>
    %cst_303 = arith.constant 1.000000e+00 : f32
    %516 = vector.broadcast %cst_303 : f32 to vector<1x32xf32>
    %517 = arith.addf %516, %515 : vector<1x32xf32>
    %518 = arith.divf %516, %517 : vector<1x32xf32>
    %519 = arith.index_cast %c1_i32_295 : i32 to index
    %c0_304 = arith.constant 0 : index
    %c0_305 = arith.constant 0 : index
    %520 = vector.load %arg12[%519, %c0_304, %c0_305] : memref<8x1x32xf32, #tpu.memory_space<vmem>>, vector<1x1x32xf32>
    %521 = vector.shape_cast %520 : vector<1x1x32xf32> to vector<1x32xf32>
    %522 = arith.addf %521, %507 : vector<1x32xf32>
    %523 = arith.negf %522 : vector<1x32xf32>
    %524 = math.exp %523 : vector<1x32xf32>
    %cst_306 = arith.constant 1.000000e+00 : f32
    %525 = vector.broadcast %cst_306 : f32 to vector<1x32xf32>
    %526 = arith.addf %525, %524 : vector<1x32xf32>
    %527 = arith.divf %525, %526 : vector<1x32xf32>
    %528 = arith.index_cast %c1_i32_295 : i32 to index
    %c0_307 = arith.constant 0 : index
    %c0_308 = arith.constant 0 : index
    %529 = vector.load %arg13[%528, %c0_307, %c0_308] : memref<8x1x32xf32, #tpu.memory_space<vmem>>, vector<1x1x32xf32>
    %530 = vector.shape_cast %529 : vector<1x1x32xf32> to vector<1x32xf32>
    %531 = arith.mulf %518, %509 : vector<1x32xf32>
    %532 = arith.addf %530, %531 : vector<1x32xf32>
    %533 = math.tanh %532 : vector<1x32xf32>
    %cst_309 = arith.constant 1.000000e+00 : f32
    %534 = vector.broadcast %cst_309 : f32 to vector<1x32xf32>
    %535 = arith.subf %534, %527 : vector<1x32xf32>
    %536 = arith.mulf %535, %533 : vector<1x32xf32>
    %537 = arith.mulf %527, %503 : vector<1x32xf32>
    %538 = arith.addf %536, %537 : vector<1x32xf32>
    %539 = vector.broadcast %c1_i32_295 : i32 to vector<1x1xi32>
    %540 = arith.cmpi slt, %539, %1 : vector<1x1xi32>
    %541 = vector.shape_cast %540 : vector<1x1xi1> to vector<1x1xi1>
    %542 = vector.broadcast %541 : vector<1x1xi1> to vector<1x32xi1>
    %543 = arith.select %542, %538, %503 : vector<1x32xi1>, vector<1x32xf32>
    %c0_310 = arith.constant 0 : index
    %c0_311 = arith.constant 0 : index
    %544 = vector.load %arg14[%c0_310, %c0_311] : memref<1x32xf32, #tpu.memory_space<vmem>>, vector<1x32xf32>
    tpu.vector_store %arg14[%c0_310, %c0_311], %543 {strides = array<i32>} : memref<1x32xf32, #tpu.memory_space<vmem>>, vector<1x32xf32>,
    %545 = arith.index_cast %c1_i32_295 : i32 to index
    %c0_312 = arith.constant 0 : index
    %c0_313 = arith.constant 0 : index
    %546 = vector.load %arg10[%545, %c0_312, %c0_313] : memref<8x1x32xf32, #tpu.memory_space<vmem>>, vector<1x1x32xf32>
    %547 = vector.shape_cast %546 : vector<1x1x32xf32> to vector<1x32xf32>
    %548 = vector.shape_cast %543 : vector<1x32xf32> to vector<1x1x32xf32>
    tpu.vector_store %arg10[%545, %c0_312, %c0_313], %548 {strides = array<i32>} : memref<8x1x32xf32, #tpu.memory_space<vmem>>, vector<1x1x32xf32>,
    %c2_i32_314 = arith.constant 2 : i32
    %c0_315 = arith.constant 0 : index
    %c0_316 = arith.constant 0 : index
    %549 = vector.load %arg14[%c0_315, %c0_316] : memref<1x32xf32, #tpu.memory_space<vmem>>, vector<1x32xf32>
    %cst_317 = arith.constant dense<0.000000e+00> : vector<1x32xf32>
    %550 = tpu.matmul %549, %444, %cst_317 {dimension_numbers = #tpu.dot_dimension_numbers<[1], [0], [0], [1], [0, 0, 1, 1], [], []>} : vector<1x32xf32>, vector<32x32xf32>, vector<1x32xf32> -> vector<1x32xf32>
    %551 = arith.addf %550, %450 : vector<1x32xf32>
    %cst_318 = arith.constant dense<0.000000e+00> : vector<1x32xf32>
    %552 = tpu.matmul %549, %446, %cst_318 {dimension_numbers = #tpu.dot_dimension_numbers<[1], [0], [0], [1], [0, 0, 1, 1], [], []>} : vector<1x32xf32>, vector<32x32xf32>, vector<1x32xf32> -> vector<1x32xf32>
    %553 = arith.addf %552, %452 : vector<1x32xf32>
    %cst_319 = arith.constant dense<0.000000e+00> : vector<1x32xf32>
    %554 = tpu.matmul %549, %448, %cst_319 {dimension_numbers = #tpu.dot_dimension_numbers<[1], [0], [0], [1], [0, 0, 1, 1], [], []>} : vector<1x32xf32>, vector<32x32xf32>, vector<1x32xf32> -> vector<1x32xf32>
    %555 = arith.addf %554, %454 : vector<1x32xf32>
    %556 = arith.index_cast %c2_i32_314 : i32 to index
    %c0_320 = arith.constant 0 : index
    %c0_321 = arith.constant 0 : index
    %557 = vector.load %arg11[%556, %c0_320, %c0_321] : memref<8x1x32xf32, #tpu.memory_space<vmem>>, vector<1x1x32xf32>
    %558 = vector.shape_cast %557 : vector<1x1x32xf32> to vector<1x32xf32>
    %559 = arith.addf %558, %551 : vector<1x32xf32>
    %560 = arith.negf %559 : vector<1x32xf32>
    %561 = math.exp %560 : vector<1x32xf32>
    %cst_322 = arith.constant 1.000000e+00 : f32
    %562 = vector.broadcast %cst_322 : f32 to vector<1x32xf32>
    %563 = arith.addf %562, %561 : vector<1x32xf32>
    %564 = arith.divf %562, %563 : vector<1x32xf32>
    %565 = arith.index_cast %c2_i32_314 : i32 to index
    %c0_323 = arith.constant 0 : index
    %c0_324 = arith.constant 0 : index
    %566 = vector.load %arg12[%565, %c0_323, %c0_324] : memref<8x1x32xf32, #tpu.memory_space<vmem>>, vector<1x1x32xf32>
    %567 = vector.shape_cast %566 : vector<1x1x32xf32> to vector<1x32xf32>
    %568 = arith.addf %567, %553 : vector<1x32xf32>
    %569 = arith.negf %568 : vector<1x32xf32>
    %570 = math.exp %569 : vector<1x32xf32>
    %cst_325 = arith.constant 1.000000e+00 : f32
    %571 = vector.broadcast %cst_325 : f32 to vector<1x32xf32>
    %572 = arith.addf %571, %570 : vector<1x32xf32>
    %573 = arith.divf %571, %572 : vector<1x32xf32>
    %574 = arith.index_cast %c2_i32_314 : i32 to index
    %c0_326 = arith.constant 0 : index
    %c0_327 = arith.constant 0 : index
    %575 = vector.load %arg13[%574, %c0_326, %c0_327] : memref<8x1x32xf32, #tpu.memory_space<vmem>>, vector<1x1x32xf32>
    %576 = vector.shape_cast %575 : vector<1x1x32xf32> to vector<1x32xf32>
    %577 = arith.mulf %564, %555 : vector<1x32xf32>
    %578 = arith.addf %576, %577 : vector<1x32xf32>
    %579 = math.tanh %578 : vector<1x32xf32>
    %cst_328 = arith.constant 1.000000e+00 : f32
    %580 = vector.broadcast %cst_328 : f32 to vector<1x32xf32>
    %581 = arith.subf %580, %573 : vector<1x32xf32>
    %582 = arith.mulf %581, %579 : vector<1x32xf32>
    %583 = arith.mulf %573, %549 : vector<1x32xf32>
    %584 = arith.addf %582, %583 : vector<1x32xf32>
    %585 = vector.broadcast %c2_i32_314 : i32 to vector<1x1xi32>
    %586 = arith.cmpi slt, %585, %1 : vector<1x1xi32>
    %587 = vector.shape_cast %586 : vector<1x1xi1> to vector<1x1xi1>
    %588 = vector.broadcast %587 : vector<1x1xi1> to vector<1x32xi1>
    %589 = arith.select %588, %584, %549 : vector<1x32xi1>, vector<1x32xf32>
    %c0_329 = arith.constant 0 : index
    %c0_330 = arith.constant 0 : index
    %590 = vector.load %arg14[%c0_329, %c0_330] : memref<1x32xf32, #tpu.memory_space<vmem>>, vector<1x32xf32>
    tpu.vector_store %arg14[%c0_329, %c0_330], %589 {strides = array<i32>} : memref<1x32xf32, #tpu.memory_space<vmem>>, vector<1x32xf32>,
    %591 = arith.index_cast %c2_i32_314 : i32 to index
    %c0_331 = arith.constant 0 : index
    %c0_332 = arith.constant 0 : index
    %592 = vector.load %arg10[%591, %c0_331, %c0_332] : memref<8x1x32xf32, #tpu.memory_space<vmem>>, vector<1x1x32xf32>
    %593 = vector.shape_cast %592 : vector<1x1x32xf32> to vector<1x32xf32>
    %594 = vector.shape_cast %589 : vector<1x32xf32> to vector<1x1x32xf32>
    tpu.vector_store %arg10[%591, %c0_331, %c0_332], %594 {strides = array<i32>} : memref<8x1x32xf32, #tpu.memory_space<vmem>>, vector<1x1x32xf32>,
    %c3_i32_333 = arith.constant 3 : i32
    %c0_334 = arith.constant 0 : index
    %c0_335 = arith.constant 0 : index
    %595 = vector.load %arg14[%c0_334, %c0_335] : memref<1x32xf32, #tpu.memory_space<vmem>>, vector<1x32xf32>
    %cst_336 = arith.constant dense<0.000000e+00> : vector<1x32xf32>
    %596 = tpu.matmul %595, %444, %cst_336 {dimension_numbers = #tpu.dot_dimension_numbers<[1], [0], [0], [1], [0, 0, 1, 1], [], []>} : vector<1x32xf32>, vector<32x32xf32>, vector<1x32xf32> -> vector<1x32xf32>
    %597 = arith.addf %596, %450 : vector<1x32xf32>
    %cst_337 = arith.constant dense<0.000000e+00> : vector<1x32xf32>
    %598 = tpu.matmul %595, %446, %cst_337 {dimension_numbers = #tpu.dot_dimension_numbers<[1], [0], [0], [1], [0, 0, 1, 1], [], []>} : vector<1x32xf32>, vector<32x32xf32>, vector<1x32xf32> -> vector<1x32xf32>
    %599 = arith.addf %598, %452 : vector<1x32xf32>
    %cst_338 = arith.constant dense<0.000000e+00> : vector<1x32xf32>
    %600 = tpu.matmul %595, %448, %cst_338 {dimension_numbers = #tpu.dot_dimension_numbers<[1], [0], [0], [1], [0, 0, 1, 1], [], []>} : vector<1x32xf32>, vector<32x32xf32>, vector<1x32xf32> -> vector<1x32xf32>
    %601 = arith.addf %600, %454 : vector<1x32xf32>
    %602 = arith.index_cast %c3_i32_333 : i32 to index
    %c0_339 = arith.constant 0 : index
    %c0_340 = arith.constant 0 : index
    %603 = vector.load %arg11[%602, %c0_339, %c0_340] : memref<8x1x32xf32, #tpu.memory_space<vmem>>, vector<1x1x32xf32>
    %604 = vector.shape_cast %603 : vector<1x1x32xf32> to vector<1x32xf32>
    %605 = arith.addf %604, %597 : vector<1x32xf32>
    %606 = arith.negf %605 : vector<1x32xf32>
    %607 = math.exp %606 : vector<1x32xf32>
    %cst_341 = arith.constant 1.000000e+00 : f32
    %608 = vector.broadcast %cst_341 : f32 to vector<1x32xf32>
    %609 = arith.addf %608, %607 : vector<1x32xf32>
    %610 = arith.divf %608, %609 : vector<1x32xf32>
    %611 = arith.index_cast %c3_i32_333 : i32 to index
    %c0_342 = arith.constant 0 : index
    %c0_343 = arith.constant 0 : index
    %612 = vector.load %arg12[%611, %c0_342, %c0_343] : memref<8x1x32xf32, #tpu.memory_space<vmem>>, vector<1x1x32xf32>
    %613 = vector.shape_cast %612 : vector<1x1x32xf32> to vector<1x32xf32>
    %614 = arith.addf %613, %599 : vector<1x32xf32>
    %615 = arith.negf %614 : vector<1x32xf32>
    %616 = math.exp %615 : vector<1x32xf32>
    %cst_344 = arith.constant 1.000000e+00 : f32
    %617 = vector.broadcast %cst_344 : f32 to vector<1x32xf32>
    %618 = arith.addf %617, %616 : vector<1x32xf32>
    %619 = arith.divf %617, %618 : vector<1x32xf32>
    %620 = arith.index_cast %c3_i32_333 : i32 to index
    %c0_345 = arith.constant 0 : index
    %c0_346 = arith.constant 0 : index
    %621 = vector.load %arg13[%620, %c0_345, %c0_346] : memref<8x1x32xf32, #tpu.memory_space<vmem>>, vector<1x1x32xf32>
    %622 = vector.shape_cast %621 : vector<1x1x32xf32> to vector<1x32xf32>
    %623 = arith.mulf %610, %601 : vector<1x32xf32>
    %624 = arith.addf %622, %623 : vector<1x32xf32>
    %625 = math.tanh %624 : vector<1x32xf32>
    %cst_347 = arith.constant 1.000000e+00 : f32
    %626 = vector.broadcast %cst_347 : f32 to vector<1x32xf32>
    %627 = arith.subf %626, %619 : vector<1x32xf32>
    %628 = arith.mulf %627, %625 : vector<1x32xf32>
    %629 = arith.mulf %619, %595 : vector<1x32xf32>
    %630 = arith.addf %628, %629 : vector<1x32xf32>
    %631 = vector.broadcast %c3_i32_333 : i32 to vector<1x1xi32>
    %632 = arith.cmpi slt, %631, %1 : vector<1x1xi32>
    %633 = vector.shape_cast %632 : vector<1x1xi1> to vector<1x1xi1>
    %634 = vector.broadcast %633 : vector<1x1xi1> to vector<1x32xi1>
    %635 = arith.select %634, %630, %595 : vector<1x32xi1>, vector<1x32xf32>
    %c0_348 = arith.constant 0 : index
    %c0_349 = arith.constant 0 : index
    %636 = vector.load %arg14[%c0_348, %c0_349] : memref<1x32xf32, #tpu.memory_space<vmem>>, vector<1x32xf32>
    tpu.vector_store %arg14[%c0_348, %c0_349], %635 {strides = array<i32>} : memref<1x32xf32, #tpu.memory_space<vmem>>, vector<1x32xf32>,
    %637 = arith.index_cast %c3_i32_333 : i32 to index
    %c0_350 = arith.constant 0 : index
    %c0_351 = arith.constant 0 : index
    %638 = vector.load %arg10[%637, %c0_350, %c0_351] : memref<8x1x32xf32, #tpu.memory_space<vmem>>, vector<1x1x32xf32>
    %639 = vector.shape_cast %638 : vector<1x1x32xf32> to vector<1x32xf32>
    %640 = vector.shape_cast %635 : vector<1x32xf32> to vector<1x1x32xf32>
    tpu.vector_store %arg10[%637, %c0_350, %c0_351], %640 {strides = array<i32>} : memref<8x1x32xf32, #tpu.memory_space<vmem>>, vector<1x1x32xf32>,
    %c4_i32_352 = arith.constant 4 : i32
    %c0_353 = arith.constant 0 : index
    %c0_354 = arith.constant 0 : index
    %641 = vector.load %arg14[%c0_353, %c0_354] : memref<1x32xf32, #tpu.memory_space<vmem>>, vector<1x32xf32>
    %cst_355 = arith.constant dense<0.000000e+00> : vector<1x32xf32>
    %642 = tpu.matmul %641, %444, %cst_355 {dimension_numbers = #tpu.dot_dimension_numbers<[1], [0], [0], [1], [0, 0, 1, 1], [], []>} : vector<1x32xf32>, vector<32x32xf32>, vector<1x32xf32> -> vector<1x32xf32>
    %643 = arith.addf %642, %450 : vector<1x32xf32>
    %cst_356 = arith.constant dense<0.000000e+00> : vector<1x32xf32>
    %644 = tpu.matmul %641, %446, %cst_356 {dimension_numbers = #tpu.dot_dimension_numbers<[1], [0], [0], [1], [0, 0, 1, 1], [], []>} : vector<1x32xf32>, vector<32x32xf32>, vector<1x32xf32> -> vector<1x32xf32>
    %645 = arith.addf %644, %452 : vector<1x32xf32>
    %cst_357 = arith.constant dense<0.000000e+00> : vector<1x32xf32>
    %646 = tpu.matmul %641, %448, %cst_357 {dimension_numbers = #tpu.dot_dimension_numbers<[1], [0], [0], [1], [0, 0, 1, 1], [], []>} : vector<1x32xf32>, vector<32x32xf32>, vector<1x32xf32> -> vector<1x32xf32>
    %647 = arith.addf %646, %454 : vector<1x32xf32>
    %648 = arith.index_cast %c4_i32_352 : i32 to index
    %c0_358 = arith.constant 0 : index
    %c0_359 = arith.constant 0 : index
    %649 = vector.load %arg11[%648, %c0_358, %c0_359] : memref<8x1x32xf32, #tpu.memory_space<vmem>>, vector<1x1x32xf32>
    %650 = vector.shape_cast %649 : vector<1x1x32xf32> to vector<1x32xf32>
    %651 = arith.addf %650, %643 : vector<1x32xf32>
    %652 = arith.negf %651 : vector<1x32xf32>
    %653 = math.exp %652 : vector<1x32xf32>
    %cst_360 = arith.constant 1.000000e+00 : f32
    %654 = vector.broadcast %cst_360 : f32 to vector<1x32xf32>
    %655 = arith.addf %654, %653 : vector<1x32xf32>
    %656 = arith.divf %654, %655 : vector<1x32xf32>
    %657 = arith.index_cast %c4_i32_352 : i32 to index
    %c0_361 = arith.constant 0 : index
    %c0_362 = arith.constant 0 : index
    %658 = vector.load %arg12[%657, %c0_361, %c0_362] : memref<8x1x32xf32, #tpu.memory_space<vmem>>, vector<1x1x32xf32>
    %659 = vector.shape_cast %658 : vector<1x1x32xf32> to vector<1x32xf32>
    %660 = arith.addf %659, %645 : vector<1x32xf32>
    %661 = arith.negf %660 : vector<1x32xf32>
    %662 = math.exp %661 : vector<1x32xf32>
    %cst_363 = arith.constant 1.000000e+00 : f32
    %663 = vector.broadcast %cst_363 : f32 to vector<1x32xf32>
    %664 = arith.addf %663, %662 : vector<1x32xf32>
    %665 = arith.divf %663, %664 : vector<1x32xf32>
    %666 = arith.index_cast %c4_i32_352 : i32 to index
    %c0_364 = arith.constant 0 : index
    %c0_365 = arith.constant 0 : index
    %667 = vector.load %arg13[%666, %c0_364, %c0_365] : memref<8x1x32xf32, #tpu.memory_space<vmem>>, vector<1x1x32xf32>
    %668 = vector.shape_cast %667 : vector<1x1x32xf32> to vector<1x32xf32>
    %669 = arith.mulf %656, %647 : vector<1x32xf32>
    %670 = arith.addf %668, %669 : vector<1x32xf32>
    %671 = math.tanh %670 : vector<1x32xf32>
    %cst_366 = arith.constant 1.000000e+00 : f32
    %672 = vector.broadcast %cst_366 : f32 to vector<1x32xf32>
    %673 = arith.subf %672, %665 : vector<1x32xf32>
    %674 = arith.mulf %673, %671 : vector<1x32xf32>
    %675 = arith.mulf %665, %641 : vector<1x32xf32>
    %676 = arith.addf %674, %675 : vector<1x32xf32>
    %677 = vector.broadcast %c4_i32_352 : i32 to vector<1x1xi32>
    %678 = arith.cmpi slt, %677, %1 : vector<1x1xi32>
    %679 = vector.shape_cast %678 : vector<1x1xi1> to vector<1x1xi1>
    %680 = vector.broadcast %679 : vector<1x1xi1> to vector<1x32xi1>
    %681 = arith.select %680, %676, %641 : vector<1x32xi1>, vector<1x32xf32>
    %c0_367 = arith.constant 0 : index
    %c0_368 = arith.constant 0 : index
    %682 = vector.load %arg14[%c0_367, %c0_368] : memref<1x32xf32, #tpu.memory_space<vmem>>, vector<1x32xf32>
    tpu.vector_store %arg14[%c0_367, %c0_368], %681 {strides = array<i32>} : memref<1x32xf32, #tpu.memory_space<vmem>>, vector<1x32xf32>,
    %683 = arith.index_cast %c4_i32_352 : i32 to index
    %c0_369 = arith.constant 0 : index
    %c0_370 = arith.constant 0 : index
    %684 = vector.load %arg10[%683, %c0_369, %c0_370] : memref<8x1x32xf32, #tpu.memory_space<vmem>>, vector<1x1x32xf32>
    %685 = vector.shape_cast %684 : vector<1x1x32xf32> to vector<1x32xf32>
    %686 = vector.shape_cast %681 : vector<1x32xf32> to vector<1x1x32xf32>
    tpu.vector_store %arg10[%683, %c0_369, %c0_370], %686 {strides = array<i32>} : memref<8x1x32xf32, #tpu.memory_space<vmem>>, vector<1x1x32xf32>,
    %c5_i32_371 = arith.constant 5 : i32
    %c0_372 = arith.constant 0 : index
    %c0_373 = arith.constant 0 : index
    %687 = vector.load %arg14[%c0_372, %c0_373] : memref<1x32xf32, #tpu.memory_space<vmem>>, vector<1x32xf32>
    %cst_374 = arith.constant dense<0.000000e+00> : vector<1x32xf32>
    %688 = tpu.matmul %687, %444, %cst_374 {dimension_numbers = #tpu.dot_dimension_numbers<[1], [0], [0], [1], [0, 0, 1, 1], [], []>} : vector<1x32xf32>, vector<32x32xf32>, vector<1x32xf32> -> vector<1x32xf32>
    %689 = arith.addf %688, %450 : vector<1x32xf32>
    %cst_375 = arith.constant dense<0.000000e+00> : vector<1x32xf32>
    %690 = tpu.matmul %687, %446, %cst_375 {dimension_numbers = #tpu.dot_dimension_numbers<[1], [0], [0], [1], [0, 0, 1, 1], [], []>} : vector<1x32xf32>, vector<32x32xf32>, vector<1x32xf32> -> vector<1x32xf32>
    %691 = arith.addf %690, %452 : vector<1x32xf32>
    %cst_376 = arith.constant dense<0.000000e+00> : vector<1x32xf32>
    %692 = tpu.matmul %687, %448, %cst_376 {dimension_numbers = #tpu.dot_dimension_numbers<[1], [0], [0], [1], [0, 0, 1, 1], [], []>} : vector<1x32xf32>, vector<32x32xf32>, vector<1x32xf32> -> vector<1x32xf32>
    %693 = arith.addf %692, %454 : vector<1x32xf32>
    %694 = arith.index_cast %c5_i32_371 : i32 to index
    %c0_377 = arith.constant 0 : index
    %c0_378 = arith.constant 0 : index
    %695 = vector.load %arg11[%694, %c0_377, %c0_378] : memref<8x1x32xf32, #tpu.memory_space<vmem>>, vector<1x1x32xf32>
    %696 = vector.shape_cast %695 : vector<1x1x32xf32> to vector<1x32xf32>
    %697 = arith.addf %696, %689 : vector<1x32xf32>
    %698 = arith.negf %697 : vector<1x32xf32>
    %699 = math.exp %698 : vector<1x32xf32>
    %cst_379 = arith.constant 1.000000e+00 : f32
    %700 = vector.broadcast %cst_379 : f32 to vector<1x32xf32>
    %701 = arith.addf %700, %699 : vector<1x32xf32>
    %702 = arith.divf %700, %701 : vector<1x32xf32>
    %703 = arith.index_cast %c5_i32_371 : i32 to index
    %c0_380 = arith.constant 0 : index
    %c0_381 = arith.constant 0 : index
    %704 = vector.load %arg12[%703, %c0_380, %c0_381] : memref<8x1x32xf32, #tpu.memory_space<vmem>>, vector<1x1x32xf32>
    %705 = vector.shape_cast %704 : vector<1x1x32xf32> to vector<1x32xf32>
    %706 = arith.addf %705, %691 : vector<1x32xf32>
    %707 = arith.negf %706 : vector<1x32xf32>
    %708 = math.exp %707 : vector<1x32xf32>
    %cst_382 = arith.constant 1.000000e+00 : f32
    %709 = vector.broadcast %cst_382 : f32 to vector<1x32xf32>
    %710 = arith.addf %709, %708 : vector<1x32xf32>
    %711 = arith.divf %709, %710 : vector<1x32xf32>
    %712 = arith.index_cast %c5_i32_371 : i32 to index
    %c0_383 = arith.constant 0 : index
    %c0_384 = arith.constant 0 : index
    %713 = vector.load %arg13[%712, %c0_383, %c0_384] : memref<8x1x32xf32, #tpu.memory_space<vmem>>, vector<1x1x32xf32>
    %714 = vector.shape_cast %713 : vector<1x1x32xf32> to vector<1x32xf32>
    %715 = arith.mulf %702, %693 : vector<1x32xf32>
    %716 = arith.addf %714, %715 : vector<1x32xf32>
    %717 = math.tanh %716 : vector<1x32xf32>
    %cst_385 = arith.constant 1.000000e+00 : f32
    %718 = vector.broadcast %cst_385 : f32 to vector<1x32xf32>
    %719 = arith.subf %718, %711 : vector<1x32xf32>
    %720 = arith.mulf %719, %717 : vector<1x32xf32>
    %721 = arith.mulf %711, %687 : vector<1x32xf32>
    %722 = arith.addf %720, %721 : vector<1x32xf32>
    %723 = vector.broadcast %c5_i32_371 : i32 to vector<1x1xi32>
    %724 = arith.cmpi slt, %723, %1 : vector<1x1xi32>
    %725 = vector.shape_cast %724 : vector<1x1xi1> to vector<1x1xi1>
    %726 = vector.broadcast %725 : vector<1x1xi1> to vector<1x32xi1>
    %727 = arith.select %726, %722, %687 : vector<1x32xi1>, vector<1x32xf32>
    %c0_386 = arith.constant 0 : index
    %c0_387 = arith.constant 0 : index
    %728 = vector.load %arg14[%c0_386, %c0_387] : memref<1x32xf32, #tpu.memory_space<vmem>>, vector<1x32xf32>
    tpu.vector_store %arg14[%c0_386, %c0_387], %727 {strides = array<i32>} : memref<1x32xf32, #tpu.memory_space<vmem>>, vector<1x32xf32>,
    %729 = arith.index_cast %c5_i32_371 : i32 to index
    %c0_388 = arith.constant 0 : index
    %c0_389 = arith.constant 0 : index
    %730 = vector.load %arg10[%729, %c0_388, %c0_389] : memref<8x1x32xf32, #tpu.memory_space<vmem>>, vector<1x1x32xf32>
    %731 = vector.shape_cast %730 : vector<1x1x32xf32> to vector<1x32xf32>
    %732 = vector.shape_cast %727 : vector<1x32xf32> to vector<1x1x32xf32>
    tpu.vector_store %arg10[%729, %c0_388, %c0_389], %732 {strides = array<i32>} : memref<8x1x32xf32, #tpu.memory_space<vmem>>, vector<1x1x32xf32>,
    %c6_i32_390 = arith.constant 6 : i32
    %c0_391 = arith.constant 0 : index
    %c0_392 = arith.constant 0 : index
    %733 = vector.load %arg14[%c0_391, %c0_392] : memref<1x32xf32, #tpu.memory_space<vmem>>, vector<1x32xf32>
    %cst_393 = arith.constant dense<0.000000e+00> : vector<1x32xf32>
    %734 = tpu.matmul %733, %444, %cst_393 {dimension_numbers = #tpu.dot_dimension_numbers<[1], [0], [0], [1], [0, 0, 1, 1], [], []>} : vector<1x32xf32>, vector<32x32xf32>, vector<1x32xf32> -> vector<1x32xf32>
    %735 = arith.addf %734, %450 : vector<1x32xf32>
    %cst_394 = arith.constant dense<0.000000e+00> : vector<1x32xf32>
    %736 = tpu.matmul %733, %446, %cst_394 {dimension_numbers = #tpu.dot_dimension_numbers<[1], [0], [0], [1], [0, 0, 1, 1], [], []>} : vector<1x32xf32>, vector<32x32xf32>, vector<1x32xf32> -> vector<1x32xf32>
    %737 = arith.addf %736, %452 : vector<1x32xf32>
    %cst_395 = arith.constant dense<0.000000e+00> : vector<1x32xf32>
    %738 = tpu.matmul %733, %448, %cst_395 {dimension_numbers = #tpu.dot_dimension_numbers<[1], [0], [0], [1], [0, 0, 1, 1], [], []>} : vector<1x32xf32>, vector<32x32xf32>, vector<1x32xf32> -> vector<1x32xf32>
    %739 = arith.addf %738, %454 : vector<1x32xf32>
    %740 = arith.index_cast %c6_i32_390 : i32 to index
    %c0_396 = arith.constant 0 : index
    %c0_397 = arith.constant 0 : index
    %741 = vector.load %arg11[%740, %c0_396, %c0_397] : memref<8x1x32xf32, #tpu.memory_space<vmem>>, vector<1x1x32xf32>
    %742 = vector.shape_cast %741 : vector<1x1x32xf32> to vector<1x32xf32>
    %743 = arith.addf %742, %735 : vector<1x32xf32>
    %744 = arith.negf %743 : vector<1x32xf32>
    %745 = math.exp %744 : vector<1x32xf32>
    %cst_398 = arith.constant 1.000000e+00 : f32
    %746 = vector.broadcast %cst_398 : f32 to vector<1x32xf32>
    %747 = arith.addf %746, %745 : vector<1x32xf32>
    %748 = arith.divf %746, %747 : vector<1x32xf32>
    %749 = arith.index_cast %c6_i32_390 : i32 to index
    %c0_399 = arith.constant 0 : index
    %c0_400 = arith.constant 0 : index
    %750 = vector.load %arg12[%749, %c0_399, %c0_400] : memref<8x1x32xf32, #tpu.memory_space<vmem>>, vector<1x1x32xf32>
    %751 = vector.shape_cast %750 : vector<1x1x32xf32> to vector<1x32xf32>
    %752 = arith.addf %751, %737 : vector<1x32xf32>
    %753 = arith.negf %752 : vector<1x32xf32>
    %754 = math.exp %753 : vector<1x32xf32>
    %cst_401 = arith.constant 1.000000e+00 : f32
    %755 = vector.broadcast %cst_401 : f32 to vector<1x32xf32>
    %756 = arith.addf %755, %754 : vector<1x32xf32>
    %757 = arith.divf %755, %756 : vector<1x32xf32>
    %758 = arith.index_cast %c6_i32_390 : i32 to index
    %c0_402 = arith.constant 0 : index
    %c0_403 = arith.constant 0 : index
    %759 = vector.load %arg13[%758, %c0_402, %c0_403] : memref<8x1x32xf32, #tpu.memory_space<vmem>>, vector<1x1x32xf32>
    %760 = vector.shape_cast %759 : vector<1x1x32xf32> to vector<1x32xf32>
    %761 = arith.mulf %748, %739 : vector<1x32xf32>
    %762 = arith.addf %760, %761 : vector<1x32xf32>
    %763 = math.tanh %762 : vector<1x32xf32>
    %cst_404 = arith.constant 1.000000e+00 : f32
    %764 = vector.broadcast %cst_404 : f32 to vector<1x32xf32>
    %765 = arith.subf %764, %757 : vector<1x32xf32>
    %766 = arith.mulf %765, %763 : vector<1x32xf32>
    %767 = arith.mulf %757, %733 : vector<1x32xf32>
    %768 = arith.addf %766, %767 : vector<1x32xf32>
    %769 = vector.broadcast %c6_i32_390 : i32 to vector<1x1xi32>
    %770 = arith.cmpi slt, %769, %1 : vector<1x1xi32>
    %771 = vector.shape_cast %770 : vector<1x1xi1> to vector<1x1xi1>
    %772 = vector.broadcast %771 : vector<1x1xi1> to vector<1x32xi1>
    %773 = arith.select %772, %768, %733 : vector<1x32xi1>, vector<1x32xf32>
    %c0_405 = arith.constant 0 : index
    %c0_406 = arith.constant 0 : index
    %774 = vector.load %arg14[%c0_405, %c0_406] : memref<1x32xf32, #tpu.memory_space<vmem>>, vector<1x32xf32>
    tpu.vector_store %arg14[%c0_405, %c0_406], %773 {strides = array<i32>} : memref<1x32xf32, #tpu.memory_space<vmem>>, vector<1x32xf32>,
    %775 = arith.index_cast %c6_i32_390 : i32 to index
    %c0_407 = arith.constant 0 : index
    %c0_408 = arith.constant 0 : index
    %776 = vector.load %arg10[%775, %c0_407, %c0_408] : memref<8x1x32xf32, #tpu.memory_space<vmem>>, vector<1x1x32xf32>
    %777 = vector.shape_cast %776 : vector<1x1x32xf32> to vector<1x32xf32>
    %778 = vector.shape_cast %773 : vector<1x32xf32> to vector<1x1x32xf32>
    tpu.vector_store %arg10[%775, %c0_407, %c0_408], %778 {strides = array<i32>} : memref<8x1x32xf32, #tpu.memory_space<vmem>>, vector<1x1x32xf32>,
    %c7_i32_409 = arith.constant 7 : i32
    %c0_410 = arith.constant 0 : index
    %c0_411 = arith.constant 0 : index
    %779 = vector.load %arg14[%c0_410, %c0_411] : memref<1x32xf32, #tpu.memory_space<vmem>>, vector<1x32xf32>
    %cst_412 = arith.constant dense<0.000000e+00> : vector<1x32xf32>
    %780 = tpu.matmul %779, %444, %cst_412 {dimension_numbers = #tpu.dot_dimension_numbers<[1], [0], [0], [1], [0, 0, 1, 1], [], []>} : vector<1x32xf32>, vector<32x32xf32>, vector<1x32xf32> -> vector<1x32xf32>
    %781 = arith.addf %780, %450 : vector<1x32xf32>
    %cst_413 = arith.constant dense<0.000000e+00> : vector<1x32xf32>
    %782 = tpu.matmul %779, %446, %cst_413 {dimension_numbers = #tpu.dot_dimension_numbers<[1], [0], [0], [1], [0, 0, 1, 1], [], []>} : vector<1x32xf32>, vector<32x32xf32>, vector<1x32xf32> -> vector<1x32xf32>
    %783 = arith.addf %782, %452 : vector<1x32xf32>
    %cst_414 = arith.constant dense<0.000000e+00> : vector<1x32xf32>
    %784 = tpu.matmul %779, %448, %cst_414 {dimension_numbers = #tpu.dot_dimension_numbers<[1], [0], [0], [1], [0, 0, 1, 1], [], []>} : vector<1x32xf32>, vector<32x32xf32>, vector<1x32xf32> -> vector<1x32xf32>
    %785 = arith.addf %784, %454 : vector<1x32xf32>
    %786 = arith.index_cast %c7_i32_409 : i32 to index
    %c0_415 = arith.constant 0 : index
    %c0_416 = arith.constant 0 : index
    %787 = vector.load %arg11[%786, %c0_415, %c0_416] : memref<8x1x32xf32, #tpu.memory_space<vmem>>, vector<1x1x32xf32>
    %788 = vector.shape_cast %787 : vector<1x1x32xf32> to vector<1x32xf32>
    %789 = arith.addf %788, %781 : vector<1x32xf32>
    %790 = arith.negf %789 : vector<1x32xf32>
    %791 = math.exp %790 : vector<1x32xf32>
    %cst_417 = arith.constant 1.000000e+00 : f32
    %792 = vector.broadcast %cst_417 : f32 to vector<1x32xf32>
    %793 = arith.addf %792, %791 : vector<1x32xf32>
    %794 = arith.divf %792, %793 : vector<1x32xf32>
    %795 = arith.index_cast %c7_i32_409 : i32 to index
    %c0_418 = arith.constant 0 : index
    %c0_419 = arith.constant 0 : index
    %796 = vector.load %arg12[%795, %c0_418, %c0_419] : memref<8x1x32xf32, #tpu.memory_space<vmem>>, vector<1x1x32xf32>
    %797 = vector.shape_cast %796 : vector<1x1x32xf32> to vector<1x32xf32>
    %798 = arith.addf %797, %783 : vector<1x32xf32>
    %799 = arith.negf %798 : vector<1x32xf32>
    %800 = math.exp %799 : vector<1x32xf32>
    %cst_420 = arith.constant 1.000000e+00 : f32
    %801 = vector.broadcast %cst_420 : f32 to vector<1x32xf32>
    %802 = arith.addf %801, %800 : vector<1x32xf32>
    %803 = arith.divf %801, %802 : vector<1x32xf32>
    %804 = arith.index_cast %c7_i32_409 : i32 to index
    %c0_421 = arith.constant 0 : index
    %c0_422 = arith.constant 0 : index
    %805 = vector.load %arg13[%804, %c0_421, %c0_422] : memref<8x1x32xf32, #tpu.memory_space<vmem>>, vector<1x1x32xf32>
    %806 = vector.shape_cast %805 : vector<1x1x32xf32> to vector<1x32xf32>
    %807 = arith.mulf %794, %785 : vector<1x32xf32>
    %808 = arith.addf %806, %807 : vector<1x32xf32>
    %809 = math.tanh %808 : vector<1x32xf32>
    %cst_423 = arith.constant 1.000000e+00 : f32
    %810 = vector.broadcast %cst_423 : f32 to vector<1x32xf32>
    %811 = arith.subf %810, %803 : vector<1x32xf32>
    %812 = arith.mulf %811, %809 : vector<1x32xf32>
    %813 = arith.mulf %803, %779 : vector<1x32xf32>
    %814 = arith.addf %812, %813 : vector<1x32xf32>
    %815 = vector.broadcast %c7_i32_409 : i32 to vector<1x1xi32>
    %816 = arith.cmpi slt, %815, %1 : vector<1x1xi32>
    %817 = vector.shape_cast %816 : vector<1x1xi1> to vector<1x1xi1>
    %818 = vector.broadcast %817 : vector<1x1xi1> to vector<1x32xi1>
    %819 = arith.select %818, %814, %779 : vector<1x32xi1>, vector<1x32xf32>
    %c0_424 = arith.constant 0 : index
    %c0_425 = arith.constant 0 : index
    %820 = vector.load %arg14[%c0_424, %c0_425] : memref<1x32xf32, #tpu.memory_space<vmem>>, vector<1x32xf32>
    tpu.vector_store %arg14[%c0_424, %c0_425], %819 {strides = array<i32>} : memref<1x32xf32, #tpu.memory_space<vmem>>, vector<1x32xf32>,
    %821 = arith.index_cast %c7_i32_409 : i32 to index
    %c0_426 = arith.constant 0 : index
    %c0_427 = arith.constant 0 : index
    %822 = vector.load %arg10[%821, %c0_426, %c0_427] : memref<8x1x32xf32, #tpu.memory_space<vmem>>, vector<1x1x32xf32>
    %823 = vector.shape_cast %822 : vector<1x1x32xf32> to vector<1x32xf32>
    %824 = vector.shape_cast %819 : vector<1x32xf32> to vector<1x1x32xf32>
    tpu.vector_store %arg10[%821, %c0_426, %c0_427], %824 {strides = array<i32>} : memref<8x1x32xf32, #tpu.memory_space<vmem>>, vector<1x1x32xf32>,
    %c8_i32_428 = arith.constant 8 : i32
    %825 = tpu.iota {dimensions = array<i32: 0>} : vector<8x1x1xi32>
    %826 = vector.shape_cast %1 : vector<1x1xi32> to vector<1x1x1xi32>
    %827 = vector.broadcast %826 : vector<1x1x1xi32> to vector<8x1x1xi32>
    %828 = arith.cmpi slt, %825, %827 : vector<8x1x1xi32>
    %c0_429 = arith.constant 0 : index
    %c0_430 = arith.constant 0 : index
    %c0_431 = arith.constant 0 : index
    %829 = vector.load %arg10[%c0_429, %c0_430, %c0_431] : memref<8x1x32xf32, #tpu.memory_space<vmem>>, vector<8x1x32xf32>
    %cst_432 = arith.constant -1.000000e+00 : f32
    %830 = vector.shape_cast %828 : vector<8x1x1xi1> to vector<8x1x1xi1>
    %831 = vector.broadcast %830 : vector<8x1x1xi1> to vector<8x1x32xi1>
    %832 = vector.broadcast %cst_432 : f32 to vector<8x1x32xf32>
    %833 = arith.select %831, %829, %832 : vector<8x1x32xi1>, vector<8x1x32xf32>
    %c0_433 = arith.constant 0 : index
    %c0_434 = arith.constant 0 : index
    %834 = vector.load %arg7[%c0_433, %c0_434] : memref<1x32xf32, #tpu.memory_space<vmem>>, vector<1x32xf32>
    %835 = vector.shape_cast %834 : vector<1x32xf32> to vector<1x1x32xf32>
    %836 = vector.broadcast %835 : vector<1x1x32xf32> to vector<8x1x32xf32>
    %837 = arith.mulf %833, %836 : vector<8x1x32xf32>
    %cst_435 = arith.constant dense<0.000000e+00> : vector<8x1xf32>
    %838 = vector.multi_reduction <add>, %837, %cst_435 [2] : vector<8x1x32xf32> to vector<8x1xf32>
    %c0_436 = arith.constant 0 : index
    %c0_437 = arith.constant 0 : index
    %839 = memref.load %arg8[%c0_436, %c0_437] : memref<1x1xf32, #tpu.memory_space<smem>>
    %840 = vector.broadcast %839 : f32 to vector<8x1xf32>
    %841 = arith.addf %838, %840 : vector<8x1xf32>
    %842 = tpu.transpose %841, [1, 0] : vector<8x1xf32> -> vector<1x8xf32>
    %c0_438 = arith.constant 0 : index
    %c0_439 = arith.constant 0 : index
    %c0_440 = arith.constant 0 : index
    %843 = vector.load %arg9[%c0_438, %c0_439, %c0_440] : memref<1x1x8xf32, #tpu.memory_space<vmem>>, vector<1x1x8xf32>
    %844 = vector.shape_cast %843 : vector<1x1x8xf32> to vector<1x8xf32>
    %845 = vector.shape_cast %842 : vector<1x8xf32> to vector<1x1x8xf32>
    tpu.vector_store %arg9[%c0_438, %c0_439, %c0_440], %845 {strides = array<i32>} : memref<1x1x8xf32, #tpu.memory_space<vmem>>, vector<1x1x8xf32>,
    return
  }
  func.func @transform_0(%arg0: i32) -> (i32, i32, i32) {
    %c0_i32 = arith.constant 0 : i32
    %c0_i32_0 = arith.constant 0 : i32
    %c0_i32_1 = arith.constant 0 : i32
    return %arg0, %c0_i32, %c0_i32_0 : i32, i32, i32
  }
  func.func @transform_1(%arg0: i32) -> (i32, i32, i32, i32) {
    %c0_i32 = arith.constant 0 : i32
    %c0_i32_0 = arith.constant 0 : i32
    %c0_i32_1 = arith.constant 0 : i32
    %c0_i32_2 = arith.constant 0 : i32
    return %arg0, %c0_i32, %c0_i32_0, %c0_i32_1 : i32, i32, i32, i32
  }
  func.func @transform_2(%arg0: i32) -> (i32, i32, i32, i32) {
    %c0_i32 = arith.constant 0 : i32
    %c0_i32_0 = arith.constant 0 : i32
    %c0_i32_1 = arith.constant 0 : i32
    %c0_i32_2 = arith.constant 0 : i32
    %c0_i32_3 = arith.constant 0 : i32
    return %c0_i32, %c0_i32_0, %c0_i32_1, %c0_i32_2 : i32, i32, i32, i32
  }
  func.func @transform_3(%arg0: i32) -> (i32, i32, i32, i32) {
    %c0_i32 = arith.constant 0 : i32
    %c0_i32_0 = arith.constant 0 : i32
    %c0_i32_1 = arith.constant 0 : i32
    %c0_i32_2 = arith.constant 0 : i32
    %c0_i32_3 = arith.constant 0 : i32
    return %c0_i32, %c0_i32_0, %c0_i32_1, %c0_i32_2 : i32, i32, i32, i32
  }
  func.func @transform_4(%arg0: i32) -> (i32, i32, i32, i32) {
    %c0_i32 = arith.constant 0 : i32
    %c0_i32_0 = arith.constant 0 : i32
    %c0_i32_1 = arith.constant 0 : i32
    %c0_i32_2 = arith.constant 0 : i32
    %c0_i32_3 = arith.constant 0 : i32
    return %c0_i32, %c0_i32_0, %c0_i32_1, %c0_i32_2 : i32, i32, i32, i32
  }
  func.func @transform_5(%arg0: i32) -> (i32, i32, i32, i32) {
    %c0_i32 = arith.constant 0 : i32
    %c0_i32_0 = arith.constant 0 : i32
    %c0_i32_1 = arith.constant 0 : i32
    %c0_i32_2 = arith.constant 0 : i32
    %c0_i32_3 = arith.constant 0 : i32
    return %c0_i32, %c0_i32_0, %c0_i32_1, %c0_i32_2 : i32, i32, i32, i32
  }
  func.func @transform_6(%arg0: i32) -> (i32, i32) {
    %c0_i32 = arith.constant 0 : i32
    %c0_i32_0 = arith.constant 0 : i32
    %c0_i32_1 = arith.constant 0 : i32
    return %c0_i32, %c0_i32_0 : i32, i32
  }
  func.func @transform_7(%arg0: i32) -> (i32, i32) {
    %c0_i32 = arith.constant 0 : i32
    %c0_i32_0 = arith.constant 0 : i32
    %c0_i32_1 = arith.constant 0 : i32
    return %c0_i32, %c0_i32_0 : i32, i32
  }
  func.func @transform_8(%arg0: i32) -> (i32, i32, i32) {
    %c0_i32 = arith.constant 0 : i32
    %c0_i32_0 = arith.constant 0 : i32
    %c0_i32_1 = arith.constant 0 : i32
    return %arg0, %c0_i32, %c0_i32_0 : i32, i32, i32
  }
}

</mosaic_0001>

<bundles_post_ra>
// kernel: tpu_custom_call.1
= control target key start
LH: loop header
LB: loop body
LE: loop exit
PB: predicated region body
PF: predicated region fallthrough
CT: control target
= control target key end

     0   :  { %s4709_s0 = inlined_call_operand.vmem [shape: s32[2,1,1], index: 0, kind: input, shape index: {}]   ;;  %s4710_s1 = inlined_call_operand.hbm [shape: f32[2,8,1,32], index: 1, kind: input, shape index: {}]   ;;  %s4711_s2 = inlined_call_operand.hbm [shape: f32[2,3,32,32], index: 2, kind: input, shape index: {}]   ;;  %s4712_s3 = inlined_call_operand.hbm [shape: f32[2,3,32,32], index: 3, kind: input, shape index: {}]   ;;  %s4713_s4 = inlined_call_operand.hbm [shape: f32[2,3,1,32], index: 4, kind: input, shape index: {}]   ;;  %s4714_s5 = inlined_call_operand.hbm [shape: f32[2,3,1,32], index: 5, kind: input, shape index: {}]   ;;  %s4715_s6 = inlined_call_operand.vmem [shape: f32[1,32], index: 6, kind: input, shape index: {}]   ;;  %s4716_s7 = inlined_call_operand.<no memory space> [shape: f32[1,1], index: 7, kind: input, shape index: {}]   ;;  %s4717_s8 = inlined_call_operand.hbm [shape: f32[2,1,8], index: 8, kind: output, shape index: {}]  }
   0x1   :  { %4721 = sst [smem:[#allocation22_spill]] %s4711_s2 }
   0x2   :  { %13 = sst [smem:[#allocation7]] %s4716_s7 }
   0x3   :  { %14 = vsyncpa [#allocation9], 0 }
   0x4   :  { %16 = vsyncpa [#allocation9 + $0x1], 0 }
   0x5   :  { %17 = vsyncpa [#allocation12], 0 }
   0x6   :  { %18 = vsyncpa [#allocation15], 0 }
   0x7   :  { %19 = vsyncpa [#allocation10], 0 }
   0x8   :  { %21 = vsyncpa [#allocation10 + $0x1], 0  ;;  %s3775_s29 = smov 0   ;;  %s3777_s30 = smov 0  }
   0x9   :  { %s3779_s9 = smov 0   ;;  %s3781_s10 = smov 0  }
   0xa LB: > { %s3796_s7 = sadd.s32 4294967295, %s3715_s10   ;;  %s3111_s11 = sadd.s32 4294967294, %s3715_s10   ;;  %s3715_s10 = sphi %s3781_s10, %s4768_s10   ;;  %s3711_s9 = sphi %s3779_s9, %s4767_s9   ;;  %s3707_s30 = sphi %s3777_s30, %s4766_s30   ;;  %s3703_s29 = sphi %s3775_s29, %s4765_s29  }
   0xb   : > { %p73_p0 = scmp.ne.s32.totalorder %s3707_s30, %s3703_s29  ;;  %p74_p1 = scmp.eq.s32.totalorder %s3796_s7, 0 }
   0xc   : > { %p223_p2 = scmp.eq.s32.totalorder %s3796_s7, 1  ;;  %p229_p3 = scmp.eq.s32.totalorder %s3111_s11, 1 }
   0xd   : > { %p3805_p4 = por %p74_p1, %p73_p0  ;;  %p3112_p5 = scmp.ge.s32.totalorder %s3715_s10, 1 }
   0xe   : > { %p3810_p6 = por %p229_p3, %p73_p0  ;;  %p236_p7 = scmp.lt.s32.totalorder %s3715_s10, 3 }
   0xf   : > { %s4724_s2 = sld [smem:[#allocation22_spill]]  ;;  %s3717_s18 = smov [#allocation11]  }
  0x10   : > { %p3818_p8 = pnand %p3112_p5, %p236_p7  ;;  %s249_s19 = sshll.u32 %s3717_s18, 4  ;;  %s250_s19 = int_to_ptr.vmem [resolvable:$true] %s249_s19 }
  0x11   : > { %s275_s23 = sshll.u32 %s4713_s4, 4  ;;  %s3718_s24 = smov 128   ;;  %s276_s23 = int_to_ptr.hbm [resolvable:$true] %s275_s23 }
  0x12   : > { %p3234_p9 = pneg %p3818_p8  ;;  %s3719_s25 = smov 8  }
  0x13   : > { %s3720_s26 = smov [#allocation14]   ;;  %s4718_s28 = smov 16  }
  0x14   : > { %p3826_p10 = pnand %p3234_p9, %p74_p1  ;;  %s277_s27 = sshll.u32 %s3720_s26, 4  ;;  %s278_s27 = int_to_ptr.vmem [resolvable:$true] %s277_s27 }
  0x15   : > { %s247_s16 = sshll.u32 %s4724_s2, 4  ;;  %s4719_s11 = smov 1   ;;  %s248_s16 = int_to_ptr.hbm [resolvable:$true] %s247_s16 }
  0x16   : > { %3237 = dma.hbm_to_vmem [thread:$0]  (!%p3826_p10), %s248_s16, 3072, %s250_s19, [#allocation12], %s3718_s24, %s3718_s24, %s3719_s25  }
  0x17   : > { %3243 = dma.hbm_to_vmem [thread:$0]  (!%p3826_p10), %s276_s23, 96, %s278_s27, [#allocation15], %s4718_s28, %s4718_s28, %s4719_s11  }
  0x18   : > { %s261_s16 = sshll.u32 %s4712_s3, 4  ;;  %s3723_s18 = smov [#allocation13]   ;;  %s262_s16 = int_to_ptr.hbm [resolvable:$true] %s261_s16 }
  0x19   : > { %s263_s19 = sshll.u32 %s3723_s18, 4  ;;  %s289_s26 = sshll.u32 %s4714_s5, 4  ;;  %s264_s19 = int_to_ptr.vmem [resolvable:$true] %s263_s19  ;;  %s290_s26 = int_to_ptr.hbm [resolvable:$true] %s289_s26 }
  0x1a   : > { %3240 = dma.hbm_to_vmem [thread:$0]  (!%p3826_p10), %s262_s16, 3072, %s264_s19, [#allocation12], %s3718_s24, %s3718_s24, %s3719_s25  }
  0x1b   : > { %s3724_s23 = smov [#allocation16]   ;;  %s3855_s14 = sadd.s32 1, %s3715_s10  }
  0x1c   : > { %s291_s27 = sshll.u32 %s3724_s23, 4  ;;  %s60_s15 = sadd.s32 1, %s3711_s9  ;;  %s292_s27 = int_to_ptr.vmem [resolvable:$true] %s291_s27 }
  0x1d   : > { %3246 = dma.hbm_to_vmem [thread:$0]  (!%p3826_p10), %s290_s26, 96, %s292_s27, [#allocation15], %s4718_s28, %s4718_s28, %s4719_s11  }
  0x1e   : > { %s57_s18 = ssub.s32 %s3715_s10, %s3855_s14  ;;  %p67_p12 = scmp.ne.s32.totalorder %s3711_s9, %s3707_s30 }
  0x1f   : > { %p58_p13 = scmp.eq.s32.totalorder %s57_s18, 0  ;;  %p68_p0 = scmp.eq.s32.totalorder %s3715_s10, 0 }
  0x20   : > { %p3865_p3 = por %p223_p2, %p67_p12  ;;  %p3259_p5 = scmp.lt.s32.totalorder %s3715_s10, 2 }
  0x21   : > { %s3871_s25 = scalar_select %p58_p13, %s3711_s9, %s60_s15  }
  0x22   : > { %p69_p7 = por %p68_p0, %p67_p12  ;;  %s317_s20 = sand.u32 1, %s3711_s9  }
  0x23   : > { %s3118_s16 = sshll.u32 %s317_s20, 3  ;;  %s3119_s19 = sshll.u32 %s3715_s10, 3 }
  0x24   : > { %s325_s26 = scalar_lea.hbm %s4710_s1, %s3119_s19  ;;  %s321_s23 = scalar_lea.vmem [#allocation8], %s3118_s16 }
  0x25   : > { %s328_s27 = sshll.u32 %s321_s23, 4  ;;  %s326_s18 = sshll.u32 %s325_s26, 4  ;;  %s329_s27 = int_to_ptr.vmem [resolvable:$true] %s328_s27  ;;  %s327_s18 = int_to_ptr.hbm [resolvable:$true] %s326_s18 }
  0x26   : > { %p3878_p2 = pnand %p3259_p5, %p69_p7  ;;  %s318_s15 = scalar_lea.sflag [#allocation9], %s317_s20 }
  0x27   : > { %s3611_s11 = sshra.s32 %s327_s18, 4  ;;  %s3618_s21 = scalar_lea.hbm %s4710_s1, 16  ;;  %s3612_s11 = int_to_ptr.hbm [resolvable:$true] %s3611_s11 }
  0x28   : > { %s3613_s2 = scalar_lea.hbm %s3612_s11, 8  ;;  %p3615_p10 = pneg %p3878_p2 }
  0x29   : > { %p3614_p9 = scmp.ne.s32.totalorder %s3612_s11, %s3613_s2  ;;  %p3619_p0 = scmp.lt.s32.totalorder %s3612_s11, %s4710_s1 }
  0x2a   : > { %p3620_p5 = scmp.lt.s32.totalorder %s3618_s21, %s3613_s2 }
  0x2b   : > { %p3616_p12 = pnand %p3615_p10, %p3614_p9 }
  0x2c   : > { %p3621_p7 = por %p3620_p5, %p3619_p0 }
  0x2d   : > { %p3617_p13 = pneg %p3616_p12 }
  0x2f   : > { %p3622_p11 = pnand %p3621_p7, %p3617_p13 }
  0x31   : > { %3625 = shalt.err (!%p3622_p11)
}
  0x32   : > { %s4729_s20 = smov 1   ;;  %s4730_s23 = smov 16  }
  0x33   : > { %3250 = dma.hbm_to_vmem [thread:$0]  (!%p3878_p2), %s327_s18, 128, %s329_s27, %s318_s15, %s4730_s23, %s4730_s23, %s4729_s20  }
  0x34   : > { %340 = sbr.rel (%p3818_p8) target bundleno = 3366 (0xd26), region = 52  ;;  %s3898_s19 = sand.u32 (!%p3818_p8), 1, %s3707_s30  }
  0x35   : > { %s3121_s11 = sshll.u32 (!%p3818_p8), %s3898_s19, 3  ;;  %s343_s2 = scalar_lea.sflag (!%p3818_p8), [#allocation9], %s3898_s19 }
  0x36   : > { %s3902_s16 = scalar_lea.vmem (!%p3818_p8), [#allocation8], %s3121_s11 }
  0x39   : > { %3686 = dma.done.wait (%p3805_p4), %s343_s2, 128  }
  0x3a   : > { %3688 = vsyncadd (%p3805_p4), %s343_s2, 4294967168 }
  0x3b   : > { %3690 = dma.done.wait (%p74_p1), [#allocation12], 6144  }
  0x3c   : > { %3692 = vsyncadd (%p74_p1), [#allocation12], 4294961152 }
  0x3d   : > { %3694 = dma.done.wait (%p74_p1), [#allocation15], 192  }
  0x3e   : > { %3696 = vsyncadd (%p74_p1), [#allocation15], 4294967104  ;;  %vm484_vm0 = vcmask 253952   ;;  %v3725_v0 = vmov 0.0   ;;  %v417_v1 = vld [vmem:[#allocation11 + $0x18] sm:$0xff]  ;;  %v416_v2 = vld [vmem:[#allocation11 + $0x10] sm:$0xff]  ;;  %s2994_s11 = scalar_lea.hbm %s4717_s8, %s3796_s7 }
  0x3f   : > { %654 = vst.msk [vmem:[#allocation6] sm:$0x1] %vm484_vm0, %v3725_v0  ;;  %v3918_v3 = vld [vmem:[#allocation13 + $0x18] sm:$0xff]  ;;  %461 = vmatpush.msra.mxu0 %v417_v1  ;;  %v3921_v4 = vld [vmem:[#allocation13 + $0x10] sm:$0xff]  ;;  %v415_v5 = vld [vmem:[#allocation11 + $0x8] sm:$0xff]  ;;  %p402_p1 = scmp.lt.s32.totalorder %s3796_s7, 1 }
  0x40   : > { %671 = vmatpush.msra.mxu3 %v3918_v3  ;;  %v3923_v6 = vld [vmem:[#allocation13 + $0x8] sm:$0xff]  ;;  %v3926_v7 = vld [vmem:[%s3902_s16] sm:$0x1]  ;;  %v414_v8 = vld [vmem:[#allocation11] sm:$0xff]  ;;  %vm4720_vm1 = vcmask 261120   ;;  %v3726_v33 = vmov 0  }
  0x41   : > { %462 = vmatpush.msra.mxu0 %v416_v2  ;;  %v3930_v9 = vld [vmem:[%s3902_s16 + $0x1] sm:$0x1]  ;;  %v3933_v10 = vld [vmem:[%s3902_s16 + $0x2] sm:$0x1]  ;;  %v3936_v11 = vld [vmem:[%s3902_s16 + $0x3] sm:$0x1]  ;;  %3307 = vset.pattern.permute.xlu0 %v3726_v33 }
  0x42   : > { %672 = vmatpush.msra.mxu3 %v3921_v4  ;;  %v3939_v12 = vld [vmem:[%s3902_s16 + $0x4] sm:$0x1]  ;;  %v3943_v13 = vld [vmem:[%s3902_s16 + $0x5] sm:$0x1]  ;;  %430 = vst [vmem:[#allocation1] ss:$9 sm:$0xff] %v3926_v7  ;;  %3308 = vset.pattern.permute.xlu1 %v3726_v33 }
  0x43   : > { %463 = vmatpush.msra.mxu0 %v415_v5  ;;  %v497_v14 = vld [vmem:[#allocation11 + $0x38] sm:$0xff]  ;;  %v3946_v15 = vld [vmem:[#allocation13] sm:$0xff]  ;;  %432 = vst [vmem:[#allocation1 + $0x1] ss:$9 sm:$0xff] %v3930_v9  ;;  %v496_v18 = vld [vmem:[#allocation11 + $0x30] sm:$0xff]  ;;  %s403_s12 = scalar_select %p402_p1, %s3796_s7, 1  ;;  %3309 = vset.pattern.permute.xlu2 %v3726_v33 }
  0x44   : > { %673 = vmatpush.msra.mxu3 %v3923_v6  ;;  %v3951_v17 = vld [vmem:[%s3902_s16 + $0x6] sm:$0x1]  ;;  %533 = vmatpush.msra.mxu1 %v497_v14  ;;  %v3956_v19 = vld [vmem:[%s3902_s16 + $0x7] sm:$0x1]  ;;  %434 = vst [vmem:[#allocation1 + $0x2] ss:$9 sm:$0xff] %v3933_v10 }
  0x45   : > { %464 = vmatpush.msra.mxu0 %v414_v8  ;;  %v495_v20 = vld [vmem:[#allocation11 + $0x28] sm:$0xff]  ;;  %v3960_v21 = vld [vmem:[#allocation13 + $0x38] sm:$0xff]  ;;  %v3962_v22 = vld [vmem:[#allocation13 + $0x30] sm:$0xff]  ;;  %436 = vst [vmem:[#allocation1 + $0x3] ss:$9 sm:$0xff] %v3936_v11  ;;  %s404_s27 = scalar_lea.vmem %s4709_s0, %s403_s12  ;;  %s2911_s26 = sld [smem:[#allocation7]] }
  0x46   : > { %v3948_v16 = vld [vmem:[#allocation6] sm:$0x1]  ;;  %674 = vmatpush.msra.mxu3 %v3946_v15  ;;  %534 = vmatpush.msra.mxu1 %v496_v18  ;;  %438 = vst [vmem:[#allocation1 + $0x4] ss:$9 sm:$0xff] %v3939_v12  ;;  %v494_v23 = vld [vmem:[#allocation11 + $0x20] sm:$0xff]  ;;  %v568_v25 = vld [vmem:[#allocation11 + $0x58] sm:$0xff] }
  0x47   : > { %3129 = vmatmul.msk.f32.vlgmr.msra.gmra.mxu3 %vm4720_vm1, %v3948_v16  ;;  %691 = vmatpush.msrb.mxu0 %v3960_v21  ;;  %440 = vst [vmem:[#allocation1 + $0x5] ss:$9 sm:$0xff] %v3943_v13  ;;  %v3971_v24 = vld [vmem:[#allocation13 + $0x28] sm:$0xff]  ;;  %v567_v26 = vld [vmem:[#allocation11 + $0x50] sm:$0xff]  ;;  %v3978_v27 = vld [vmem:[#allocation13 + $0x20] sm:$0xff]  ;;  %s401_s2 = scalar_lea.vmem [#allocation17], %s3898_s19 }
  0x48   : > { %815 = vmatpush.msrb.mxu3 %v3960_v21  ;;  %535 = vmatpush.msra.mxu1 %v495_v20  ;;  %442 = vst [vmem:[#allocation1 + $0x6] ss:$9 sm:$0xff] %v3951_v17  ;;  %v566_v28 = vld [vmem:[#allocation11 + $0x48] sm:$0xff]  ;;  %v565_v29 = vld [vmem:[#allocation11 + $0x40] sm:$0xff]  ;;  %v3989_v30 = vld [vmem:[#allocation13 + $0x58] sm:$0xff]  ;;  %s2996_s16 = sshll.u32 %s401_s2, 4  ;;  %s2997_s16 = int_to_ptr.vmem [resolvable:$true] %s2996_s16 }
  0x49   : > { %692 = vmatpush.msrb.mxu0 %v3962_v22  ;;  %604 = vmatpush.msra.mxu2 %v568_v25  ;;  %444 = vst [vmem:[#allocation1 + $0x7] ss:$9 sm:$0xff] %v3956_v19  ;;  %v3991_v31 = vld [vmem:[#allocation13 + $0x50] sm:$0xff]  ;;  %v3996_v34 = vld [vmem:[%s404_s27] sm:$0x1]  ;;  %v4000_v35 = vld [vmem:[#allocation13 + $0x48] sm:$0xff] }
  0x4a   : > { %536 = vmatpush.msra.mxu1 %v494_v23  ;;  %816 = vmatpush.msrb.mxu3 %v3962_v22  ;;  %vm769_vm2 = vcmp.gt.s32.totalorder %v3996_v34, 0  ;;  %v4009_v37 = vld [vmem:[#allocation13 + $0x40] sm:$0xff]  ;;  %vm896_vm3 = vcmp.gt.s32.totalorder %v3996_v34, 1  ;;  %vm1536_vm4 = vcmp.gt.s32.totalorder %v3996_v34, 6  ;;  %vm1024_vm14 = vcmp.gt.s32.totalorder %v3996_v34, 2  ;;  %s2998_s12 = sshll.u32 %s2994_s11, 4  ;;  %s2999_s12 = int_to_ptr.hbm [resolvable:$true] %s2998_s12 }
  0x4b   : > { %693 = vmatpush.msrb.mxu0 %v3971_v24  ;;  %605 = vmatpush.msra.mxu2 %v567_v26  ;;  %v770_v36 = vsel %vm769_vm2, 1, %v3726_v33  ;;  %v897_v38 = vsel %vm896_vm3, 1, %v3726_v33  ;;  %v1537_v40 = vsel %vm1536_vm4, 1, %v3726_v33  ;;  %v3310_v42 = vld [vmem:[#allocation14] ss:$0 sm:$0xff]  ;;  %vm1152_vm4 = vcmp.gt.s32.totalorder %v3996_v34, 3 }
  0x4c   : > { %817 = vmatpush.msrb.mxu3 %v3971_v24  ;;  %711 = vmatpush.msrb.mxu1 %v3989_v30  ;;  %v4064_v49 = vld [vmem:[#allocation16] sm:$0x1]  ;;  %v3311_v57 = vld [vmem:[#allocation14 + $0x1] ss:$0 sm:$0xff]  ;;  %v4075_v2 = vld [vmem:[#allocation16 + $0x1] sm:$0x1] }
  0x4d   : > { %694 = vmatpush.msrb.mxu0 %v3978_v27  ;;  %606 = vmatpush.msra.mxu2 %v566_v28  ;;  %v3312_v20 = vld [vmem:[#allocation14 + $0x2] ss:$0 sm:$0xff]  ;;  %s2986_s17 = scalar_lea.sflag [#allocation10], %s3898_s19  ;;  %s3655_s28 = sshra.s32 %s2999_s12, 4  ;;  %s3656_s28 = int_to_ptr.hbm [resolvable:$true] %s3655_s28 }
  0x4e   : > { %818 = vmatpush.msrb.mxu3 %v3978_v27  ;;  %712 = vmatpush.msrb.mxu1 %v3991_v31  ;;  %s3657_s27 = scalar_lea.hbm %s3656_s28, 1  ;;  %s3661_s7 = scalar_lea.hbm %s4717_s8, 2 }
  0x4f   : > { %607 = vmatpush.msra.mxu2 %v565_v29  ;;  %772 = vperm.xlu0 %3307, %v770_v36   ;;  %v4085_v29 = vld [vmem:[#allocation16 + $0x2] sm:$0x1]  ;;  %p3658_p4 = scmp.ne.s32.totalorder %s3656_s28, %s3657_s27  ;;  %p3662_p2 = scmp.lt.s32.totalorder %s3656_s28, %s4717_s8 }
  0x50   : > { %v445_v32 = vld [vmem:[#allocation1] sm:$0xff]  ;;  %713 = vmatpush.msrb.mxu1 %v4000_v35  ;;  %963 = vmatpush.msra.mxu3 %v3989_v30  ;;  %p3663_p9 = scmp.lt.s32.totalorder %s3661_s7, %s3657_s27 }
  0x51   : > { %795 = vmatpush.msrb.mxu2 %v3918_v3  ;;  %3126 = vmatmul.msk.f32.vlgmr.msra.gmra.mxu0 %vm4720_vm1, %v445_v32  ;;  %503 = vst [vmem:[#allocation1] ss:$9 sm:$0xff] %v3926_v7  ;;  %p3659_p8 = pnand %p3658_p4, %p3865_p3 }
  0x52   : > { %505 = vst [vmem:[#allocation1 + $0x1] ss:$9 sm:$0xff] %v3930_v9  ;;  %835 = vmatpush.msra.mxu0 %v3989_v30  ;;  %714 = vmatpush.msrb.mxu1 %v4009_v37  ;;  %p3664_p10 = por %p3663_p9, %p3662_p2 }
  0x53   : > { %796 = vmatpush.msrb.mxu2 %v3921_v4  ;;  %507 = vst [vmem:[#allocation1 + $0x2] ss:$9 sm:$0xff] %v3933_v10  ;;  %964 = vmatpush.msra.mxu3 %v3991_v31  ;;  %p3660_p11 = pneg %p3659_p8 }
  0x54   : > { %509 = vst [vmem:[#allocation1 + $0x3] ss:$9 sm:$0xff] %v3936_v11  ;;  %836 = vmatpush.msra.mxu0 %v3991_v31 }
  0x55   : > { %797 = vmatpush.msrb.mxu2 %v3923_v6  ;;  %511 = vst [vmem:[#allocation1 + $0x4] ss:$9 sm:$0xff] %v3939_v12  ;;  %965 = vmatpush.msra.mxu3 %v4000_v35  ;;  %p3665_p12 = pnand %p3664_p10, %p3660_p11 }
  0x56   : > { %513 = vst [vmem:[#allocation1 + $0x5] ss:$9 sm:$0xff] %v3943_v13  ;;  %837 = vmatpush.msra.mxu0 %v4000_v35 }
  0x57   : > { %798 = vmatpush.msrb.mxu2 %v3946_v15  ;;  %515 = vst [vmem:[#allocation1 + $0x6] ss:$9 sm:$0xff] %v3951_v17  ;;  %899 = vperm.xlu0 %3307, %v897_v38  }
  0x58   : > { %517 = vst [vmem:[#allocation1 + $0x7] ss:$9 sm:$0xff] %v3956_v19  ;;  %838 = vmatpush.msra.mxu0 %v4009_v37  ;;  %966 = vmatpush.msra.mxu3 %v4009_v37 }
  0x59   : > { %3130 = vmatmul.msk.f32.vlgmr.msrb.gmra.mxu0 %vm4720_vm1, %v3948_v16 }
  0x5a   : > { %1051 = vmatpush.msrb.mxu0 %v3918_v3 }
  0x5c   : > { %1052 = vmatpush.msrb.mxu0 %v3921_v4 }
  0x5e   : > { %1053 = vmatpush.msrb.mxu0 %v3923_v6 }
  0x5f   : > { %v518_v39 = vld [vmem:[#allocation1] sm:$0xff]  ;;  %1539 = vperm.xlu0 %3307, %v1537_v40  }
  0x60   : > { %3127 = vmatmul.msk.f32.vlgmr.msra.gmra.mxu1 %vm4720_vm1, %v518_v39  ;;  %574 = vst [vmem:[#allocation1] ss:$9 sm:$0xff] %v3926_v7  ;;  %1054 = vmatpush.msrb.mxu0 %v3946_v15 }
  0x61   : > { %576 = vst [vmem:[#allocation1 + $0x1] ss:$9 sm:$0xff] %v3930_v9  ;;  %923 = vmatpush.msra.mxu1 %v3918_v3 }
  0x62   : > { %578 = vst [vmem:[#allocation1 + $0x2] ss:$9 sm:$0xff] %v3933_v10 }
  0x63   : > { %580 = vst [vmem:[#allocation1 + $0x3] ss:$9 sm:$0xff] %v3936_v11  ;;  %924 = vmatpush.msra.mxu1 %v3921_v4 }
  0x64   : > { %582 = vst [vmem:[#allocation1 + $0x4] ss:$9 sm:$0xff] %v3939_v12 }
  0x65   : > { %584 = vst [vmem:[#allocation1 + $0x5] ss:$9 sm:$0xff] %v3943_v13  ;;  %925 = vmatpush.msra.mxu1 %v3923_v6 }
  0x66   : > { %586 = vst [vmem:[#allocation1 + $0x6] ss:$9 sm:$0xff] %v3951_v17 }
  0x67   : > { %588 = vst [vmem:[#allocation1 + $0x7] ss:$9 sm:$0xff] %v3956_v19  ;;  %926 = vmatpush.msra.mxu1 %v3946_v15 }
  0x68   : > { %3131 = vmatmul.msk.f32.vlgmr.msrb.gmra.mxu1 %vm4720_vm1, %v3948_v16 }
  0x69   : > { %1071 = vmatpush.msrb.mxu1 %v3960_v21 }
  0x6b   : > { %1072 = vmatpush.msrb.mxu1 %v3962_v22 }
  0x6d   : > { %1073 = vmatpush.msrb.mxu1 %v3971_v24 }
  0x6e   : > { %v589_v41 = vld [vmem:[#allocation1] sm:$0xff] }
  0x6f   : > { %3128 = vmatmul.msk.f32.vlgmr.msra.gmra.mxu2 %vm4720_vm1, %v589_v41  ;;  %1074 = vmatpush.msrb.mxu1 %v3978_v27 }
  0x70   : > { %943 = vmatpush.msra.mxu2 %v3960_v21 }
  0x72   : > { %944 = vmatpush.msra.mxu2 %v3962_v22 }
  0x74   : > { %945 = vmatpush.msra.mxu2 %v3971_v24 }
  0x76   : > { %946 = vmatpush.msra.mxu2 %v3978_v27 }
  0xca   : > { %v676_v50 = vpop.f32.mrf.mxu3 }
  0xcb   : > { %v677_v54 = vadd.f32 %v676_v50, %v4064_v49 }
  0xce   : > { %v466_v43 = vpop.f32.mrf.mxu0 }
  0xcf   : > { %v467_v44 = vadd.f32 %v3310_v42, %v466_v43 }
  0xd1   : > { %v470_v45 = vrot.slane %v467_v44, 1  ;;  %v471_v46 = vrot.slane %v467_v44, 2  ;;  %v472_v47 = vrot.slane %v467_v44, 3  ;;  %485 = vst.msk [vmem:[#allocation3] sm:$0x1] %vm484_vm0, %v467_v44  ;;  %v473_v48 = vrot.slane %v467_v44, 4 }
  0xd2   : > { %v474_v51 = vrot.slane %v467_v44, 5  ;;  %v475_v52 = vrot.slane %v467_v44, 6  ;;  %v476_v53 = vrot.slane %v467_v44, 7 }
  0xd3   : > { %486 = vst.msk [vmem:[#allocation3 + $0x1] sm:$0x1] %vm484_vm0, %v470_v45 }
  0xd4   : > { %487 = vst.msk [vmem:[#allocation3 + $0x2] sm:$0x1] %vm484_vm0, %v471_v46 }
  0xd5   : > { %488 = vst.msk [vmem:[#allocation3 + $0x3] sm:$0x1] %vm484_vm0, %v472_v47 }
  0xd6   : > { %489 = vst.msk [vmem:[#allocation3 + $0x4] sm:$0x1] %vm484_vm0, %v473_v48  ;;  %v696_v5 = vpop.f32.mrf.mxu0 }
  0xd7   : > { %490 = vst.msk [vmem:[#allocation3 + $0x5] sm:$0x1] %vm484_vm0, %v474_v51  ;;  %v697_v12 = vadd.f32 %v696_v5, %v4075_v2  ;;  %v773_v5 = vpop.permute.xlu0 %772 }
  0xd8   : > { %491 = vst.msk [vmem:[#allocation3 + $0x6] sm:$0x1] %vm484_vm0, %v475_v52  ;;  %v719_v55 = vld [vmem:[#allocation3] sm:$0x1] }
  0xd9   : > { %492 = vst.msk [vmem:[#allocation3 + $0x7] sm:$0x1] %vm484_vm0, %v476_v53  ;;  %v720_v56 = vadd.f32 %v719_v55, %v677_v54 }
  0xdb   : > { %v3132_v58 = vmul.f32 -1.442695, %v720_v56 }
  0xdd   : > { %v538_v59 = vpop.f32.mrf.mxu1  ;;  %3316 = vpow2.f32 %v3132_v58 }
  0xde   : > { %v539_v60 = vadd.f32 %v3311_v57, %v538_v59 }
  0xe0   : > { %v542_v61 = vrot.slane %v539_v60, 1  ;;  %v543_v62 = vrot.slane %v539_v60, 2  ;;  %v544_v63 = vrot.slane %v539_v60, 3  ;;  %556 = vst.msk [vmem:[#allocation4] sm:$0x1] %vm484_vm0, %v539_v60  ;;  %v545_v1 = vrot.slane %v539_v60, 4 }
  0xe1   : > { %v546_v7 = vrot.slane %v539_v60, 5  ;;  %v547_v9 = vrot.slane %v539_v60, 6  ;;  %v548_v10 = vrot.slane %v539_v60, 7 }
  0xe2   : > { %557 = vst.msk [vmem:[#allocation4 + $0x1] sm:$0x1] %vm484_vm0, %v542_v61 }
  0xe3   : > { %v3317_v8 = vpop.eup %3316  ;;  %558 = vst.msk [vmem:[#allocation4 + $0x2] sm:$0x1] %vm484_vm0, %v543_v62 }
  0xe4   : > { %559 = vst.msk [vmem:[#allocation4 + $0x3] sm:$0x1] %vm484_vm0, %v544_v63  ;;  %v724_v11 = vadd.f32 1.0, %v3317_v8 }
  0xe5   : > { %560 = vst.msk [vmem:[#allocation4 + $0x4] sm:$0x1] %vm484_vm0, %v545_v1  ;;  %v716_v32 = vpop.f32.mrf.mxu1 }
  0xe6   : > { %561 = vst.msk [vmem:[#allocation4 + $0x5] sm:$0x1] %vm484_vm0, %v546_v7  ;;  %3318 = vrcp.f32 %v724_v11  ;;  %v734_v36 = vand.u32 2147483647, %v724_v11  ;;  %v736_v38 = vand.u32 2147483648, %v724_v11  ;;  %v717_v43 = vadd.f32 %v716_v32, %v4085_v29 }
  0xe7   : > { %562 = vst.msk [vmem:[#allocation4 + $0x6] sm:$0x1] %vm484_vm0, %v547_v9  ;;  %v740_v13 = vld [vmem:[#allocation4] sm:$0x1]  ;;  %vm730_vm6 = vweird.f32 %v724_v11  ;;  %v774_v9 = vperm.slane %v773_v5, 0 }
  0xe8   : > { %563 = vst.msk [vmem:[#allocation4 + $0x7] sm:$0x1] %vm484_vm0, %v548_v10  ;;  %v741_v14 = vadd.f32 %v740_v13, %v697_v12  ;;  %v737_v47 = vor.u32 1.1754944e-38, %v736_v38  ;;  %vm735_vm8 = vcmp.eq.f32.partialorder %v734_v36, 8.507059e+37 }
  0xe9   : > { %vm4097_vm13 = vcmp.eq.s32.totalorder %v774_v9, 1  ;;  %v866_v32 = vld [vmem:[#allocation4 + $0x1] sm:$0x1] }
  0xea   : > { %v3133_v17 = vmul.f32 -1.442695, %v741_v14 }
  0xec   : > { %v3319_v18 = vpop.eup %3318  ;;  %3320 = vpow2.f32 %v3133_v17 }
  0xed   : > { %v726_v19 = vmul.f32 %v3319_v18, %v724_v11  ;;  %vm731_vm5 = vweird.f32 %v3319_v18 }
  0xee   : > { %vm732_vm7 = vmor %vm730_vm6, %vm731_vm5 }
  0xef   : > { %v727_v23 = vsub.f32 1.0, %v726_v19 }
  0xf1   : > { %v728_v25 = vmul.f32 %v3319_v18, %v727_v23 }
  0xf2   : > { %v3321_v26 = vpop.eup %3320  ;;  %v609_v28 = vpop.f32.mrf.mxu2 }
  0xf3   : > { %v745_v39 = vadd.f32 1.0, %v3321_v26  ;;  %v610_v40 = vadd.f32 %v3312_v20, %v609_v28  ;;  %v729_v41 = vadd.f32 %v3319_v18, %v728_v25  ;;  %v844_v28 = vld [vmem:[#allocation3 + $0x1] sm:$0x1] }
  0xf5   : > { %3322 = vrcp.f32 %v745_v39  ;;  %v613_v42 = vrot.slane %v610_v40, 1  ;;  %627 = vst.msk [vmem:[#allocation5] sm:$0x1] %vm484_vm0, %v610_v40  ;;  %v614_v44 = vrot.slane %v610_v40, 2  ;;  %v615_v45 = vrot.slane %v610_v40, 3 }
  0xf6   : > { %v616_v46 = vrot.slane %v610_v40, 4  ;;  %v617_v48 = vrot.slane %v610_v40, 5  ;;  %v733_v50 = vsel %vm732_vm7, %v3319_v18, %v729_v41  ;;  %v618_v51 = vrot.slane %v610_v40, 6 }
  0xf7   : > { %628 = vst.msk [vmem:[#allocation5 + $0x1] sm:$0x1] %vm484_vm0, %v613_v42  ;;  %v738_v52 = vsel %vm735_vm8, %v737_v47, %v733_v50  ;;  %v619_v53 = vrot.slane %v610_v40, 7  ;;  %v757_v60 = vand.u32 2147483648, %v745_v39  ;;  %v755_v62 = vand.u32 2147483647, %v745_v39 }
  0xf8   : > { %629 = vst.msk [vmem:[#allocation5 + $0x2] sm:$0x1] %vm484_vm0, %v614_v44  ;;  %v762_v54 = vmul.f32 %v738_v52, %v717_v43  ;;  %vm751_vm10 = vweird.f32 %v745_v39 }
  0xf9   : > { %630 = vst.msk [vmem:[#allocation5 + $0x3] sm:$0x1] %vm484_vm0, %v615_v45  ;;  %v758_v1 = vor.u32 1.1754944e-38, %v757_v60  ;;  %vm756_vm12 = vcmp.eq.f32.partialorder %v755_v62, 8.507059e+37 }
  0xfa   : > { %631 = vst.msk [vmem:[#allocation5 + $0x4] sm:$0x1] %vm484_vm0, %v616_v46 }
  0xfb   : > { %v3323_v55 = vpop.eup %3322  ;;  %632 = vst.msk [vmem:[#allocation5 + $0x5] sm:$0x1] %vm484_vm0, %v617_v48 }
  0xfc   : > { %v747_v56 = vmul.f32 %v3323_v55, %v745_v39  ;;  %633 = vst.msk [vmem:[#allocation5 + $0x6] sm:$0x1] %vm484_vm0, %v618_v51  ;;  %v761_v57 = vld [vmem:[#allocation5] sm:$0x1]  ;;  %vm752_vm9 = vweird.f32 %v3323_v55 }
  0xfd   : > { %634 = vst.msk [vmem:[#allocation5 + $0x7] sm:$0x1] %vm484_vm0, %v619_v53  ;;  %v763_v58 = vadd.f32 %v762_v54, %v761_v57  ;;  %vm753_vm11 = vmor %vm751_vm10, %vm752_vm9  ;;  %vm1664_vm10 = vcmp.gt.s32.totalorder %v3996_v34, 7 }
  0xfe   : > { %v748_v59 = vsub.f32 1.0, %v747_v56 }
  0xff   : > { %3324 = vtanh.f32 %v763_v58 }
 0x100   : > { %v749_v61 = vmul.f32 %v3323_v55, %v748_v59 }
 0x102   : > { %v750_v63 = vadd.f32 %v3323_v55, %v749_v61 }
 0x104   : > { %v754_v7 = vsel %vm753_vm11, %v3323_v55, %v750_v63  ;;  %v1025_v55 = vsel %vm1024_vm14, 1, %v3726_v33 }
 0x105   : > { %v3325_v8 = vpop.eup %3324  ;;  %v759_v10 = vsel %vm756_vm12, %v758_v1, %v754_v7  ;;  %1027 = vperm.xlu1 %3308, %v1025_v55   ;;  %v1153_v7 = vsel %vm1152_vm4, 1, %v3726_v33 }
 0x106   : > { %v765_v11 = vsub.f32 1.0, %v759_v10  ;;  %v767_v13 = vmul.f32 %v759_v10, %v3948_v16 }
 0x108   : > { %v766_v12 = vmul.f32 %v3325_v8, %v765_v11  ;;  %v888_v8 = vld [vmem:[#allocation5 + $0x1] sm:$0x1] }
 0x10a   : > { %v768_v17 = vadd.f32 %v767_v13, %v766_v12 }
 0x10c   : > { %v776_v18 = vsel %vm4097_vm13, %v768_v17, %v3948_v16  ;;  %v1665_v17 = vsel %vm1664_vm10, 1, %v3726_v33 }
 0x10d   : > { %777 = vst.msk [vmem:[#allocation6] sm:$0x1] %vm484_vm0, %v776_v18  ;;  %1155 = vperm.xlu1 %3308, %v1153_v7  }
 0x10e   : > { %778 = vst.msk [vmem:[#allocation2] sm:$0x1] %vm484_vm0, %v776_v18  ;;  %v900_v18 = vpop.permute.xlu0 %899 }
 0x114   : > { %v4106_v19 = vld [vmem:[#allocation6] sm:$0x1] }
 0x115   : > { %v4108_v20 = vld [vmem:[#allocation2] sm:$0x1]  ;;  %3134 = vmatmul.msk.f32.vlgmr.msrb.gmra.mxu2 %vm4720_vm1, %v4106_v19  ;;  %3135 = vmatmul.msk.f32.vlgmr.msrb.gmra.mxu3 %vm4720_vm1, %v4106_v19 }
 0x116   : > { %1701 = vst [vmem:[#allocation1] ss:$9 sm:$0xff] %v4108_v20  ;;  %3136 = vmatmul.msk.f32.vlgmr.msra.gmra.mxu0 %vm4720_vm1, %v4106_v19  ;;  %1091 = vmatpush.msrb.mxu2 %v3989_v30 }
 0x117   : > { %1179 = vmatpush.msrb.mxu3 %v3918_v3  ;;  %1199 = vmatpush.msra.mxu0 %v3960_v21 }
 0x118   : > { %1092 = vmatpush.msrb.mxu2 %v3991_v31  ;;  %1667 = vperm.xlu1 %3308, %v1665_v17   ;;  %v1016_v17 = vld [vmem:[#allocation5 + $0x2] sm:$0x1] }
 0x119   : > { %1180 = vmatpush.msrb.mxu3 %v3921_v4  ;;  %1200 = vmatpush.msra.mxu0 %v3962_v22 }
 0x11a   : > { %1093 = vmatpush.msrb.mxu2 %v4000_v35 }
 0x11b   : > { %1181 = vmatpush.msrb.mxu3 %v3923_v6  ;;  %1201 = vmatpush.msra.mxu0 %v3971_v24 }
 0x11c   : > { %1094 = vmatpush.msrb.mxu2 %v4009_v37 }
 0x11d   : > { %1182 = vmatpush.msrb.mxu3 %v3946_v15  ;;  %1202 = vmatpush.msra.mxu0 %v3978_v27 }
 0x193   : > { %v840_v56 = vpop.f32.mrf.mxu0 }
 0x194   : > { %v841_v60 = vadd.f32 %v840_v56, %v4085_v29 }
 0x198   : > { %v800_v16 = vpop.f32.mrf.mxu2  ;;  %v820_v23 = vpop.f32.mrf.mxu3 }
 0x199   : > { %v801_v25 = vadd.f32 %v800_v16, %v4064_v49  ;;  %v821_v26 = vadd.f32 %v820_v23, %v4075_v2 }
 0x19b   : > { %v845_v36 = vadd.f32 %v844_v28, %v801_v25  ;;  %v867_v38 = vadd.f32 %v866_v32, %v821_v26  ;;  %v901_v25 = vperm.slane %v900_v18, 0 }
 0x19d   : > { %v3137_v39 = vmul.f32 -1.442695, %v845_v36  ;;  %v3138_v40 = vmul.f32 -1.442695, %v867_v38  ;;  %vm4139_vm11 = vcmp.eq.s32.totalorder %v901_v25, 1 }
 0x19f   : > { %3326 = vpow2.f32 %v3137_v39 }
 0x1a0   : > { %3328 = vpow2.f32 %v3138_v40 }
 0x1a5   : > { %v3327_v41 = vpop.eup %3326 }
 0x1a6   : > { %v3329_v42 = vpop.eup %3328  ;;  %v849_v43 = vadd.f32 1.0, %v3327_v41 }
 0x1a7   : > { %v871_v44 = vadd.f32 1.0, %v3329_v42  ;;  %v972_v42 = vld [vmem:[#allocation3 + $0x2] sm:$0x1] }
 0x1a8   : > { %3330 = vrcp.f32 %v849_v43  ;;  %v861_v51 = vand.u32 2147483648, %v849_v43  ;;  %v859_v54 = vand.u32 2147483647, %v849_v43  ;;  %vm855_vm2 = vweird.f32 %v849_v43 }
 0x1a9   : > { %3332 = vrcp.f32 %v871_v44  ;;  %v883_v5 = vand.u32 2147483648, %v871_v44  ;;  %vm877_vm7 = vweird.f32 %v871_v44  ;;  %v881_v9 = vand.u32 2147483647, %v871_v44 }
 0x1aa   : > { %v862_v59 = vor.u32 1.1754944e-38, %v861_v51  ;;  %vm860_vm5 = vcmp.eq.f32.partialorder %v859_v54, 8.507059e+37 }
 0x1ab   : > { %v884_v12 = vor.u32 1.1754944e-38, %v883_v5  ;;  %vm882_vm9 = vcmp.eq.f32.partialorder %v881_v9, 8.507059e+37 }
 0x1ae   : > { %v3331_v45 = vpop.eup %3330 }
 0x1af   : > { %v3333_v46 = vpop.eup %3332  ;;  %v851_v47 = vmul.f32 %v3331_v45, %v849_v43  ;;  %vm856_vm15 = vweird.f32 %v3331_v45 }
 0x1b0   : > { %v873_v48 = vmul.f32 %v3333_v46, %v871_v44  ;;  %vm857_vm3 = vmor %vm855_vm2, %vm856_vm15  ;;  %vm878_vm6 = vweird.f32 %v3333_v46 }
 0x1b1   : > { %v852_v50 = vsub.f32 1.0, %v851_v47  ;;  %vm879_vm8 = vmor %vm877_vm7, %vm878_vm6  ;;  %v994_v47 = vld [vmem:[#allocation4 + $0x2] sm:$0x1] }
 0x1b2   : > { %v874_v52 = vsub.f32 1.0, %v873_v48 }
 0x1b3   : > { %v853_v53 = vmul.f32 %v3331_v45, %v852_v50 }
 0x1b4   : > { %v875_v57 = vmul.f32 %v3333_v46, %v874_v52 }
 0x1b5   : > { %v854_v58 = vadd.f32 %v3331_v45, %v853_v53 }
 0x1b6   : > { %v876_v63 = vadd.f32 %v3333_v46, %v875_v57 }
 0x1b7   : > { %v858_v61 = vsel %vm857_vm3, %v3331_v45, %v854_v58 }
 0x1b8   : > { %v863_v62 = vsel %vm860_vm5, %v862_v59, %v858_v61  ;;  %v880_v11 = vsel %vm879_vm8, %v3333_v46, %v876_v63  ;;  %vm1280_vm8 = vcmp.gt.s32.totalorder %v3996_v34, 4 }
 0x1b9   : > { %v889_v1 = vmul.f32 %v863_v62, %v841_v60  ;;  %v885_v13 = vsel %vm882_vm9, %v884_v12, %v880_v11 }
 0x1ba   : > { %v892_v16 = vsub.f32 1.0, %v885_v13  ;;  %v894_v28 = vmul.f32 %v885_v13, %v4106_v19 }
 0x1bb   : > { %v890_v10 = vadd.f32 %v889_v1, %v888_v8 }
 0x1bd   : > { %3334 = vtanh.f32 %v890_v10 }
 0x1c3   : > { %v3335_v23 = vpop.eup %3334 }
 0x1c4   : > { %v893_v26 = vmul.f32 %v3335_v23, %v892_v16 }
 0x1c6   : > { %v895_v32 = vadd.f32 %v894_v28, %v893_v26 }
 0x1c8   : > { %v903_v38 = vsel %vm4139_vm11, %v895_v32, %v4106_v19  ;;  %v1028_v32 = vpop.permute.xlu1 %1027 }
 0x1c9   : > { %904 = vst.msk [vmem:[#allocation6] sm:$0x1] %vm484_vm0, %v903_v38 }
 0x1ca   : > { %906 = vst.msk [vmem:[#allocation2 + $0x1] sm:$0x1] %vm484_vm0, %v903_v38  ;;  %v1029_v38 = vperm.slane %v1028_v32, 0 }
 0x1cc   : > { %vm4175_vm7 = vcmp.eq.s32.totalorder %v1029_v38, 1  ;;  %v1144_v38 = vld [vmem:[#allocation5 + $0x3] sm:$0x1] }
 0x1d0   : > { %v4148_v39 = vld [vmem:[#allocation6] sm:$0x1] }
 0x1d1   : > { %v4150_v40 = vld [vmem:[#allocation2 + $0x1] sm:$0x1]  ;;  %3139 = vmatmul.msk.f32.vlgmr.msra.gmra.mxu1 %vm4720_vm1, %v4148_v39  ;;  %3140 = vmatmul.msk.f32.vlgmr.msra.gmra.mxu2 %vm4720_vm1, %v4148_v39 }
 0x1d2   : > { %1703 = vst [vmem:[#allocation1 + $0x1] ss:$9 sm:$0xff] %v4150_v40  ;;  %3141 = vmatmul.msk.f32.vlgmr.msra.gmra.mxu3 %vm4720_vm1, %v4148_v39  ;;  %1219 = vmatpush.msra.mxu1 %v3989_v30 }
 0x1d3   : > { %1307 = vmatpush.msra.mxu2 %v3918_v3  ;;  %1327 = vmatpush.msra.mxu3 %v3960_v21 }
 0x1d4   : > { %1220 = vmatpush.msra.mxu1 %v3991_v31 }
 0x1d5   : > { %1308 = vmatpush.msra.mxu2 %v3921_v4  ;;  %1328 = vmatpush.msra.mxu3 %v3962_v22 }
 0x1d6   : > { %1221 = vmatpush.msra.mxu1 %v4000_v35 }
 0x1d7   : > { %1309 = vmatpush.msra.mxu2 %v3923_v6  ;;  %1329 = vmatpush.msra.mxu3 %v3971_v24 }
 0x1d8   : > { %1222 = vmatpush.msra.mxu1 %v4009_v37 }
 0x1d9   : > { %1310 = vmatpush.msra.mxu2 %v3946_v15  ;;  %1330 = vmatpush.msra.mxu3 %v3978_v27 }
 0x24e   : > { %v928_v19 = vpop.f32.mrf.mxu1 }
 0x24f   : > { %v929_v41 = vadd.f32 %v928_v19, %v4064_v49 }
 0x251   : > { %v973_v43 = vadd.f32 %v972_v42, %v929_v41 }
 0x253   : > { %v3142_v44 = vmul.f32 -1.442695, %v973_v43 }
 0x254   : > { %v948_v45 = vpop.f32.mrf.mxu2 }
 0x255   : > { %3336 = vpow2.f32 %v3142_v44  ;;  %v949_v46 = vadd.f32 %v948_v45, %v4075_v2  ;;  %v968_v62 = vpop.f32.mrf.mxu3 }
 0x256   : > { %v969_v8 = vadd.f32 %v968_v62, %v4085_v29 }
 0x257   : > { %v995_v48 = vadd.f32 %v994_v47, %v949_v46 }
 0x259   : > { %v3143_v50 = vmul.f32 -1.442695, %v995_v48 }
 0x25b   : > { %v3337_v51 = vpop.eup %3336  ;;  %3338 = vpow2.f32 %v3143_v50 }
 0x25c   : > { %v977_v52 = vadd.f32 1.0, %v3337_v51  ;;  %v1100_v51 = vld [vmem:[#allocation3 + $0x3] sm:$0x1] }
 0x25e   : > { %3340 = vrcp.f32 %v977_v52  ;;  %v989_v58 = vand.u32 2147483648, %v977_v52  ;;  %v987_v60 = vand.u32 2147483647, %v977_v52  ;;  %vm983_vm14 = vweird.f32 %v977_v52 }
 0x260   : > { %v990_v5 = vor.u32 1.1754944e-38, %v989_v58  ;;  %vm988_vm2 = vcmp.eq.f32.partialorder %v987_v60, 8.507059e+37 }
 0x261   : > { %v3339_v53 = vpop.eup %3338 }
 0x262   : > { %v999_v54 = vadd.f32 1.0, %v3339_v53 }
 0x264   : > { %v3341_v55 = vpop.eup %3340  ;;  %3342 = vrcp.f32 %v999_v54  ;;  %v1011_v13 = vand.u32 2147483648, %v999_v54  ;;  %v1009_v18 = vand.u32 2147483647, %v999_v54  ;;  %vm1005_vm4 = vweird.f32 %v999_v54 }
 0x265   : > { %v979_v56 = vmul.f32 %v3341_v55, %v977_v52  ;;  %vm984_vm12 = vweird.f32 %v3341_v55  ;;  %v1122_v52 = vld [vmem:[#allocation4 + $0x3] sm:$0x1] }
 0x266   : > { %vm985_vm15 = vmor %vm983_vm14, %vm984_vm12  ;;  %v1012_v26 = vor.u32 1.1754944e-38, %v1011_v13  ;;  %vm1010_vm6 = vcmp.eq.f32.partialorder %v1009_v18, 8.507059e+37  ;;  %vm1408_vm14 = vcmp.gt.s32.totalorder %v3996_v34, 5 }
 0x267   : > { %v980_v57 = vsub.f32 1.0, %v979_v56 }
 0x269   : > { %v981_v59 = vmul.f32 %v3341_v55, %v980_v57 }
 0x26a   : > { %v3343_v61 = vpop.eup %3342 }
 0x26b   : > { %v1001_v63 = vmul.f32 %v3343_v61, %v999_v54  ;;  %v982_v1 = vadd.f32 %v3341_v55, %v981_v59  ;;  %vm1006_vm3 = vweird.f32 %v3343_v61 }
 0x26c   : > { %vm1007_vm5 = vmor %vm1005_vm4, %vm1006_vm3 }
 0x26d   : > { %v1002_v7 = vsub.f32 1.0, %v1001_v63  ;;  %v986_v9 = vsel %vm985_vm15, %v3341_v55, %v982_v1 }
 0x26e   : > { %v991_v10 = vsel %vm988_vm2, %v990_v5, %v986_v9  ;;  %v1281_v9 = vsel %vm1280_vm8, 1, %v3726_v33 }
 0x26f   : > { %v1017_v11 = vmul.f32 %v991_v10, %v969_v8  ;;  %v1003_v12 = vmul.f32 %v3343_v61, %v1002_v7  ;;  %1283 = vperm.xlu2 %3309, %v1281_v9  }
 0x271   : > { %v1018_v16 = vadd.f32 %v1017_v11, %v1016_v17  ;;  %v1004_v23 = vadd.f32 %v3343_v61, %v1003_v12 }
 0x273   : > { %3344 = vtanh.f32 %v1018_v16  ;;  %v1008_v25 = vsel %vm1007_vm5, %v3343_v61, %v1004_v23 }
 0x274   : > { %v1013_v28 = vsel %vm1010_vm6, %v1012_v26, %v1008_v25 }
 0x275   : > { %v1020_v19 = vsub.f32 1.0, %v1013_v28  ;;  %v1022_v43 = vmul.f32 %v1013_v28, %v4148_v39  ;;  %v1409_v28 = vsel %vm1408_vm14, 1, %v3726_v33 }
 0x277   : > { %1411 = vperm.xlu2 %3309, %v1409_v28  }
 0x279   : > { %v3345_v41 = vpop.eup %3344 }
 0x27a   : > { %v1021_v42 = vmul.f32 %v3345_v41, %v1020_v19 }
 0x27c   : > { %v1023_v45 = vadd.f32 %v1022_v43, %v1021_v42  ;;  %v1156_v43 = vpop.permute.xlu1 %1155 }
 0x27e   : > { %v1031_v46 = vsel %vm4175_vm7, %v1023_v45, %v4148_v39 }
 0x27f   : > { %1032 = vst.msk [vmem:[#allocation6] sm:$0x1] %vm484_vm0, %v1031_v46 }
 0x280   : > { %1034 = vst.msk [vmem:[#allocation2 + $0x2] sm:$0x1] %vm484_vm0, %v1031_v46 }
 0x286   : > { %v4184_v47 = vld [vmem:[#allocation6] sm:$0x1] }
 0x287   : > { %v4186_v48 = vld [vmem:[#allocation2 + $0x2] sm:$0x1]  ;;  %3144 = vmatmul.msk.f32.vlgmr.msrb.gmra.mxu0 %vm4720_vm1, %v4184_v47  ;;  %3145 = vmatmul.msk.f32.vlgmr.msrb.gmra.mxu1 %vm4720_vm1, %v4184_v47 }
 0x288   : > { %1705 = vst [vmem:[#allocation1 + $0x2] ss:$9 sm:$0xff] %v4186_v48  ;;  %3146 = vmatmul.msk.f32.vlgmr.msrb.gmra.mxu2 %vm4720_vm1, %v4184_v47  ;;  %1347 = vmatpush.msrb.mxu0 %v3989_v30 }
 0x289   : > { %1435 = vmatpush.msrb.mxu1 %v3918_v3  ;;  %1455 = vmatpush.msrb.mxu2 %v3960_v21 }
 0x28a   : > { %1348 = vmatpush.msrb.mxu0 %v3991_v31 }
 0x28b   : > { %1436 = vmatpush.msrb.mxu1 %v3921_v4  ;;  %1456 = vmatpush.msrb.mxu2 %v3962_v22 }
 0x28c   : > { %1349 = vmatpush.msrb.mxu0 %v4000_v35 }
 0x28d   : > { %1437 = vmatpush.msrb.mxu1 %v3923_v6  ;;  %1457 = vmatpush.msrb.mxu2 %v3971_v24 }
 0x28e   : > { %1350 = vmatpush.msrb.mxu0 %v4009_v37 }
 0x28f   : > { %1438 = vmatpush.msrb.mxu1 %v3946_v15  ;;  %1458 = vmatpush.msrb.mxu2 %v3978_v27 }
 0x304   : > { %v1056_v3 = vpop.f32.mrf.mxu0  ;;  %v1076_v39 = vpop.f32.mrf.mxu1 }
 0x305   : > { %v1057_v50 = vadd.f32 %v1056_v3, %v4064_v49  ;;  %v1077_v4 = vadd.f32 %v1076_v39, %v4075_v2  ;;  %v1157_v3 = vperm.slane %v1156_v43, 0  ;;  %v1284_v43 = vpop.permute.xlu2 %1283 }
 0x307   : > { %v1101_v53 = vadd.f32 %v1100_v51, %v1057_v50  ;;  %v1123_v54 = vadd.f32 %v1122_v52, %v1077_v4  ;;  %vm4215_vm6 = vcmp.eq.s32.totalorder %v1157_v3, 1 }
 0x309   : > { %v3147_v55 = vmul.f32 -1.442695, %v1101_v53  ;;  %v3148_v6 = vmul.f32 -1.442695, %v1123_v54  ;;  %v3477_v54 = vld [vmem:[#allocation13 + $0x10] sm:$0xff] }
 0x30b   : > { %3346 = vpow2.f32 %v3147_v55  ;;  %v1096_v11 = vpop.f32.mrf.mxu2  ;;  %v3478_v55 = vld [vmem:[#allocation13 + $0x8] sm:$0xff] }
 0x30c   : > { %3348 = vpow2.f32 %v3148_v6  ;;  %v1097_v17 = vadd.f32 %v1096_v11, %v4085_v29  ;;  %v3479_v6 = vld [vmem:[#allocation13] sm:$0xff] }
 0x311   : > { %v3347_v56 = vpop.eup %3346 }
 0x312   : > { %v3349_v57 = vpop.eup %3348  ;;  %v1105_v58 = vadd.f32 1.0, %v3347_v56 }
 0x313   : > { %v1127_v15 = vadd.f32 1.0, %v3349_v57 }
 0x314   : > { %3350 = vrcp.f32 %v1105_v58  ;;  %v1117_v5 = vand.u32 2147483648, %v1105_v58  ;;  %v1115_v8 = vand.u32 2147483647, %v1105_v58  ;;  %vm1111_vm10 = vweird.f32 %v1105_v58 }
 0x315   : > { %3352 = vrcp.f32 %v1127_v15  ;;  %v1139_v25 = vand.u32 2147483648, %v1127_v15  ;;  %vm1133_vm3 = vweird.f32 %v1127_v15  ;;  %v1137_v32 = vand.u32 2147483647, %v1127_v15 }
 0x316   : > { %v1118_v13 = vor.u32 1.1754944e-38, %v1117_v5  ;;  %vm1116_vm15 = vcmp.eq.f32.partialorder %v1115_v8, 8.507059e+37 }
 0x317   : > { %v1140_v42 = vor.u32 1.1754944e-38, %v1139_v25  ;;  %vm1138_vm5 = vcmp.eq.f32.partialorder %v1137_v32, 8.507059e+37  ;;  %v1272_v32 = vld [vmem:[#allocation5 + $0x4] sm:$0x1] }
 0x31a   : > { %v3351_v59 = vpop.eup %3350 }
 0x31b   : > { %v3353_v60 = vpop.eup %3352  ;;  %v1107_v61 = vmul.f32 %v3351_v59, %v1105_v58  ;;  %vm1112_vm9 = vweird.f32 %v3351_v59 }
 0x31c   : > { %v1129_v62 = vmul.f32 %v3353_v60, %v1127_v15  ;;  %vm1113_vm12 = vmor %vm1111_vm10, %vm1112_vm9  ;;  %vm1134_vm2 = vweird.f32 %v3353_v60 }
 0x31d   : > { %v1108_v63 = vsub.f32 1.0, %v1107_v61  ;;  %vm1135_vm4 = vmor %vm1133_vm3, %vm1134_vm2 }
 0x31e   : > { %v1130_v1 = vsub.f32 1.0, %v1129_v62 }
 0x31f   : > { %v1109_v7 = vmul.f32 %v3351_v59, %v1108_v63 }
 0x320   : > { %v1131_v10 = vmul.f32 %v3353_v60, %v1130_v1 }
 0x321   : > { %v1110_v12 = vadd.f32 %v3351_v59, %v1109_v7 }
 0x322   : > { %v1132_v23 = vadd.f32 %v3353_v60, %v1131_v10 }
 0x323   : > { %v1114_v18 = vsel %vm1113_vm12, %v3351_v59, %v1110_v12 }
 0x324   : > { %v1119_v16 = vsel %vm1116_vm15, %v1118_v13, %v1114_v18  ;;  %v1136_v41 = vsel %vm1135_vm4, %v3353_v60, %v1132_v23 }
 0x325   : > { %v1145_v26 = vmul.f32 %v1119_v16, %v1097_v17  ;;  %v1141_v34 = vsel %vm1138_vm5, %v1140_v42, %v1136_v41 }
 0x326   : > { %v1148_v45 = vsub.f32 1.0, %v1141_v34  ;;  %v1150_v50 = vmul.f32 %v1141_v34, %v4184_v47 }
 0x327   : > { %v1146_v19 = vadd.f32 %v1145_v26, %v1144_v38 }
 0x329   : > { %3354 = vtanh.f32 %v1146_v19 }
 0x32f   : > { %v3355_v46 = vpop.eup %3354 }
 0x330   : > { %v1149_v39 = vmul.f32 %v3355_v46, %v1148_v45  ;;  %v1285_v45 = vperm.slane %v1284_v43, 0  ;;  %v1412_v43 = vpop.permute.xlu2 %1411 }
 0x332   : > { %v1151_v4 = vadd.f32 %v1150_v50, %v1149_v39  ;;  %vm4247_vm4 = vcmp.eq.s32.totalorder %v1285_v45, 1 }
 0x334   : > { %v1159_v51 = vsel %vm4215_vm6, %v1151_v4, %v4184_v47  ;;  %v3476_v47 = vld [vmem:[#allocation13 + $0x18] sm:$0xff] }
 0x335   : > { %1160 = vst.msk [vmem:[#allocation6] sm:$0x1] %vm484_vm0, %v1159_v51 }
 0x336   : > { %1162 = vst.msk [vmem:[#allocation2 + $0x3] sm:$0x1] %vm484_vm0, %v1159_v51 }
 0x33c   : > { %v4224_v52 = vld [vmem:[#allocation6] sm:$0x1] }
 0x33d   : > { %v4226_v53 = vld [vmem:[#allocation2 + $0x3] sm:$0x1]  ;;  %3149 = vmatmul.msk.f32.vlgmr.msrb.gmra.mxu3 %vm4720_vm1, %v4224_v52  ;;  %3150 = vmatmul.msk.f32.vlgmr.msra.gmra.mxu0 %vm4720_vm1, %v4224_v52 }
 0x33e   : > { %1707 = vst [vmem:[#allocation1 + $0x3] ss:$9 sm:$0xff] %v4226_v53  ;;  %3151 = vmatmul.msk.f32.vlgmr.msra.gmra.mxu1 %vm4720_vm1, %v4224_v52  ;;  %1475 = vmatpush.msrb.mxu3 %v3989_v30 }
 0x33f   : > { %1563 = vmatpush.msra.mxu0 %v3476_v47  ;;  %1583 = vmatpush.msra.mxu1 %v3960_v21 }
 0x340   : > { %1476 = vmatpush.msrb.mxu3 %v3991_v31  ;;  %v1250_v31 = vld [vmem:[#allocation4 + $0x4] sm:$0x1] }
 0x341   : > { %1564 = vmatpush.msra.mxu0 %v3477_v54  ;;  %1584 = vmatpush.msra.mxu1 %v3962_v22 }
 0x342   : > { %1477 = vmatpush.msrb.mxu3 %v4000_v35  ;;  %v1228_v35 = vld [vmem:[#allocation3 + $0x4] sm:$0x1] }
 0x343   : > { %1565 = vmatpush.msra.mxu0 %v3478_v55  ;;  %1585 = vmatpush.msra.mxu1 %v3971_v24 }
 0x344   : > { %1478 = vmatpush.msrb.mxu3 %v4009_v37 }
 0x345   : > { %1566 = vmatpush.msra.mxu0 %v3479_v6  ;;  %1586 = vmatpush.msra.mxu1 %v3978_v27  ;;  %v3481_v6 = vld [vmem:[#allocation13 + $0x50] sm:$0xff] }
 0x3ba   : > { %v1204_v30 = vpop.f32.mrf.mxu0 }
 0x3bb   : > { %v1205_v21 = vadd.f32 %v1204_v30, %v4075_v2  ;;  %v1224_v11 = vpop.f32.mrf.mxu1  ;;  %v3482_v30 = vld [vmem:[#allocation13 + $0x48] sm:$0xff] }
 0x3bc   : > { %v1225_v18 = vadd.f32 %v1224_v11, %v4085_v29 }
 0x3bd   : > { %v1251_v56 = vadd.f32 %v1250_v31, %v1205_v21  ;;  %v3483_v21 = vld [vmem:[#allocation13 + $0x40] sm:$0xff] }
 0x3bf   : > { %v3153_v57 = vmul.f32 -1.442695, %v1251_v56 }
 0x3c0   : > { %v1184_v58 = vpop.f32.mrf.mxu3 }
 0x3c1   : > { %3356 = vpow2.f32 %v3153_v57  ;;  %v1185_v22 = vadd.f32 %v1184_v58, %v4064_v49 }
 0x3c3   : > { %v1229_v15 = vadd.f32 %v1228_v35, %v1185_v22  ;;  %v1356_v22 = vld [vmem:[#allocation3 + $0x5] sm:$0x1]  ;;  %v1378_v35 = vld [vmem:[#allocation4 + $0x5] sm:$0x1] }
 0x3c5   : > { %v3152_v59 = vmul.f32 -1.442695, %v1229_v15 }
 0x3c7   : > { %v3357_v24 = vpop.eup %3356  ;;  %3358 = vpow2.f32 %v3152_v59 }
 0x3c8   : > { %v1255_v37 = vadd.f32 1.0, %v3357_v24 }
 0x3ca   : > { %3360 = vrcp.f32 %v1255_v37  ;;  %v1267_v26 = vand.u32 2147483648, %v1255_v37  ;;  %vm1261_vm15 = vweird.f32 %v1255_v37  ;;  %v1265_v38 = vand.u32 2147483647, %v1255_v37 }
 0x3cc   : > { %v1268_v42 = vor.u32 1.1754944e-38, %v1267_v26  ;;  %vm1266_vm3 = vcmp.eq.f32.partialorder %v1265_v38, 8.507059e+37 }
 0x3cd   : > { %v3359_v60 = vpop.eup %3358 }
 0x3ce   : > { %v1233_v61 = vadd.f32 1.0, %v3359_v60 }
 0x3d0   : > { %3362 = vrcp.f32 %v1233_v61  ;;  %v3361_v27 = vpop.eup %3360  ;;  %v1245_v8 = vand.u32 2147483648, %v1233_v61  ;;  %v1243_v10 = vand.u32 2147483647, %v1233_v61  ;;  %vm1239_vm9 = vweird.f32 %v1233_v61 }
 0x3d1   : > { %v1257_v62 = vmul.f32 %v3361_v27, %v1255_v37  ;;  %vm1262_vm14 = vweird.f32 %v3361_v27 }
 0x3d2   : > { %v1246_v17 = vor.u32 1.1754944e-38, %v1245_v8  ;;  %vm1244_vm12 = vcmp.eq.f32.partialorder %v1243_v10, 8.507059e+37  ;;  %vm1263_vm2 = vmor %vm1261_vm15, %vm1262_vm14 }
 0x3d3   : > { %v1258_v5 = vsub.f32 1.0, %v1257_v62 }
 0x3d5   : > { %v1259_v12 = vmul.f32 %v3361_v27, %v1258_v5 }
 0x3d6   : > { %v3363_v63 = vpop.eup %3362 }
 0x3d7   : > { %v1235_v1 = vmul.f32 %v3363_v63, %v1233_v61  ;;  %vm1240_vm8 = vweird.f32 %v3363_v63  ;;  %v1260_v25 = vadd.f32 %v3361_v27, %v1259_v12 }
 0x3d8   : > { %vm1241_vm10 = vmor %vm1239_vm9, %vm1240_vm8 }
 0x3d9   : > { %v1236_v7 = vsub.f32 1.0, %v1235_v1  ;;  %v1264_v41 = vsel %vm1263_vm2, %v3361_v27, %v1260_v25 }
 0x3da   : > { %v1269_v34 = vsel %vm1266_vm3, %v1268_v42, %v1264_v41 }
 0x3db   : > { %v1237_v9 = vmul.f32 %v3363_v63, %v1236_v7  ;;  %v1276_v46 = vsub.f32 1.0, %v1269_v34  ;;  %v1278_v50 = vmul.f32 %v1269_v34, %v4224_v52 }
 0x3dd   : > { %v1238_v13 = vadd.f32 %v3363_v63, %v1237_v9 }
 0x3df   : > { %v1242_v16 = vsel %vm1241_vm10, %v3363_v63, %v1238_v13 }
 0x3e0   : > { %v1247_v23 = vsel %vm1244_vm12, %v1246_v17, %v1242_v16 }
 0x3e1   : > { %v1273_v28 = vmul.f32 %v1247_v23, %v1225_v18 }
 0x3e3   : > { %v1274_v19 = vadd.f32 %v1273_v28, %v1272_v32  ;;  %v1400_v32 = vld [vmem:[#allocation5 + $0x5] sm:$0x1] }
 0x3e5   : > { %3364 = vtanh.f32 %v1274_v19 }
 0x3eb   : > { %v3365_v3 = vpop.eup %3364 }
 0x3ec   : > { %v1277_v39 = vmul.f32 %v3365_v3, %v1276_v46  ;;  %v1413_v3 = vperm.slane %v1412_v43, 0  ;;  %v1540_v43 = vpop.permute.xlu0 %1539 }
 0x3ee   : > { %v1279_v51 = vadd.f32 %v1278_v50, %v1277_v39  ;;  %vm4271_vm3 = vcmp.eq.s32.totalorder %v1413_v3, 1 }
 0x3f0   : > { %v1287_v47 = vsel %vm4247_vm4, %v1279_v51, %v4224_v52  ;;  %v3480_v52 = vld [vmem:[#allocation13 + $0x58] sm:$0xff] }
 0x3f1   : > { %1288 = vst.msk [vmem:[#allocation6] sm:$0x1] %vm484_vm0, %v1287_v47 }
 0x3f2   : > { %1290 = vst.msk [vmem:[#allocation2 + $0x4] sm:$0x1] %vm484_vm0, %v1287_v47 }
 0x3f8   : > { %v4256_v54 = vld [vmem:[#allocation6] sm:$0x1] }
 0x3f9   : > { %v4258_v55 = vld [vmem:[#allocation2 + $0x4] sm:$0x1]  ;;  %3154 = vmatmul.msk.f32.vlgmr.msra.gmra.mxu2 %vm4720_vm1, %v4256_v54  ;;  %3155 = vmatmul.msk.f32.vlgmr.msra.gmra.mxu3 %vm4720_vm1, %v4256_v54 }
 0x3fa   : > { %1709 = vst [vmem:[#allocation1 + $0x4] ss:$9 sm:$0xff] %v4258_v55  ;;  %3156 = vmatmul.msk.f32.vlgmr.msrb.gmra.mxu0 %vm4720_vm1, %v4256_v54  ;;  %1603 = vmatpush.msra.mxu2 %v3480_v52 }
 0x3fc   : > { %1604 = vmatpush.msra.mxu2 %v3481_v6 }
 0x3fe   : > { %1605 = vmatpush.msra.mxu2 %v3482_v30 }
 0x400   : > { %1606 = vmatpush.msra.mxu2 %v3483_v21  ;;  %v4291_v21 = vld [vmem:[#allocation16] sm:$0x1] }
 0x477   : > { %v1352_v11 = vpop.f32.mrf.mxu0 }
 0x478   : > { %v1353_v18 = vadd.f32 %v1352_v11, %v4085_v29 }
 0x47c   : > { %v1312_v31 = vpop.f32.mrf.mxu2  ;;  %v1332_v56 = vpop.f32.mrf.mxu3 }
 0x47d   : > { %v1313_v57 = vadd.f32 %v1312_v31, %v4064_v49  ;;  %v1333_v58 = vadd.f32 %v1332_v56, %v4075_v2  ;;  %v1484_v56 = vld [vmem:[#allocation3 + $0x6] sm:$0x1] }
 0x47f   : > { %v1357_v15 = vadd.f32 %v1356_v22, %v1313_v57  ;;  %v1379_v59 = vadd.f32 %v1378_v35, %v1333_v58  ;;  %v4294_v35 = vld [vmem:[#allocation16 + $0x1] sm:$0x1] }
 0x481   : > { %v3157_v24 = vmul.f32 -1.442695, %v1357_v15  ;;  %v3158_v37 = vmul.f32 -1.442695, %v1379_v59  ;;  %v1506_v59 = vld [vmem:[#allocation4 + $0x6] sm:$0x1] }
 0x483   : > { %3366 = vpow2.f32 %v3157_v24 }
 0x484   : > { %3368 = vpow2.f32 %v3158_v37 }
 0x489   : > { %v3367_v60 = vpop.eup %3366 }
 0x48a   : > { %v3369_v61 = vpop.eup %3368  ;;  %v1361_v27 = vadd.f32 1.0, %v3367_v60 }
 0x48b   : > { %v1383_v62 = vadd.f32 1.0, %v3369_v61 }
 0x48c   : > { %3370 = vrcp.f32 %v1361_v27  ;;  %v1373_v2 = vand.u32 2147483648, %v1361_v27  ;;  %v1371_v10 = vand.u32 2147483647, %v1361_v27  ;;  %vm1367_vm8 = vweird.f32 %v1361_v27 }
 0x48d   : > { %3372 = vrcp.f32 %v1383_v62  ;;  %v1395_v28 = vand.u32 2147483648, %v1383_v62  ;;  %vm1389_vm14 = vweird.f32 %v1383_v62  ;;  %v1393_v38 = vand.u32 2147483647, %v1383_v62 }
 0x48e   : > { %v1374_v17 = vor.u32 1.1754944e-38, %v1373_v2  ;;  %vm1372_vm10 = vcmp.eq.f32.partialorder %v1371_v10, 8.507059e+37 }
 0x48f   : > { %v1396_v42 = vor.u32 1.1754944e-38, %v1395_v28  ;;  %vm1394_vm2 = vcmp.eq.f32.partialorder %v1393_v38, 8.507059e+37 }
 0x492   : > { %v3371_v63 = vpop.eup %3370 }
 0x493   : > { %v3373_v1 = vpop.eup %3372  ;;  %v1363_v5 = vmul.f32 %v3371_v63, %v1361_v27  ;;  %vm1368_vm5 = vweird.f32 %v3371_v63 }
 0x494   : > { %v1385_v49 = vmul.f32 %v3373_v1, %v1383_v62  ;;  %vm1369_vm9 = vmor %vm1367_vm8, %vm1368_vm5  ;;  %vm1390_vm12 = vweird.f32 %v3373_v1 }
 0x495   : > { %v1364_v7 = vsub.f32 1.0, %v1363_v5  ;;  %vm1391_vm15 = vmor %vm1389_vm14, %vm1390_vm12 }
 0x496   : > { %v1386_v8 = vsub.f32 1.0, %v1385_v49 }
 0x497   : > { %v1365_v9 = vmul.f32 %v3371_v63, %v1364_v7 }
 0x498   : > { %v1387_v12 = vmul.f32 %v3373_v1, %v1386_v8 }
 0x499   : > { %v1366_v13 = vadd.f32 %v3371_v63, %v1365_v9 }
 0x49a   : > { %v1388_v25 = vadd.f32 %v3373_v1, %v1387_v12 }
 0x49b   : > { %v1370_v16 = vsel %vm1369_vm9, %v3371_v63, %v1366_v13 }
 0x49c   : > { %v1375_v23 = vsel %vm1372_vm10, %v1374_v17, %v1370_v16  ;;  %v1392_v41 = vsel %vm1391_vm15, %v3373_v1, %v1388_v25 }
 0x49d   : > { %v1401_v26 = vmul.f32 %v1375_v23, %v1353_v18  ;;  %v1397_v34 = vsel %vm1394_vm2, %v1396_v42, %v1392_v41 }
 0x49e   : > { %v1404_v45 = vsub.f32 1.0, %v1397_v34  ;;  %v1406_v50 = vmul.f32 %v1397_v34, %v4256_v54 }
 0x49f   : > { %v1402_v19 = vadd.f32 %v1401_v26, %v1400_v32  ;;  %v1528_v32 = vld [vmem:[#allocation5 + $0x6] sm:$0x1] }
 0x4a1   : > { %3374 = vtanh.f32 %v1402_v19 }
 0x4a7   : > { %v3375_v46 = vpop.eup %3374 }
 0x4a8   : > { %v1405_v39 = vmul.f32 %v3375_v46, %v1404_v45  ;;  %v1541_v46 = vperm.slane %v1540_v43, 0 }
 0x4aa   : > { %v1407_v51 = vadd.f32 %v1406_v50, %v1405_v39 }
 0x4ac   : > { %v1415_v52 = vsel %vm4271_vm3, %v1407_v51, %v4256_v54 }
 0x4ad   : > { %1416 = vst.msk [vmem:[#allocation6] sm:$0x1] %vm484_vm0, %v1415_v52 }
 0x4ae   : > { %1418 = vst.msk [vmem:[#allocation2 + $0x5] sm:$0x1] %vm484_vm0, %v1415_v52 }
 0x4b4   : > { %v4280_v6 = vld [vmem:[#allocation6] sm:$0x1] }
 0x4b5   : > { %v4282_v30 = vld [vmem:[#allocation2 + $0x5] sm:$0x1]  ;;  %3159 = vmatmul.msk.f32.vlgmr.msrb.gmra.mxu1 %vm4720_vm1, %v4280_v6  ;;  %3160 = vmatmul.msk.f32.vlgmr.msrb.gmra.mxu2 %vm4720_vm1, %v4280_v6 }
 0x4b6   : > { %1711 = vst [vmem:[#allocation1 + $0x5] ss:$9 sm:$0xff] %v4282_v30  ;;  %3161 = vmatmul.msk.f32.vlgmr.msrb.gmra.mxu3 %vm4720_vm1, %v4280_v6 }
 0x532   : > { %v1440_v54 = vpop.f32.mrf.mxu1 }
 0x533   : > { %v1441_v31 = vadd.f32 %v4291_v21, %v1440_v54 }
 0x535   : > { %v1485_v57 = vadd.f32 %v1484_v56, %v1441_v31 }
 0x537   : > { %v3162_v58 = vmul.f32 -1.442695, %v1485_v57 }
 0x538   : > { %v1460_v22 = vpop.f32.mrf.mxu2 }
 0x539   : > { %3376 = vpow2.f32 %v3162_v58  ;;  %v1461_v15 = vadd.f32 %v4294_v35, %v1460_v22  ;;  %v1480_v9 = vpop.f32.mrf.mxu3  ;;  %v1612_v22 = vld [vmem:[#allocation3 + $0x7] sm:$0x1] }
 0x53a   : > { %v1481_v17 = vadd.f32 %v1480_v9, %v4085_v29  ;;  %v1686_v9 = vld [vmem:[#allocation11 + $0x70] sm:$0xff] }
 0x53b   : > { %v1507_v24 = vadd.f32 %v1506_v59, %v1461_v15  ;;  %v1634_v15 = vld [vmem:[#allocation4 + $0x7] sm:$0x1] }
 0x53d   : > { %v3163_v37 = vmul.f32 -1.442695, %v1507_v24 }
 0x53f   : > { %v3377_v60 = vpop.eup %3376  ;;  %3378 = vpow2.f32 %v3163_v37 }
 0x540   : > { %v1489_v61 = vadd.f32 1.0, %v3377_v60 }
 0x542   : > { %3380 = vrcp.f32 %v1489_v61  ;;  %v1501_v49 = vand.u32 2147483648, %v1489_v61  ;;  %v1499_v2 = vand.u32 2147483647, %v1489_v61  ;;  %vm1495_vm8 = vweird.f32 %v1489_v61 }
 0x544   : > { %v1502_v12 = vor.u32 1.1754944e-38, %v1501_v49  ;;  %vm1500_vm10 = vcmp.eq.f32.partialorder %v1499_v2, 8.507059e+37 }
 0x545   : > { %v3379_v27 = vpop.eup %3378 }
 0x546   : > { %v1511_v62 = vadd.f32 1.0, %v3379_v27 }
 0x548   : > { %v3381_v63 = vpop.eup %3380  ;;  %3382 = vrcp.f32 %v1511_v62  ;;  %v1523_v25 = vand.u32 2147483648, %v1511_v62  ;;  %v1521_v28 = vand.u32 2147483647, %v1511_v62  ;;  %vm1517_vm14 = vweird.f32 %v1511_v62 }
 0x549   : > { %v1491_v1 = vmul.f32 %v3381_v63, %v1489_v61  ;;  %vm1496_vm5 = vweird.f32 %v3381_v63 }
 0x54a   : > { %vm1497_vm9 = vmor %vm1495_vm8, %vm1496_vm5  ;;  %v1524_v41 = vor.u32 1.1754944e-38, %v1523_v25  ;;  %vm1522_vm2 = vcmp.eq.f32.partialorder %v1521_v28, 8.507059e+37  ;;  %vm4299_vm5 = vcmp.eq.s32.totalorder %v1541_v46, 1  ;;  %v3486_v25 = vld [vmem:[#allocation16 + $0x2] sm:$0x1] }
 0x54b   : > { %v1492_v5 = vsub.f32 1.0, %v1491_v1 }
 0x54d   : > { %v1493_v7 = vmul.f32 %v3381_v63, %v1492_v5 }
 0x54e   : > { %v3383_v8 = vpop.eup %3382 }
 0x54f   : > { %v1513_v10 = vmul.f32 %v3383_v8, %v1511_v62  ;;  %v1494_v11 = vadd.f32 %v3381_v63, %v1493_v7  ;;  %vm1518_vm12 = vweird.f32 %v3383_v8 }
 0x550   : > { %vm1519_vm15 = vmor %vm1517_vm14, %vm1518_vm12 }
 0x551   : > { %v1514_v13 = vsub.f32 1.0, %v1513_v10  ;;  %v1498_v18 = vsel %vm1497_vm9, %v3381_v63, %v1494_v11 }
 0x552   : > { %v1503_v16 = vsel %vm1500_vm10, %v1502_v12, %v1498_v18 }
 0x553   : > { %v1515_v23 = vmul.f32 %v3383_v8, %v1514_v13  ;;  %v1529_v26 = vmul.f32 %v1503_v16, %v1481_v17  ;;  %v1685_v17 = vld [vmem:[#allocation11 + $0x68] sm:$0xff] }
 0x555   : > { %v1516_v38 = vadd.f32 %v3383_v8, %v1515_v23  ;;  %v1530_v19 = vadd.f32 %v1529_v26, %v1528_v32  ;;  %v1684_v23 = vld [vmem:[#allocation11 + $0x60] sm:$0xff] }
 0x557   : > { %v1520_v42 = vsel %vm1519_vm15, %v3383_v8, %v1516_v38  ;;  %3384 = vtanh.f32 %v1530_v19  ;;  %v1687_v8 = vld [vmem:[#allocation11 + $0x78] sm:$0xff] }
 0x558   : > { %v1525_v34 = vsel %vm1522_vm2, %v1524_v41, %v1520_v42  ;;  %1731 = vmatpush.msra.mxu3 %v1687_v8  ;;  %v4365_v8 = vld [vmem:[#allocation13 + $0xb8] sm:$0xff] }
 0x559   : > { %v1532_v29 = vsub.f32 1.0, %v1525_v34  ;;  %v1534_v39 = vmul.f32 %v1525_v34, %v4280_v6  ;;  %v1656_v34 = vld [vmem:[#allocation5 + $0x7] sm:$0x1] }
 0x55a   : > { %1732 = vmatpush.msra.mxu3 %v1686_v9  ;;  %v4367_v9 = vld [vmem:[#allocation13 + $0xb0] sm:$0xff] }
 0x55c   : > { %1733 = vmatpush.msra.mxu3 %v1685_v17 }
 0x55d   : > { %v3385_v45 = vpop.eup %3384 }
 0x55e   : > { %v1533_v3 = vmul.f32 %v3385_v45, %v1532_v29  ;;  %1734 = vmatpush.msra.mxu3 %v1684_v23 }
 0x560   : > { %v1535_v50 = vadd.f32 %v1534_v39, %v1533_v3  ;;  %v1668_v3 = vpop.permute.xlu1 %1667  ;;  %v4321_v39 = vld [vmem:[#allocation13 + $0x78] sm:$0xff] }
 0x561   : > { %1942 = vmatpush.msrb.mxu2 %v4321_v39 }
 0x562   : > { %v1543_v52 = vsel %vm4299_vm5, %v1535_v50, %v4280_v6  ;;  %v1766_v50 = vld [vmem:[#allocation11 + $0x98] sm:$0xff] }
 0x563   : > { %1544 = vst.msk [vmem:[#allocation6] sm:$0x1] %vm484_vm0, %v1543_v52  ;;  %1802 = vmatpush.msrb.mxu0 %v1766_v50 }
 0x564   : > { %1546 = vst.msk [vmem:[#allocation2 + $0x6] sm:$0x1] %vm484_vm0, %v1543_v52  ;;  %v4323_v52 = vld [vmem:[#allocation13 + $0x70] sm:$0xff] }
 0x565   : > { %1943 = vmatpush.msrb.mxu2 %v4323_v52 }
 0x56a   : > { %v4308_v54 = vld [vmem:[#allocation6] sm:$0x1] }
 0x56b   : > { %v4310_v31 = vld [vmem:[#allocation2 + $0x6] sm:$0x1]  ;;  %3164 = vmatmul.msk.f32.vlgmr.msra.gmra.mxu0 %vm4720_vm1, %v4308_v54  ;;  %3165 = vmatmul.msk.f32.vlgmr.msra.gmra.mxu1 %vm4720_vm1, %v4308_v54 }
 0x56c   : > { %1713 = vst [vmem:[#allocation1 + $0x6] ss:$9 sm:$0xff] %v4310_v31  ;;  %3166 = vmatmul.msk.f32.vlgmr.msra.gmra.mxu2 %vm4720_vm1, %v4308_v54 }
 0x5e8   : > { %v1568_v6 = vpop.f32.mrf.mxu0  ;;  %v1588_v56 = vpop.f32.mrf.mxu1 }
 0x5e9   : > { %v1569_v57 = vadd.f32 %v4291_v21, %v1568_v6  ;;  %v1589_v58 = vadd.f32 %v4294_v35, %v1588_v56  ;;  %v1765_v56 = vld [vmem:[#allocation11 + $0x90] sm:$0xff] }
 0x5ea   : > { %1803 = vmatpush.msrb.mxu0 %v1765_v56 }
 0x5eb   : > { %v1613_v59 = vadd.f32 %v1612_v22, %v1569_v57  ;;  %v1635_v24 = vadd.f32 %v1634_v15, %v1589_v58  ;;  %v4326_v57 = vld [vmem:[#allocation13 + $0x98] sm:$0xff]  ;;  %v1669_v22 = vperm.slane %v1668_v3, 0  ;;  %v4329_v15 = vld [vmem:[#allocation13 + $0x68] sm:$0xff] }
 0x5ec   : > { %1962 = vmatpush.msrb.mxu3 %v4326_v57  ;;  %1944 = vmatpush.msrb.mxu2 %v4329_v15  ;;  %v4438_v3 = vld [vmem:[#allocation16 + $0x4] sm:$0x1] }
 0x5ed   : > { %v3167_v37 = vmul.f32 -1.442695, %v1613_v59  ;;  %v3168_v60 = vmul.f32 -1.442695, %v1635_v24  ;;  %v1764_v59 = vld [vmem:[#allocation11 + $0x88] sm:$0xff]  ;;  %v4331_v24 = vld [vmem:[#allocation13 + $0x90] sm:$0xff] }
 0x5ee   : > { %1963 = vmatpush.msrb.mxu3 %v4331_v24  ;;  %1804 = vmatpush.msrb.mxu0 %v1764_v59 }
 0x5ef   : > { %3386 = vpow2.f32 %v3167_v37  ;;  %v1608_v13 = vpop.f32.mrf.mxu2 }
 0x5f0   : > { %3388 = vpow2.f32 %v3168_v60  ;;  %v1609_v26 = vadd.f32 %v3486_v25, %v1608_v13 }
 0x5f5   : > { %v3387_v61 = vpop.eup %3386 }
 0x5f6   : > { %v3389_v27 = vpop.eup %3388  ;;  %v1617_v62 = vadd.f32 1.0, %v3387_v61  ;;  %v4335_v61 = vld [vmem:[#allocation13 + $0x88] sm:$0xff] }
 0x5f7   : > { %v1639_v63 = vadd.f32 1.0, %v3389_v27  ;;  %v4338_v27 = vld [vmem:[#allocation13 + $0x60] sm:$0xff]  ;;  %1964 = vmatpush.msrb.mxu3 %v4335_v61 }
 0x5f8   : > { %3390 = vrcp.f32 %v1617_v62  ;;  %v1629_v2 = vand.u32 2147483648, %v1617_v62  ;;  %v1627_v11 = vand.u32 2147483647, %v1617_v62  ;;  %vm1623_vm9 = vweird.f32 %v1617_v62  ;;  %1945 = vmatpush.msrb.mxu2 %v4338_v27 }
 0x5f9   : > { %3392 = vrcp.f32 %v1639_v63  ;;  %v1651_v19 = vand.u32 2147483648, %v1639_v63  ;;  %vm1645_vm15 = vweird.f32 %v1639_v63  ;;  %v1649_v42 = vand.u32 2147483647, %v1639_v63 }
 0x5fa   : > { %v1630_v16 = vor.u32 1.1754944e-38, %v1629_v2  ;;  %vm1628_vm12 = vcmp.eq.f32.partialorder %v1627_v11, 8.507059e+37  ;;  %2079 = vmatpush.msra.mxu2 %v4326_v57  ;;  %v1835_v2 = vld [vmem:[#allocation11 + $0xa8] sm:$0xff] }
 0x5fb   : > { %v1652_v45 = vor.u32 1.1754944e-38, %v1651_v19  ;;  %v4374_v11 = vld [vmem:[#allocation13 + $0xa8] sm:$0xff] }
 0x5fc   : > { %2080 = vmatpush.msra.mxu2 %v4331_v24 }
 0x5fe   : > { %v3391_v1 = vpop.eup %3390  ;;  %2081 = vmatpush.msra.mxu2 %v4335_v61 }
 0x5ff   : > { %v3393_v5 = vpop.eup %3392  ;;  %v1619_v49 = vmul.f32 %v3391_v1, %v1617_v62  ;;  %vm1624_vm8 = vweird.f32 %v3391_v1  ;;  %v1763_v62 = vld [vmem:[#allocation11 + $0x80] sm:$0xff] }
 0x600   : > { %v1641_v21 = vmul.f32 %v3393_v5, %v1639_v63  ;;  %vm1625_vm10 = vmor %vm1623_vm9, %vm1624_vm8  ;;  %vm1646_vm14 = vweird.f32 %v3393_v5  ;;  %vm1650_vm8 = vcmp.eq.f32.partialorder %v1649_v42, 8.507059e+37  ;;  %vm4341_vm9 = vcmp.eq.s32.totalorder %v1669_v22, 1  ;;  %1805 = vmatpush.msrb.mxu0 %v1763_v62  ;;  %v3315_v62 = vld [vmem:[#allocation14 + $0x5] ss:$0 sm:$0xff] }
 0x601   : > { %v1620_v7 = vsub.f32 1.0, %v1619_v49  ;;  %vm1647_vm2 = vmor %vm1645_vm15, %vm1646_vm14  ;;  %v1837_v49 = vld [vmem:[#allocation11 + $0xb8] sm:$0xff] }
 0x602   : > { %v1642_v35 = vsub.f32 1.0, %v1641_v21  ;;  %v4357_v21 = vld [vmem:[#allocation13 + $0x80] sm:$0xff]  ;;  %1873 = vmatpush.msrb.mxu1 %v1837_v49  ;;  %1982 = vmatpush.msra.mxu0 %v4365_v8 }
 0x603   : > { %v1621_v10 = vmul.f32 %v3391_v1, %v1620_v7  ;;  %1965 = vmatpush.msrb.mxu3 %v4357_v21  ;;  %2082 = vmatpush.msra.mxu2 %v4357_v21 }
 0x604   : > { %v1643_v12 = vmul.f32 %v3393_v5, %v1642_v35  ;;  %1983 = vmatpush.msra.mxu0 %v4367_v9 }
 0x605   : > { %v1622_v18 = vadd.f32 %v3391_v1, %v1621_v10 }
 0x606   : > { %v1644_v38 = vadd.f32 %v3393_v5, %v1643_v12  ;;  %v4381_v12 = vld [vmem:[#allocation13 + $0xa0] sm:$0xff]  ;;  %1984 = vmatpush.msra.mxu0 %v4374_v11 }
 0x607   : > { %v1626_v28 = vsel %vm1625_vm10, %v3391_v1, %v1622_v18  ;;  %v4427_v18 = vld [vmem:[#allocation16 + $0x3] sm:$0x1] }
 0x608   : > { %v1631_v32 = vsel %vm1628_vm12, %v1630_v16, %v1626_v28  ;;  %v1648_v29 = vsel %vm1647_vm2, %v3393_v5, %v1644_v38  ;;  %1985 = vmatpush.msra.mxu0 %v4381_v12 }
 0x609   : > { %v1657_v41 = vmul.f32 %v1631_v32, %v1609_v26  ;;  %v1653_v46 = vsel %vm1650_vm8, %v1652_v45, %v1648_v29  ;;  %v3314_v26 = vld [vmem:[#allocation14 + $0x4] ss:$0 sm:$0xff] }
 0x60a   : > { %v1660_v6 = vsub.f32 1.0, %v1653_v46  ;;  %v1662_v60 = vmul.f32 %v1653_v46, %v4308_v54 }
 0x60b   : > { %v1658_v43 = vadd.f32 %v1657_v41, %v1656_v34 }
 0x60d   : > { %3394 = vtanh.f32 %v1658_v43 }
 0x613   : > { %v3395_v58 = vpop.eup %3394 }
 0x614   : > { %v1661_v37 = vmul.f32 %v3395_v58, %v1660_v6 }
 0x616   : > { %v1663_v63 = vadd.f32 %v1662_v60, %v1661_v37 }
 0x618   : > { %v1671_v5 = vsel %vm4341_vm9, %v1663_v63, %v4308_v54  ;;  %v1836_v54 = vld [vmem:[#allocation11 + $0xb0] sm:$0xff] }
 0x619   : > { %1672 = vst.msk [vmem:[#allocation6] sm:$0x1] %vm484_vm0, %v1671_v5  ;;  %1874 = vmatpush.msrb.mxu1 %v1836_v54 }
 0x61a   : > { %1674 = vst.msk [vmem:[#allocation2 + $0x7] sm:$0x1] %vm484_vm0, %v1671_v5 }
 0x61b   : > { %1925 = vst.msk [vmem:[#allocation6] sm:$0x1] %vm484_vm0, %v3725_v0  ;;  %v1834_v0 = vld [vmem:[#allocation11 + $0xa0] sm:$0xff]  ;;  %1875 = vmatpush.msrb.mxu1 %v1835_v2 }
 0x61d   : > { %1876 = vmatpush.msrb.mxu1 %v1834_v0 }
 0x61f   : > { %2059 = vmatpush.msra.mxu1 %v4321_v39 }
 0x621   : > { %v1682_v7 = vld [vmem:[#allocation2 + $0x7] sm:$0x1]  ;;  %2060 = vmatpush.msra.mxu1 %v4323_v52 }
 0x622   : > { %1715 = vst [vmem:[#allocation1 + $0x7] ss:$9 sm:$0xff] %v1682_v7  ;;  %v4360_v35 = vld [vmem:[#allocation6] sm:$0x1] }
 0x623   : > { %3172 = vmatmul.msk.f32.vlgmr.msrb.gmra.mxu2 %vm4720_vm1, %v4360_v35  ;;  %2061 = vmatpush.msra.mxu1 %v4329_v15 }
 0x624   : > { %2216 = vmatpush.msrb.mxu2 %v4365_v8 }
 0x625   : > { %2062 = vmatpush.msra.mxu1 %v4338_v27 }
 0x626   : > { %2217 = vmatpush.msrb.mxu2 %v4367_v9 }
 0x628   : > { %2218 = vmatpush.msrb.mxu2 %v4374_v11 }
 0x629   : > { %v1716_v10 = vld [vmem:[#allocation1] sm:$0xff] }
 0x62a   : > { %3169 = vmatmul.msk.f32.vlgmr.msra.gmra.mxu3 %vm4720_vm1, %v1716_v10  ;;  %1772 = vst [vmem:[#allocation1] ss:$9 sm:$0xff] %v4108_v20  ;;  %2219 = vmatpush.msrb.mxu2 %v4381_v12 }
 0x62b   : > { %1774 = vst [vmem:[#allocation1 + $0x1] ss:$9 sm:$0xff] %v4150_v40  ;;  %2099 = vmatpush.msra.mxu3 %v4365_v8 }
 0x62c   : > { %1776 = vst [vmem:[#allocation1 + $0x2] ss:$9 sm:$0xff] %v4186_v48 }
 0x62d   : > { %1778 = vst [vmem:[#allocation1 + $0x3] ss:$9 sm:$0xff] %v4226_v53  ;;  %2100 = vmatpush.msra.mxu3 %v4367_v9 }
 0x62e   : > { %1780 = vst [vmem:[#allocation1 + $0x4] ss:$9 sm:$0xff] %v4258_v55 }
 0x62f   : > { %1782 = vst [vmem:[#allocation1 + $0x5] ss:$9 sm:$0xff] %v4282_v30  ;;  %2101 = vmatpush.msra.mxu3 %v4374_v11 }
 0x630   : > { %1784 = vst [vmem:[#allocation1 + $0x6] ss:$9 sm:$0xff] %v4310_v31 }
 0x631   : > { %1786 = vst [vmem:[#allocation1 + $0x7] ss:$9 sm:$0xff] %v1682_v7  ;;  %2102 = vmatpush.msra.mxu3 %v4381_v12 }
 0x632   : > { %3173 = vmatmul.msk.f32.vlgmr.msrb.gmra.mxu3 %vm4720_vm1, %v4360_v35 }
 0x633   : > { %2293 = vmatpush.msrb.mxu3 %v4321_v39 }
 0x635   : > { %2294 = vmatpush.msrb.mxu3 %v4323_v52 }
 0x637   : > { %2295 = vmatpush.msrb.mxu3 %v4329_v15 }
 0x638   : > { %v1787_v13 = vld [vmem:[#allocation1] sm:$0xff] }
 0x639   : > { %3170 = vmatmul.msk.f32.vlgmr.msrb.gmra.mxu0 %vm4720_vm1, %v1787_v13  ;;  %1843 = vst [vmem:[#allocation1] ss:$9 sm:$0xff] %v4108_v20  ;;  %2296 = vmatpush.msrb.mxu3 %v4338_v27 }
 0x63a   : > { %1845 = vst [vmem:[#allocation1 + $0x1] ss:$9 sm:$0xff] %v4150_v40  ;;  %2176 = vmatpush.msrb.mxu0 %v4321_v39  ;;  %v3313_v40 = vld [vmem:[#allocation14 + $0x3] ss:$0 sm:$0xff] }
 0x63b   : > { %1847 = vst [vmem:[#allocation1 + $0x2] ss:$9 sm:$0xff] %v4186_v48 }
 0x63c   : > { %1849 = vst [vmem:[#allocation1 + $0x3] ss:$9 sm:$0xff] %v4226_v53  ;;  %2177 = vmatpush.msrb.mxu0 %v4323_v52 }
 0x63d   : > { %1851 = vst [vmem:[#allocation1 + $0x4] ss:$9 sm:$0xff] %v4258_v55 }
 0x63e   : > { %1853 = vst [vmem:[#allocation1 + $0x5] ss:$9 sm:$0xff] %v4282_v30  ;;  %2178 = vmatpush.msrb.mxu0 %v4329_v15 }
 0x63f   : > { %1855 = vst [vmem:[#allocation1 + $0x6] ss:$9 sm:$0xff] %v4310_v31 }
 0x640   : > { %1857 = vst [vmem:[#allocation1 + $0x7] ss:$9 sm:$0xff] %v1682_v7  ;;  %2179 = vmatpush.msrb.mxu0 %v4338_v27 }
 0x641   : > { %3174 = vmatmul.msk.f32.vlgmr.msra.gmra.mxu0 %vm4720_vm1, %v4360_v35 }
 0x642   : > { %2313 = vmatpush.msra.mxu0 %v4326_v57 }
 0x644   : > { %2314 = vmatpush.msra.mxu0 %v4331_v24 }
 0x646   : > { %2315 = vmatpush.msra.mxu0 %v4335_v61 }
 0x647   : > { %v1858_v20 = vld [vmem:[#allocation1] sm:$0xff] }
 0x648   : > { %3171 = vmatmul.msk.f32.vlgmr.msrb.gmra.mxu1 %vm4720_vm1, %v1858_v20  ;;  %2316 = vmatpush.msra.mxu0 %v4357_v21 }
 0x649   : > { %2196 = vmatpush.msrb.mxu1 %v4326_v57 }
 0x64b   : > { %2197 = vmatpush.msrb.mxu1 %v4331_v24 }
 0x64d   : > { %2198 = vmatpush.msrb.mxu1 %v4335_v61 }
 0x64f   : > { %2199 = vmatpush.msrb.mxu1 %v4357_v21 }
 0x6a6   : > { %v1947_v16 = vpop.f32.mrf.mxu2 }
 0x6a7   : > { %v1948_v32 = vadd.f32 %v1947_v16, %v4427_v18 }
 0x6ad   : > { %v1736_v48 = vpop.f32.mrf.mxu3 }
 0x6ae   : > { %v1737_v53 = vadd.f32 %v3313_v40, %v1736_v48 }
 0x6b0   : > { %v1740_v55 = vrot.slane %v1737_v53, 1  ;;  %v1741_v30 = vrot.slane %v1737_v53, 2  ;;  %v1742_v31 = vrot.slane %v1737_v53, 3  ;;  %1754 = vst.msk [vmem:[#allocation3] sm:$0x1] %vm484_vm0, %v1737_v53  ;;  %v1743_v17 = vrot.slane %v1737_v53, 4 }
 0x6b1   : > { %v1744_v23 = vrot.slane %v1737_v53, 5  ;;  %v1745_v25 = vrot.slane %v1737_v53, 6  ;;  %v1746_v28 = vrot.slane %v1737_v53, 7 }
 0x6b2   : > { %1755 = vst.msk [vmem:[#allocation3 + $0x1] sm:$0x1] %vm484_vm0, %v1740_v55 }
 0x6b3   : > { %1756 = vst.msk [vmem:[#allocation3 + $0x2] sm:$0x1] %vm484_vm0, %v1741_v30 }
 0x6b4   : > { %1757 = vst.msk [vmem:[#allocation3 + $0x3] sm:$0x1] %vm484_vm0, %v1742_v31 }
 0x6b5   : > { %1758 = vst.msk [vmem:[#allocation3 + $0x4] sm:$0x1] %vm484_vm0, %v1743_v17  ;;  %v1967_v50 = vpop.f32.mrf.mxu3  ;;  %v4455_v17 = vld [vmem:[#allocation16 + $0x5] sm:$0x1] }
 0x6b6   : > { %1759 = vst.msk [vmem:[#allocation3 + $0x5] sm:$0x1] %vm484_vm0, %v1744_v23  ;;  %v1807_v38 = vpop.f32.mrf.mxu0  ;;  %v1968_v22 = vadd.f32 %v1967_v50, %v4438_v3 }
 0x6b7   : > { %1760 = vst.msk [vmem:[#allocation3 + $0x6] sm:$0x1] %vm484_vm0, %v1745_v25  ;;  %v1808_v19 = vadd.f32 %v3314_v26, %v1807_v38  ;;  %v1990_v41 = vld [vmem:[#allocation3] sm:$0x1] }
 0x6b8   : > { %1761 = vst.msk [vmem:[#allocation3 + $0x7] sm:$0x1] %vm484_vm0, %v1746_v28  ;;  %v1991_v42 = vadd.f32 %v1990_v41, %v1948_v32 }
 0x6b9   : > { %v1811_v34 = vrot.slane %v1808_v19, 1  ;;  %v1812_v43 = vrot.slane %v1808_v19, 2  ;;  %v1813_v29 = vrot.slane %v1808_v19, 3  ;;  %1825 = vst.msk [vmem:[#allocation4] sm:$0x1] %vm484_vm0, %v1808_v19  ;;  %v1814_v45 = vrot.slane %v1808_v19, 4 }
 0x6ba   : > { %v3175_v46 = vmul.f32 -1.442695, %v1991_v42  ;;  %v1815_v6 = vrot.slane %v1808_v19, 5  ;;  %v1816_v56 = vrot.slane %v1808_v19, 6  ;;  %v1817_v58 = vrot.slane %v1808_v19, 7 }
 0x6bb   : > { %1826 = vst.msk [vmem:[#allocation4 + $0x1] sm:$0x1] %vm484_vm0, %v1811_v34 }
 0x6bc   : > { %1827 = vst.msk [vmem:[#allocation4 + $0x2] sm:$0x1] %vm484_vm0, %v1812_v43  ;;  %3396 = vpow2.f32 %v3175_v46 }
 0x6bd   : > { %1828 = vst.msk [vmem:[#allocation4 + $0x3] sm:$0x1] %vm484_vm0, %v1813_v29 }
 0x6be   : > { %1829 = vst.msk [vmem:[#allocation4 + $0x4] sm:$0x1] %vm484_vm0, %v1814_v45  ;;  %v1987_v16 = vpop.f32.mrf.mxu0 }
 0x6bf   : > { %1830 = vst.msk [vmem:[#allocation4 + $0x5] sm:$0x1] %vm484_vm0, %v1815_v6  ;;  %v1988_v28 = vadd.f32 %v1987_v16, %v4455_v17 }
 0x6c0   : > { %1831 = vst.msk [vmem:[#allocation4 + $0x6] sm:$0x1] %vm484_vm0, %v1816_v56  ;;  %v2011_v59 = vld [vmem:[#allocation4] sm:$0x1] }
 0x6c1   : > { %1832 = vst.msk [vmem:[#allocation4 + $0x7] sm:$0x1] %vm484_vm0, %v1817_v58  ;;  %v2012_v37 = vadd.f32 %v2011_v59, %v1968_v22 }
 0x6c2   : > { %v3397_v60 = vpop.eup %3396 }
 0x6c3   : > { %v1995_v63 = vadd.f32 1.0, %v3397_v60  ;;  %v3176_v5 = vmul.f32 -1.442695, %v2012_v37 }
 0x6c5   : > { %3398 = vrcp.f32 %v1995_v63  ;;  %v1878_v49 = vpop.f32.mrf.mxu1  ;;  %v2007_v23 = vand.u32 2147483648, %v1995_v63  ;;  %v2005_v26 = vand.u32 2147483647, %v1995_v63  ;;  %vm2001_vm12 = vweird.f32 %v1995_v63 }
 0x6c6   : > { %v1879_v54 = vadd.f32 %v3315_v62, %v1878_v49  ;;  %3400 = vpow2.f32 %v3176_v5 }
 0x6c7   : > { %v2008_v38 = vor.u32 1.1754944e-38, %v2007_v23  ;;  %vm2006_vm15 = vcmp.eq.f32.partialorder %v2005_v26, 8.507059e+37 }
 0x6c8   : > { %v1884_v7 = vrot.slane %v1879_v54, 3  ;;  %v1885_v2 = vrot.slane %v1879_v54, 4  ;;  %1896 = vst.msk [vmem:[#allocation5] sm:$0x1] %vm484_vm0, %v1879_v54  ;;  %v1882_v0 = vrot.slane %v1879_v54, 1  ;;  %v1888_v10 = vrot.slane %v1879_v54, 7 }
 0x6c9   : > { %v1883_v13 = vrot.slane %v1879_v54, 2  ;;  %v1886_v40 = vrot.slane %v1879_v54, 5  ;;  %v1887_v53 = vrot.slane %v1879_v54, 6 }
 0x6ca   : > { %1899 = vst.msk [vmem:[#allocation5 + $0x3] sm:$0x1] %vm484_vm0, %v1884_v7 }
 0x6cb   : > { %v3399_v20 = vpop.eup %3398  ;;  %1900 = vst.msk [vmem:[#allocation5 + $0x4] sm:$0x1] %vm484_vm0, %v1885_v2  ;;  %v4470_v2 = vld [vmem:[%s4715_s6] sm:$0x1] }
 0x6cc   : > { %v3401_v48 = vpop.eup %3400  ;;  %1903 = vst.msk [vmem:[#allocation5 + $0x7] sm:$0x1] %vm484_vm0, %v1888_v10  ;;  %v1997_v55 = vmul.f32 %v3399_v20, %v1995_v63  ;;  %vm2002_vm10 = vweird.f32 %v3399_v20 }
 0x6cd   : > { %1897 = vst.msk [vmem:[#allocation5 + $0x1] sm:$0x1] %vm484_vm0, %v1882_v0  ;;  %v2016_v30 = vadd.f32 1.0, %v3401_v48  ;;  %vm2003_vm14 = vmor %vm2001_vm12, %vm2002_vm10 }
 0x6ce   : > { %1898 = vst.msk [vmem:[#allocation5 + $0x2] sm:$0x1] %vm484_vm0, %v1883_v13  ;;  %v1998_v31 = vsub.f32 1.0, %v1997_v55 }
 0x6cf   : > { %1901 = vst.msk [vmem:[#allocation5 + $0x5] sm:$0x1] %vm484_vm0, %v1886_v40  ;;  %3402 = vrcp.f32 %v2016_v30  ;;  %v2032_v29 = vld [vmem:[#allocation5] sm:$0x1]  ;;  %v2028_v50 = vand.u32 2147483648, %v2016_v30  ;;  %vm2022_vm8 = vweird.f32 %v2016_v30 }
 0x6d0   : > { %1902 = vst.msk [vmem:[#allocation5 + $0x6] sm:$0x1] %vm484_vm0, %v1887_v53  ;;  %v1999_v25 = vmul.f32 %v3399_v20, %v1998_v31  ;;  %v2026_v56 = vand.u32 2147483647, %v2016_v30  ;;  %v2107_v40 = vld [vmem:[#allocation3 + $0x1] sm:$0x1] }
 0x6d1   : > { %v2029_v22 = vor.u32 1.1754944e-38, %v2028_v50  ;;  %v2128_v31 = vld [vmem:[#allocation4 + $0x1] sm:$0x1] }
 0x6d2   : > { %v2000_v32 = vadd.f32 %v3399_v20, %v1999_v25  ;;  %vm2027_vm10 = vcmp.eq.f32.partialorder %v2026_v56, 8.507059e+37 }
 0x6d4   : > { %v2004_v19 = vsel %vm2003_vm14, %v3399_v20, %v2000_v32 }
 0x6d5   : > { %v3403_v41 = vpop.eup %3402  ;;  %v2009_v42 = vsel %vm2006_vm15, %v2008_v38, %v2004_v19 }
 0x6d6   : > { %v2018_v34 = vmul.f32 %v3403_v41, %v2016_v30  ;;  %v2033_v43 = vmul.f32 %v2009_v42, %v1988_v28  ;;  %vm2023_vm2 = vweird.f32 %v3403_v41 }
 0x6d7   : > { %vm2024_vm1 = vmor %vm2022_vm8, %vm2023_vm2 }
 0x6d8   : > { %v2019_v45 = vsub.f32 1.0, %v2018_v34  ;;  %v2034_v46 = vadd.f32 %v2033_v43, %v2032_v29 }
 0x6da   : > { %v2020_v6 = vmul.f32 %v3403_v41, %v2019_v45  ;;  %3404 = vtanh.f32 %v2034_v46 }
 0x6dc   : > { %v2021_v58 = vadd.f32 %v3403_v41, %v2020_v6 }
 0x6de   : > { %v2025_v59 = vsel %vm2024_vm1, %v3403_v41, %v2021_v58  ;;  %vm4747_vm1 = vcmask 261120  }
 0x6df   : > { %v2030_v37 = vsel %vm2027_vm10, %v2029_v22, %v2025_v59  ;;  %vm4748_vm12 = vmmov %vm4747_vm1 }
 0x6e0   : > { %v3405_v60 = vpop.eup %3404  ;;  %v2036_v62 = vsub.f32 1.0, %v2030_v37  ;;  %v2038_v5 = vmul.f32 %v2030_v37, %v4360_v35  ;;  %vm4749_vm14 = vmmov %vm4747_vm1 }
 0x6e2   : > { %v2037_v63 = vmul.f32 %v3405_v60, %v2036_v62 }
 0x6e4   : > { %v2039_v49 = vadd.f32 %v2038_v5, %v2037_v63  ;;  %v2149_v5 = vld [vmem:[#allocation5 + $0x1] sm:$0x1] }
 0x6e6   : > { %v2040_v54 = vsel %vm4097_vm13, %v2039_v49, %v4360_v35 }
 0x6e7   : > { %2041 = vst.msk [vmem:[#allocation6] sm:$0x1] %vm484_vm0, %v2040_v54 }
 0x6e8   : > { %2042 = vst.msk [vmem:[#allocation2] sm:$0x1] %vm484_vm0, %v2040_v54 }
 0x6ee   : > { %v4465_v7 = vld [vmem:[#allocation6] sm:$0x1] }
 0x6ef   : > { %3177 = vmatmul.msk.f32.vlgmr.msra.gmra.mxu1 %vm4747_vm1, %v4465_v7  ;;  %3178 = vmatmul.msk.f32.vlgmr.msra.gmra.mxu2 %vm4748_vm12, %v4465_v7  ;;  %v2862_v0 = vld [vmem:[#allocation2] sm:$0x1] }
 0x6f0   : > { %3179 = vmatmul.msk.f32.vlgmr.msra.gmra.mxu3 %vm4749_vm14, %v4465_v7  ;;  %v2870_v35 = vsel %vm4097_vm13, %v2862_v0, -1.0  ;;  %2333 = vmatpush.msra.mxu1 %v4365_v8 }
 0x6f1   : > { %v2879_v10 = vmul.f32 %v4470_v2, %v2870_v35  ;;  %2410 = vmatpush.msra.mxu2 %v4321_v39  ;;  %2430 = vmatpush.msra.mxu3 %v4326_v57 }
 0x6f2   : > { %2334 = vmatpush.msra.mxu1 %v4367_v9 }
 0x6f3   : > { %v2887_v13 = vsel %vm484_vm0, %v2879_v10, 0.0  ;;  %2411 = vmatpush.msra.mxu2 %v4323_v52  ;;  %2431 = vmatpush.msra.mxu3 %v4331_v24 }
 0x6f4   : > { %2888 = vadd.xlane.f32.xlu1 %v2887_v13  ;;  %2335 = vmatpush.msra.mxu1 %v4374_v11 }
 0x6f5   : > { %2412 = vmatpush.msra.mxu2 %v4329_v15  ;;  %2432 = vmatpush.msra.mxu3 %v4335_v61 }
 0x6f6   : > { %2336 = vmatpush.msra.mxu1 %v4381_v12 }
 0x6f7   : > { %2413 = vmatpush.msra.mxu2 %v4338_v27  ;;  %2433 = vmatpush.msra.mxu3 %v4357_v21 }
 0x76c   : > { %v2064_v14 = vpop.f32.mrf.mxu1 }
 0x76d   : > { %v2065_v20 = vadd.f32 %v2064_v14, %v4427_v18 }
 0x76f   : > { %v2108_v48 = vadd.f32 %v2107_v40, %v2065_v20 }
 0x771   : > { %v3180_v53 = vmul.f32 -1.442695, %v2108_v48 }
 0x772   : > { %v2084_v55 = vpop.f32.mrf.mxu2 }
 0x773   : > { %3406 = vpow2.f32 %v3180_v53  ;;  %v2085_v30 = vadd.f32 %v2084_v55, %v4438_v3  ;;  %v2104_v45 = vpop.f32.mrf.mxu3 }
 0x774   : > { %v2105_v58 = vadd.f32 %v2104_v45, %v4455_v17 }
 0x775   : > { %v2129_v16 = vadd.f32 %v2128_v31, %v2085_v30 }
 0x777   : > { %v3181_v23 = vmul.f32 -1.442695, %v2129_v16 }
 0x779   : > { %v3407_v25 = vpop.eup %3406  ;;  %3408 = vpow2.f32 %v3181_v23 }
 0x77a   : > { %v2112_v26 = vadd.f32 1.0, %v3407_v25 }
 0x77c   : > { %3410 = vrcp.f32 %v2112_v26  ;;  %v2124_v42 = vand.u32 2147483648, %v2112_v26  ;;  %v2122_v43 = vand.u32 2147483647, %v2112_v26  ;;  %vm2118_vm15 = vweird.f32 %v2112_v26 }
 0x77e   : > { %v2125_v6 = vor.u32 1.1754944e-38, %v2124_v42  ;;  %vm2123_vm8 = vcmp.eq.f32.partialorder %v2122_v43, 8.507059e+37 }
 0x77f   : > { %v3409_v28 = vpop.eup %3408 }
 0x780   : > { %v2133_v32 = vadd.f32 1.0, %v3409_v28  ;;  %v2224_v28 = vld [vmem:[#allocation3 + $0x2] sm:$0x1] }
 0x782   : > { %v3411_v38 = vpop.eup %3410  ;;  %3412 = vrcp.f32 %v2133_v32  ;;  %v2145_v60 = vand.u32 2147483648, %v2133_v32  ;;  %v2143_v63 = vand.u32 2147483647, %v2133_v32  ;;  %vm2139_vm1 = vweird.f32 %v2133_v32 }
 0x783   : > { %v2114_v19 = vmul.f32 %v3411_v38, %v2112_v26  ;;  %vm2119_vm13 = vweird.f32 %v3411_v38 }
 0x784   : > { %vm2120_vm2 = vmor %vm2118_vm15, %vm2119_vm13  ;;  %v2146_v0 = vor.u32 1.1754944e-38, %v2145_v60  ;;  %vm2144_vm14 = vcmp.eq.f32.partialorder %v2143_v63, 8.507059e+37  ;;  %vm4750_vm13 = vcmask 261120  }
 0x785   : > { %v2115_v41 = vsub.f32 1.0, %v2114_v19  ;;  %vm4751_vm15 = vmmov %vm4750_vm13 }
 0x787   : > { %v2116_v34 = vmul.f32 %v3411_v38, %v2115_v41 }
 0x788   : > { %v3413_v29 = vpop.eup %3412 }
 0x789   : > { %v2135_v46 = vmul.f32 %v3413_v29, %v2133_v32  ;;  %v2117_v50 = vadd.f32 %v3411_v38, %v2116_v34  ;;  %vm2140_vm10 = vweird.f32 %v3413_v29  ;;  %v2245_v32 = vld [vmem:[#allocation4 + $0x2] sm:$0x1] }
 0x78a   : > { %vm2141_vm12 = vmor %vm2139_vm1, %vm2140_vm10 }
 0x78b   : > { %v2136_v56 = vsub.f32 1.0, %v2135_v46  ;;  %v2121_v22 = vsel %vm2120_vm2, %v3411_v38, %v2117_v50  ;;  %vm4752_vm2 = vmmov %vm4750_vm13 }
 0x78c   : > { %v2126_v59 = vsel %vm2123_vm8, %v2125_v6, %v2121_v22 }
 0x78d   : > { %v2137_v37 = vmul.f32 %v3413_v29, %v2136_v56  ;;  %v2150_v62 = vmul.f32 %v2126_v59, %v2105_v58 }
 0x78f   : > { %v2138_v49 = vadd.f32 %v3413_v29, %v2137_v37  ;;  %v2151_v54 = vadd.f32 %v2150_v62, %v2149_v5 }
 0x791   : > { %v2142_v35 = vsel %vm2141_vm12, %v3413_v29, %v2138_v49  ;;  %3414 = vtanh.f32 %v2151_v54 }
 0x792   : > { %v2147_v10 = vsel %vm2144_vm14, %v2146_v0, %v2142_v35 }
 0x793   : > { %v2153_v13 = vsub.f32 1.0, %v2147_v10  ;;  %v2155_v40 = vmul.f32 %v2147_v10, %v4465_v7 }
 0x797   : > { %v3415_v14 = vpop.eup %3414 }
 0x798   : > { %v2154_v20 = vmul.f32 %v3415_v14, %v2153_v13 }
 0x79a   : > { %v2156_v48 = vadd.f32 %v2155_v40, %v2154_v20  ;;  %v2266_v40 = vld [vmem:[#allocation5 + $0x2] sm:$0x1] }
 0x79c   : > { %v2157_v53 = vsel %vm4139_vm11, %v2156_v48, %v4465_v7 }
 0x79d   : > { %2159 = vst.msk [vmem:[#allocation2 + $0x1] sm:$0x1] %vm484_vm0, %v2157_v53 }
 0x79e   : > { %2158 = vst.msk [vmem:[#allocation6] sm:$0x1] %vm484_vm0, %v2157_v53 }
 0x7a4   : > { %v2863_v55 = vld [vmem:[#allocation2 + $0x1] sm:$0x1] }
 0x7a5   : > { %v4503_v30 = vld [vmem:[#allocation6] sm:$0x1]  ;;  %v2871_v31 = vsel %vm4139_vm11, %v2863_v55, -1.0 }
 0x7a6   : > { %3182 = vmatmul.msk.f32.vlgmr.msrb.gmra.mxu0 %vm4750_vm13, %v4503_v30  ;;  %3183 = vmatmul.msk.f32.vlgmr.msrb.gmra.mxu1 %vm4751_vm15, %v4503_v30  ;;  %v2880_v16 = vmul.f32 %v4470_v2, %v2871_v31 }
 0x7a7   : > { %3184 = vmatmul.msk.f32.vlgmr.msrb.gmra.mxu2 %vm4752_vm2, %v4503_v30  ;;  %2450 = vmatpush.msrb.mxu0 %v4365_v8 }
 0x7a8   : > { %v2890_v7 = vsel %vm484_vm0, %v2880_v16, 0.0  ;;  %2527 = vmatpush.msrb.mxu1 %v4321_v39  ;;  %2547 = vmatpush.msrb.mxu2 %v4326_v57 }
 0x7a9   : > { %2891 = vadd.xlane.f32.xlu2 %v2890_v7  ;;  %2451 = vmatpush.msrb.mxu0 %v4367_v9 }
 0x7aa   : > { %2528 = vmatpush.msrb.mxu1 %v4323_v52  ;;  %2548 = vmatpush.msrb.mxu2 %v4331_v24 }
 0x7ab   : > { %2452 = vmatpush.msrb.mxu0 %v4374_v11 }
 0x7ac   : > { %2529 = vmatpush.msrb.mxu1 %v4329_v15  ;;  %2549 = vmatpush.msrb.mxu2 %v4335_v61 }
 0x7ad   : > { %2453 = vmatpush.msrb.mxu0 %v4381_v12 }
 0x7ae   : > { %2530 = vmatpush.msrb.mxu1 %v4338_v27  ;;  %2550 = vmatpush.msrb.mxu2 %v4357_v21 }
 0x823   : > { %v2181_v36 = vpop.f32.mrf.mxu0  ;;  %v2201_v23 = vpop.f32.mrf.mxu1 }
 0x824   : > { %v2182_v25 = vadd.f32 %v2181_v36, %v4427_v18  ;;  %v2202_v26 = vadd.f32 %v2201_v23, %v4438_v3 }
 0x826   : > { %v2225_v38 = vadd.f32 %v2224_v28, %v2182_v25  ;;  %v2246_v19 = vadd.f32 %v2245_v32, %v2202_v26 }
 0x828   : > { %v3185_v41 = vmul.f32 -1.442695, %v2225_v38  ;;  %v3186_v42 = vmul.f32 -1.442695, %v2246_v19 }
 0x82a   : > { %3416 = vpow2.f32 %v3185_v41  ;;  %v2221_v63 = vpop.f32.mrf.mxu2 }
 0x82b   : > { %3418 = vpow2.f32 %v3186_v42  ;;  %v2222_v54 = vadd.f32 %v2221_v63, %v4455_v17  ;;  %v2362_v42 = vld [vmem:[#allocation4 + $0x3] sm:$0x1] }
 0x830   : > { %v3417_v34 = vpop.eup %3416 }
 0x831   : > { %v3419_v43 = vpop.eup %3418  ;;  %v2229_v29 = vadd.f32 1.0, %v3417_v34 }
 0x832   : > { %v2250_v45 = vadd.f32 1.0, %v3419_v43 }
 0x833   : > { %3420 = vrcp.f32 %v2229_v29  ;;  %v2241_v59 = vand.u32 2147483648, %v2229_v29  ;;  %v2239_v60 = vand.u32 2147483647, %v2229_v29  ;;  %vm2235_vm8 = vweird.f32 %v2229_v29 }
 0x834   : > { %3422 = vrcp.f32 %v2250_v45  ;;  %v2262_v13 = vand.u32 2147483648, %v2250_v45  ;;  %vm2256_vm14 = vweird.f32 %v2250_v45  ;;  %v2260_v20 = vand.u32 2147483647, %v2250_v45 }
 0x835   : > { %v2242_v49 = vor.u32 1.1754944e-38, %v2241_v59  ;;  %vm2240_vm1 = vcmp.eq.f32.partialorder %v2239_v60, 8.507059e+37 }
 0x836   : > { %v2263_v55 = vor.u32 1.1754944e-38, %v2262_v13  ;;  %vm2261_vm15 = vcmp.eq.f32.partialorder %v2260_v20, 8.507059e+37 }
 0x839   : > { %v3421_v46 = vpop.eup %3420 }
 0x83a   : > { %v3423_v50 = vpop.eup %3422  ;;  %v2231_v6 = vmul.f32 %v3421_v46, %v2229_v29  ;;  %vm2236_vm11 = vweird.f32 %v3421_v46 }
 0x83b   : > { %v2252_v56 = vmul.f32 %v3423_v50, %v2250_v45  ;;  %vm2237_vm10 = vmor %vm2235_vm8, %vm2236_vm11  ;;  %vm2257_vm12 = vweird.f32 %v3423_v50 }
 0x83c   : > { %v2232_v58 = vsub.f32 1.0, %v2231_v6  ;;  %vm2258_vm13 = vmor %vm2256_vm14, %vm2257_vm12 }
 0x83d   : > { %v2253_v22 = vsub.f32 1.0, %v2252_v56  ;;  %vm4753_vm11 = vmmov %vm4752_vm2 }
 0x83e   : > { %v2233_v37 = vmul.f32 %v3421_v46, %v2232_v58  ;;  %vm4754_vm8 = vmmov %vm4752_vm2 }
 0x83f   : > { %v2254_v62 = vmul.f32 %v3423_v50, %v2253_v22 }
 0x840   : > { %v2234_v5 = vadd.f32 %v3421_v46, %v2233_v37 }
 0x841   : > { %v2255_v10 = vadd.f32 %v3423_v50, %v2254_v62 }
 0x842   : > { %v2238_v0 = vsel %vm2237_vm10, %v3421_v46, %v2234_v5  ;;  %v2341_v46 = vld [vmem:[#allocation3 + $0x3] sm:$0x1] }
 0x843   : > { %v2243_v35 = vsel %vm2240_vm1, %v2242_v49, %v2238_v0  ;;  %v2259_v53 = vsel %vm2258_vm13, %v3423_v50, %v2255_v10 }
 0x844   : > { %v2267_v14 = vmul.f32 %v2243_v35, %v2222_v54  ;;  %v2264_v31 = vsel %vm2261_vm15, %v2263_v55, %v2259_v53 }
 0x845   : > { %v2270_v16 = vsub.f32 1.0, %v2264_v31  ;;  %v2272_v23 = vmul.f32 %v2264_v31, %v4503_v30 }
 0x846   : > { %v2268_v48 = vadd.f32 %v2267_v14, %v2266_v40 }
 0x848   : > { %3424 = vtanh.f32 %v2268_v48 }
 0x84e   : > { %v3425_v7 = vpop.eup %3424 }
 0x84f   : > { %v2271_v36 = vmul.f32 %v3425_v7, %v2270_v16 }
 0x851   : > { %v2273_v25 = vadd.f32 %v2272_v23, %v2271_v36  ;;  %v2383_v36 = vld [vmem:[#allocation5 + $0x3] sm:$0x1] }
 0x853   : > { %v2274_v26 = vsel %vm4175_vm7, %v2273_v25, %v4503_v30 }
 0x854   : > { %2276 = vst.msk [vmem:[#allocation2 + $0x2] sm:$0x1] %vm484_vm0, %v2274_v26 }
 0x855   : > { %2275 = vst.msk [vmem:[#allocation6] sm:$0x1] %vm484_vm0, %v2274_v26 }
 0x85b   : > { %v2864_v28 = vld [vmem:[#allocation2 + $0x2] sm:$0x1] }
 0x85c   : > { %v4536_v32 = vld [vmem:[#allocation6] sm:$0x1]  ;;  %v2872_v38 = vsel %vm4175_vm7, %v2864_v28, -1.0 }
 0x85d   : > { %3187 = vmatmul.msk.f32.vlgmr.msrb.gmra.mxu3 %vm4752_vm2, %v4536_v32  ;;  %3188 = vmatmul.msk.f32.vlgmr.msra.gmra.mxu0 %vm4753_vm11, %v4536_v32  ;;  %v2881_v19 = vmul.f32 %v4470_v2, %v2872_v38  ;;  %vm4755_vm11 = vmmov %vm4754_vm8 }
 0x85e   : > { %3189 = vmatmul.msk.f32.vlgmr.msra.gmra.mxu1 %vm4754_vm8, %v4536_v32  ;;  %2567 = vmatpush.msrb.mxu3 %v4365_v8 }
 0x85f   : > { %v2893_v30 = vsel %vm484_vm0, %v2881_v19, 0.0  ;;  %2644 = vmatpush.msra.mxu0 %v4321_v39  ;;  %2664 = vmatpush.msra.mxu1 %v4326_v57 }
 0x860   : > { %2894 = vadd.xlane.f32.xlu0 %v2893_v30  ;;  %2568 = vmatpush.msrb.mxu3 %v4367_v9 }
 0x861   : > { %2645 = vmatpush.msra.mxu0 %v4323_v52  ;;  %2665 = vmatpush.msra.mxu1 %v4331_v24 }
 0x862   : > { %2569 = vmatpush.msrb.mxu3 %v4374_v11 }
 0x863   : > { %2646 = vmatpush.msra.mxu0 %v4329_v15  ;;  %2666 = vmatpush.msra.mxu1 %v4335_v61 }
 0x864   : > { %2570 = vmatpush.msrb.mxu3 %v4381_v12 }
 0x865   : > { %2647 = vmatpush.msra.mxu0 %v4338_v27  ;;  %2667 = vmatpush.msra.mxu1 %v4357_v21 }
 0x8da   : > { %v2318_v44 = vpop.f32.mrf.mxu0 }
 0x8db   : > { %v2319_v41 = vadd.f32 %v2318_v44, %v4438_v3  ;;  %v2338_v13 = vpop.f32.mrf.mxu1 }
 0x8dc   : > { %v2339_v40 = vadd.f32 %v2338_v13, %v4455_v17 }
 0x8dd   : > { %v2363_v34 = vadd.f32 %v2362_v42, %v2319_v41 }
 0x8df   : > { %v3191_v43 = vmul.f32 -1.442695, %v2363_v34 }
 0x8e0   : > { %v2298_v29 = vpop.f32.mrf.mxu3 }
 0x8e1   : > { %3426 = vpow2.f32 %v3191_v43  ;;  %v2299_v45 = vadd.f32 %v2298_v29, %v4427_v18 }
 0x8e3   : > { %v2342_v50 = vadd.f32 %v2341_v46, %v2299_v45  ;;  %v2479_v46 = vld [vmem:[#allocation4 + $0x4] sm:$0x1] }
 0x8e5   : > { %v3190_v6 = vmul.f32 -1.442695, %v2342_v50 }
 0x8e7   : > { %v3427_v56 = vpop.eup %3426  ;;  %3428 = vpow2.f32 %v3190_v6 }
 0x8e8   : > { %v2367_v58 = vadd.f32 1.0, %v3427_v56 }
 0x8ea   : > { %3430 = vrcp.f32 %v2367_v58  ;;  %v2379_v31 = vand.u32 2147483648, %v2367_v58  ;;  %vm2373_vm13 = vweird.f32 %v2367_v58  ;;  %v2377_v7 = vand.u32 2147483647, %v2367_v58 }
 0x8ec   : > { %v2380_v26 = vor.u32 1.1754944e-38, %v2379_v31  ;;  %vm2378_vm2 = vcmp.eq.f32.partialorder %v2377_v7, 8.507059e+37  ;;  %v2500_v31 = vld [vmem:[#allocation5 + $0x4] sm:$0x1] }
 0x8ed   : > { %v3429_v22 = vpop.eup %3428 }
 0x8ee   : > { %v2346_v59 = vadd.f32 1.0, %v3429_v22 }
 0x8f0   : > { %3432 = vrcp.f32 %v2346_v59  ;;  %v3431_v37 = vpop.eup %3430  ;;  %v2358_v54 = vand.u32 2147483648, %v2346_v59  ;;  %v2356_v35 = vand.u32 2147483647, %v2346_v59  ;;  %vm2352_vm10 = vweird.f32 %v2346_v59 }
 0x8f1   : > { %v2369_v60 = vmul.f32 %v3431_v37, %v2367_v58  ;;  %vm2374_vm14 = vweird.f32 %v3431_v37 }
 0x8f2   : > { %v2359_v20 = vor.u32 1.1754944e-38, %v2358_v54  ;;  %vm2357_vm12 = vcmp.eq.f32.partialorder %v2356_v35, 8.507059e+37  ;;  %vm2375_vm15 = vmor %vm2373_vm13, %vm2374_vm14 }
 0x8f3   : > { %v2370_v5 = vsub.f32 1.0, %v2369_v60 }
 0x8f5   : > { %v2371_v10 = vmul.f32 %v3431_v37, %v2370_v5 }
 0x8f6   : > { %v3433_v62 = vpop.eup %3432 }
 0x8f7   : > { %v2348_v63 = vmul.f32 %v3433_v62, %v2346_v59  ;;  %vm2353_vm7 = vweird.f32 %v3433_v62  ;;  %v2372_v53 = vadd.f32 %v3431_v37, %v2371_v10 }
 0x8f8   : > { %vm2354_vm1 = vmor %vm2352_vm10, %vm2353_vm7 }
 0x8f9   : > { %v2349_v49 = vsub.f32 1.0, %v2348_v63  ;;  %v2376_v25 = vsel %vm2375_vm15, %v3431_v37, %v2372_v53  ;;  %vm4756_vm7 = vmmov %vm4754_vm8 }
 0x8fa   : > { %v2381_v28 = vsel %vm2378_vm2, %v2380_v26, %v2376_v25 }
 0x8fb   : > { %v2350_v0 = vmul.f32 %v3433_v62, %v2349_v49  ;;  %v2387_v38 = vsub.f32 1.0, %v2381_v28  ;;  %v2389_v30 = vmul.f32 %v2381_v28, %v4536_v32 }
 0x8fd   : > { %v2351_v14 = vadd.f32 %v3433_v62, %v2350_v0 }
 0x8ff   : > { %v2355_v48 = vsel %vm2354_vm1, %v3433_v62, %v2351_v14 }
 0x900   : > { %v2360_v55 = vsel %vm2357_vm12, %v2359_v20, %v2355_v48 }
 0x901   : > { %v2384_v16 = vmul.f32 %v2360_v55, %v2339_v40 }
 0x903   : > { %v2385_v23 = vadd.f32 %v2384_v16, %v2383_v36 }
 0x905   : > { %3434 = vtanh.f32 %v2385_v23 }
 0x90b   : > { %v3435_v19 = vpop.eup %3434 }
 0x90c   : > { %v2388_v44 = vmul.f32 %v3435_v19, %v2387_v38 }
 0x90e   : > { %v2390_v41 = vadd.f32 %v2389_v30, %v2388_v44 }
 0x910   : > { %v2391_v42 = vsel %vm4215_vm6, %v2390_v41, %v4536_v32 }
 0x911   : > { %2392 = vst.msk [vmem:[#allocation6] sm:$0x1] %vm484_vm0, %v2391_v42 }
 0x912   : > { %2393 = vst.msk [vmem:[#allocation2 + $0x3] sm:$0x1] %vm484_vm0, %v2391_v42 }
 0x918   : > { %v4569_v34 = vld [vmem:[#allocation6] sm:$0x1] }
 0x919   : > { %3192 = vmatmul.msk.f32.vlgmr.msra.gmra.mxu2 %vm4755_vm11, %v4569_v34  ;;  %3193 = vmatmul.msk.f32.vlgmr.msra.gmra.mxu3 %vm4754_vm8, %v4569_v34  ;;  %v2865_v43 = vld [vmem:[#allocation2 + $0x3] sm:$0x1]  ;;  %vm4757_vm11 = vmmov %vm4756_vm7 }
 0x91a   : > { %3194 = vmatmul.msk.f32.vlgmr.msrb.gmra.mxu0 %vm4756_vm7, %v4569_v34  ;;  %v2873_v29 = vsel %vm4215_vm6, %v2865_v43, -1.0  ;;  %2684 = vmatpush.msra.mxu2 %v4365_v8  ;;  %vm4758_vm8 = vmmov %vm4756_vm7 }
 0x91b   : > { %v2882_v32 = vmul.f32 %v4470_v2, %v2873_v29  ;;  %2761 = vmatpush.msra.mxu3 %v4321_v39  ;;  %2781 = vmatpush.msrb.mxu0 %v4326_v57 }
 0x91c   : > { %2685 = vmatpush.msra.mxu2 %v4367_v9 }
 0x91d   : > { %v2896_v45 = vsel %vm484_vm0, %v2882_v32, 0.0  ;;  %2762 = vmatpush.msra.mxu3 %v4323_v52  ;;  %2782 = vmatpush.msrb.mxu0 %v4331_v24  ;;  %v2458_v24 = vld [vmem:[#allocation3 + $0x4] sm:$0x1] }
 0x91e   : > { %2897 = vadd.xlane.f32.xlu2 %v2896_v45  ;;  %2686 = vmatpush.msra.mxu2 %v4374_v11  ;;  %v2575_v45 = vld [vmem:[#allocation3 + $0x5] sm:$0x1] }
 0x91f   : > { %2763 = vmatpush.msra.mxu3 %v4329_v15  ;;  %2783 = vmatpush.msrb.mxu0 %v4335_v61 }
 0x920   : > { %2687 = vmatpush.msra.mxu2 %v4381_v12 }
 0x921   : > { %2764 = vmatpush.msra.mxu3 %v4338_v27  ;;  %2784 = vmatpush.msrb.mxu0 %v4357_v21 }
 0x997   : > { %v2455_v0 = vpop.f32.mrf.mxu0 }
 0x998   : > { %v2456_v14 = vadd.f32 %v2455_v0, %v4455_v17 }
 0x99c   : > { %v2415_v33 = vpop.f32.mrf.mxu2  ;;  %v2435_v39 = vpop.f32.mrf.mxu3 }
 0x99d   : > { %v2416_v57 = vadd.f32 %v2415_v33, %v4427_v18  ;;  %v2436_v52 = vadd.f32 %v2435_v39, %v4438_v3 }
 0x99f   : > { %v2459_v50 = vadd.f32 %v2458_v24, %v2416_v57  ;;  %v2480_v6 = vadd.f32 %v2479_v46, %v2436_v52 }
 0x9a1   : > { %v3195_v56 = vmul.f32 -1.442695, %v2459_v50  ;;  %v3196_v15 = vmul.f32 -1.442695, %v2480_v6 }
 0x9a3   : > { %3436 = vpow2.f32 %v3195_v56 }
 0x9a4   : > { %3438 = vpow2.f32 %v3196_v15 }
 0x9a9   : > { %v3437_v61 = vpop.eup %3436 }
 0x9aa   : > { %v3439_v58 = vpop.eup %3438  ;;  %v2463_v22 = vadd.f32 1.0, %v3437_v61 }
 0x9ab   : > { %v2484_v27 = vadd.f32 1.0, %v3439_v58 }
 0x9ac   : > { %3440 = vrcp.f32 %v2463_v22  ;;  %v2475_v63 = vand.u32 2147483648, %v2463_v22  ;;  %v2473_v54 = vand.u32 2147483647, %v2463_v22  ;;  %vm2469_vm10 = vweird.f32 %v2463_v22 }
 0x9ad   : > { %3442 = vrcp.f32 %v2484_v27  ;;  %v2496_v55 = vand.u32 2147483648, %v2484_v27  ;;  %vm2490_vm13 = vweird.f32 %v2484_v27  ;;  %v2494_v16 = vand.u32 2147483647, %v2484_v27 }
 0x9ae   : > { %v2476_v13 = vor.u32 1.1754944e-38, %v2475_v63  ;;  %vm2474_vm12 = vcmp.eq.f32.partialorder %v2473_v54, 8.507059e+37 }
 0x9af   : > { %v2497_v23 = vor.u32 1.1754944e-38, %v2496_v55  ;;  %vm2495_vm2 = vcmp.eq.f32.partialorder %v2494_v16, 8.507059e+37 }
 0x9b2   : > { %v3441_v21 = vpop.eup %3440 }
 0x9b3   : > { %v3443_v59 = vpop.eup %3442  ;;  %v2465_v37 = vmul.f32 %v3441_v21, %v2463_v22  ;;  %vm2470_vm6 = vweird.f32 %v3441_v21 }
 0x9b4   : > { %v2486_v60 = vmul.f32 %v3443_v59, %v2484_v27  ;;  %vm2471_vm1 = vmor %vm2469_vm10, %vm2470_vm6  ;;  %vm2491_vm14 = vweird.f32 %v3443_v59 }
 0x9b5   : > { %v2466_v62 = vsub.f32 1.0, %v2465_v37  ;;  %vm2492_vm15 = vmor %vm2490_vm13, %vm2491_vm14 }
 0x9b6   : > { %v2487_v5 = vsub.f32 1.0, %v2486_v60 }
 0x9b7   : > { %v2467_v49 = vmul.f32 %v3441_v21, %v2466_v62 }
 0x9b8   : > { %v2488_v35 = vmul.f32 %v3443_v59, %v2487_v5 }
 0x9b9   : > { %v2468_v10 = vadd.f32 %v3441_v21, %v2467_v49 }
 0x9ba   : > { %v2489_v48 = vadd.f32 %v3443_v59, %v2488_v35 }
 0x9bb   : > { %v2472_v20 = vsel %vm2471_vm1, %v3441_v21, %v2468_v10  ;;  %v2617_v10 = vld [vmem:[#allocation5 + $0x5] sm:$0x1] }
 0x9bc   : > { %v2477_v40 = vsel %vm2474_vm12, %v2476_v13, %v2472_v20  ;;  %v2493_v36 = vsel %vm2492_vm15, %v3443_v59, %v2489_v48 }
 0x9bd   : > { %v2501_v53 = vmul.f32 %v2477_v40, %v2456_v14  ;;  %v2498_v25 = vsel %vm2495_vm2, %v2497_v23, %v2493_v36  ;;  %vm4759_vm2 = vmmov %vm4756_vm7 }
 0x9be   : > { %v2504_v26 = vsub.f32 1.0, %v2498_v25  ;;  %v2506_v19 = vmul.f32 %v2498_v25, %v4569_v34 }
 0x9bf   : > { %v2502_v7 = vadd.f32 %v2501_v53, %v2500_v31 }
 0x9c1   : > { %3444 = vtanh.f32 %v2502_v7 }
 0x9c7   : > { %v3445_v28 = vpop.eup %3444 }
 0x9c8   : > { %v2505_v38 = vmul.f32 %v3445_v28, %v2504_v26 }
 0x9ca   : > { %v2507_v30 = vadd.f32 %v2506_v19, %v2505_v38 }
 0x9cc   : > { %v2508_v44 = vsel %vm4247_vm4, %v2507_v30, %v4569_v34 }
 0x9cd   : > { %2510 = vst.msk [vmem:[#allocation2 + $0x4] sm:$0x1] %vm484_vm0, %v2508_v44 }
 0x9ce   : > { %2509 = vst.msk [vmem:[#allocation6] sm:$0x1] %vm484_vm0, %v2508_v44  ;;  %v4639_v44 = vld [vmem:[#allocation16 + $0x3] sm:$0x1] }
 0x9d4   : > { %v2866_v41 = vld [vmem:[#allocation2 + $0x4] sm:$0x1] }
 0x9d5   : > { %v4602_v42 = vld [vmem:[#allocation6] sm:$0x1]  ;;  %v2874_v43 = vsel %vm4247_vm4, %v2866_v41, -1.0 }
 0x9d6   : > { %3197 = vmatmul.msk.f32.vlgmr.msrb.gmra.mxu1 %vm4757_vm11, %v4602_v42  ;;  %3198 = vmatmul.msk.f32.vlgmr.msrb.gmra.mxu2 %vm4758_vm8, %v4602_v42  ;;  %v2883_v29 = vmul.f32 %v4470_v2, %v2874_v43  ;;  %vm4760_vm11 = vmmov %vm4759_vm2  ;;  %v2713_v43 = vld [vmem:[#allocation4 + $0x6] sm:$0x1] }
 0x9d7   : > { %3199 = vmatmul.msk.f32.vlgmr.msrb.gmra.mxu3 %vm4756_vm7, %v4602_v42  ;;  %2801 = vmatpush.msrb.mxu1 %v4365_v8  ;;  %v2596_v8 = vld [vmem:[#allocation4 + $0x5] sm:$0x1]  ;;  %vm4761_vm8 = vmmov %vm4759_vm2 }
 0x9d8   : > { %v2899_v34 = vsel %vm484_vm0, %v2883_v29, 0.0 }
 0x9d9   : > { %2900 = vadd.xlane.f32.xlu2 %v2899_v34  ;;  %2802 = vmatpush.msrb.mxu1 %v4367_v9 }
 0x9db   : > { %2803 = vmatpush.msrb.mxu1 %v4374_v11 }
 0x9dd   : > { %2804 = vmatpush.msrb.mxu1 %v4381_v12 }
 0xa53   : > { %v2532_v4 = vpop.f32.mrf.mxu1 }
 0xa54   : > { %v2533_v32 = vadd.f32 %v2532_v4, %v4427_v18 }
 0xa56   : > { %v2576_v33 = vadd.f32 %v2575_v45, %v2533_v32 }
 0xa58   : > { %v3200_v39 = vmul.f32 -1.442695, %v2576_v33 }
 0xa59   : > { %v2552_v57 = vpop.f32.mrf.mxu2 }
 0xa5a   : > { %3446 = vpow2.f32 %v3200_v39  ;;  %v2553_v52 = vadd.f32 %v2552_v57, %v4438_v3  ;;  %v2572_v27 = vpop.f32.mrf.mxu3 }
 0xa5b   : > { %v2573_v62 = vadd.f32 %v2572_v27, %v4455_v17 }
 0xa5c   : > { %v2597_v24 = vadd.f32 %v2596_v8, %v2553_v52 }
 0xa5e   : > { %v3201_v46 = vmul.f32 -1.442695, %v2597_v24 }
 0xa60   : > { %v3447_v50 = vpop.eup %3446  ;;  %3448 = vpow2.f32 %v3201_v46 }
 0xa61   : > { %v2580_v9 = vadd.f32 1.0, %v3447_v50 }
 0xa63   : > { %3450 = vrcp.f32 %v2580_v9  ;;  %v2592_v15 = vand.u32 2147483648, %v2580_v9  ;;  %v2590_v58 = vand.u32 2147483647, %v2580_v9  ;;  %vm2586_vm6 = vweird.f32 %v2580_v9 }
 0xa65   : > { %v2593_v37 = vor.u32 1.1754944e-38, %v2592_v15  ;;  %vm2591_vm1 = vcmp.eq.f32.partialorder %v2590_v58, 8.507059e+37 }
 0xa66   : > { %v3449_v11 = vpop.eup %3448 }
 0xa67   : > { %v2601_v6 = vadd.f32 1.0, %v3449_v11 }
 0xa69   : > { %v3451_v12 = vpop.eup %3450  ;;  %3452 = vrcp.f32 %v2601_v6  ;;  %v2613_v54 = vand.u32 2147483648, %v2601_v6  ;;  %v2611_v35 = vand.u32 2147483647, %v2601_v6  ;;  %vm2607_vm14 = vweird.f32 %v2601_v6 }
 0xa6a   : > { %v2582_v56 = vmul.f32 %v3451_v12, %v2580_v9  ;;  %vm2587_vm4 = vweird.f32 %v3451_v12 }
 0xa6b   : > { %vm2588_vm10 = vmor %vm2586_vm6, %vm2587_vm4  ;;  %v2614_v20 = vor.u32 1.1754944e-38, %v2613_v54  ;;  %vm2612_vm15 = vcmp.eq.f32.partialorder %v2611_v35, 8.507059e+37 }
 0xa6c   : > { %v2583_v18 = vsub.f32 1.0, %v2582_v56 }
 0xa6e   : > { %v2584_v61 = vmul.f32 %v3451_v12, %v2583_v18 }
 0xa6f   : > { %v3453_v22 = vpop.eup %3452 }
 0xa70   : > { %v2603_v21 = vmul.f32 %v3453_v22, %v2601_v6  ;;  %v2585_v59 = vadd.f32 %v3451_v12, %v2584_v61  ;;  %vm2608_vm12 = vweird.f32 %v3453_v22 }
 0xa71   : > { %vm2609_vm13 = vmor %vm2607_vm14, %vm2608_vm12 }
 0xa72   : > { %v2604_v60 = vsub.f32 1.0, %v2603_v21  ;;  %v2589_v63 = vsel %vm2588_vm10, %v3451_v12, %v2585_v59 }
 0xa73   : > { %v2594_v5 = vsel %vm2591_vm1, %v2593_v37, %v2589_v63 }
 0xa74   : > { %v2605_v49 = vmul.f32 %v3453_v22, %v2604_v60  ;;  %v2618_v0 = vmul.f32 %v2594_v5, %v2573_v62  ;;  %v2734_v60 = vld [vmem:[#allocation5 + $0x6] sm:$0x1] }
 0xa76   : > { %v2606_v13 = vadd.f32 %v3453_v22, %v2605_v49  ;;  %v2619_v14 = vadd.f32 %v2618_v0, %v2617_v10 }
 0xa78   : > { %v2610_v40 = vsel %vm2609_vm13, %v3453_v22, %v2606_v13  ;;  %3454 = vtanh.f32 %v2619_v14  ;;  %vm4762_vm13 = vmmov %vm4759_vm2 }
 0xa79   : > { %v2615_v48 = vsel %vm2612_vm15, %v2614_v20, %v2610_v40  ;;  %vm4763_vm15 = vmmov %vm4759_vm2 }
 0xa7a   : > { %v2621_v53 = vsub.f32 1.0, %v2615_v48  ;;  %v2623_v16 = vmul.f32 %v2615_v48, %v4602_v42 }
 0xa7e   : > { %v3455_v55 = vpop.eup %3454 }
 0xa7f   : > { %v2622_v31 = vmul.f32 %v3455_v55, %v2621_v53 }
 0xa81   : > { %v2624_v7 = vadd.f32 %v2623_v16, %v2622_v31  ;;  %v3488_v31 = vld [vmem:[#allocation16 + $0x4] sm:$0x1] }
 0xa83   : > { %v2625_v36 = vsel %vm4271_vm3, %v2624_v7, %v4602_v42  ;;  %v2692_v42 = vld [vmem:[#allocation3 + $0x6] sm:$0x1]  ;;  %v2830_v7 = vld [vmem:[#allocation4 + $0x7] sm:$0x1] }
 0xa84   : > { %2627 = vst.msk [vmem:[#allocation2 + $0x5] sm:$0x1] %vm484_vm0, %v2625_v36 }
 0xa85   : > { %2626 = vst.msk [vmem:[#allocation6] sm:$0x1] %vm484_vm0, %v2625_v36 }
 0xa8b   : > { %v2867_v23 = vld [vmem:[#allocation2 + $0x5] sm:$0x1] }
 0xa8c   : > { %v4627_v25 = vld [vmem:[#allocation6] sm:$0x1]  ;;  %v2875_v26 = vsel %vm4271_vm3, %v2867_v23, -1.0 }
 0xa8d   : > { %3202 = vmatmul.msk.f32.vlgmr.msra.gmra.mxu0 %vm4759_vm2, %v4627_v25  ;;  %3203 = vmatmul.msk.f32.vlgmr.msra.gmra.mxu1 %vm4760_vm11, %v4627_v25  ;;  %v2884_v28 = vmul.f32 %v4470_v2, %v2875_v26  ;;  %v2809_v26 = vld [vmem:[#allocation3 + $0x7] sm:$0x1] }
 0xa8e   : > { %3204 = vmatmul.msk.f32.vlgmr.msra.gmra.mxu2 %vm4761_vm8, %v4627_v25 }
 0xa8f   : > { %v2902_v38 = vsel %vm484_vm0, %v2884_v28, 0.0 }
 0xa90   : > { %2903 = vadd.xlane.f32.xlu0 %v2902_v38 }
 0xb0a   : > { %v2649_v19 = vpop.f32.mrf.mxu0  ;;  %v2669_v30 = vpop.f32.mrf.mxu1 }
 0xb0b   : > { %v2650_v47 = vadd.f32 %v4639_v44, %v2649_v19  ;;  %v2670_v41 = vadd.f32 %v2669_v30, %v4438_v3 }
 0xb0d   : > { %v2693_v29 = vadd.f32 %v2692_v42, %v2650_v47  ;;  %v2714_v34 = vadd.f32 %v2713_v43, %v2670_v41 }
 0xb0f   : > { %v3205_v4 = vmul.f32 -1.442695, %v2693_v29  ;;  %v3206_v32 = vmul.f32 -1.442695, %v2714_v34 }
 0xb11   : > { %3456 = vpow2.f32 %v3205_v4  ;;  %v2689_v56 = vpop.f32.mrf.mxu2 }
 0xb12   : > { %3458 = vpow2.f32 %v3206_v32  ;;  %v2690_v61 = vadd.f32 %v2689_v56, %v4455_v17 }
 0xb17   : > { %v3457_v45 = vpop.eup %3456 }
 0xb18   : > { %v3459_v33 = vpop.eup %3458  ;;  %v2697_v39 = vadd.f32 1.0, %v3457_v45 }
 0xb19   : > { %v2718_v57 = vadd.f32 1.0, %v3459_v33 }
 0xb1a   : > { %3460 = vrcp.f32 %v2697_v39  ;;  %v2709_v9 = vand.u32 2147483648, %v2697_v39  ;;  %v2707_v6 = vand.u32 2147483647, %v2697_v39  ;;  %vm2703_vm7 = vweird.f32 %v2697_v39 }
 0xb1b   : > { %3462 = vrcp.f32 %v2718_v57  ;;  %v2730_v21 = vand.u32 2147483648, %v2718_v57  ;;  %vm2724_vm1 = vweird.f32 %v2718_v57  ;;  %v2728_v37 = vand.u32 2147483647, %v2718_v57 }
 0xb1c   : > { %v2710_v15 = vor.u32 1.1754944e-38, %v2709_v9  ;;  %vm2708_vm6 = vcmp.eq.f32.partialorder %v2707_v6, 8.507059e+37 }
 0xb1d   : > { %v2731_v5 = vor.u32 1.1754944e-38, %v2730_v21  ;;  %vm2729_vm14 = vcmp.eq.f32.partialorder %v2728_v37, 8.507059e+37 }
 0xb20   : > { %v3461_v52 = vpop.eup %3460 }
 0xb21   : > { %v3463_v8 = vpop.eup %3462  ;;  %v2699_v24 = vmul.f32 %v3461_v52, %v2697_v39  ;;  %vm2704_vm3 = vweird.f32 %v3461_v52 }
 0xb22   : > { %v2720_v46 = vmul.f32 %v3463_v8, %v2718_v57  ;;  %vm2705_vm4 = vmor %vm2703_vm7, %vm2704_vm3  ;;  %vm2725_vm10 = vweird.f32 %v3463_v8 }
 0xb23   : > { %v2700_v50 = vsub.f32 1.0, %v2699_v24  ;;  %vm2726_vm12 = vmor %vm2724_vm1, %vm2725_vm10  ;;  %vm2936_vm1 = vcmask 1043459  }
 0xb24   : > { %v2721_v3 = vsub.f32 1.0, %v2720_v46 }
 0xb25   : > { %v2701_v11 = vmul.f32 %v3461_v52, %v2700_v50 }
 0xb26   : > { %v2722_v12 = vmul.f32 %v3463_v8, %v2721_v3 }
 0xb27   : > { %v2702_v18 = vadd.f32 %v3461_v52, %v2701_v11 }
 0xb28   : > { %v2723_v27 = vadd.f32 %v3463_v8, %v2722_v12  ;;  %v2851_v12 = vld [vmem:[#allocation5 + $0x7] sm:$0x1] }
 0xb29   : > { %v2706_v58 = vsel %vm2705_vm4, %v3461_v52, %v2702_v18 }
 0xb2a   : > { %v2711_v22 = vsel %vm2708_vm6, %v2710_v15, %v2706_v58  ;;  %v2727_v63 = vsel %vm2726_vm12, %v3463_v8, %v2723_v27  ;;  %v3489_v8 = vld [vmem:[#allocation16 + $0x5] sm:$0x1]  ;;  %vm2939_vm12 = vcmask 1044484  }
 0xb2b   : > { %v2735_v59 = vmul.f32 %v2711_v22, %v2690_v61  ;;  %v2732_v49 = vsel %vm2729_vm14, %v2731_v5, %v2727_v63  ;;  %v3490_v63 = vld [vmem:[%s4715_s6] sm:$0x1]  ;;  %vm2942_vm14 = vcmask 1045509  }
 0xb2c   : > { %v2738_v54 = vsub.f32 1.0, %v2732_v49  ;;  %v2740_v35 = vmul.f32 %v2732_v49, %v4627_v25 }
 0xb2d   : > { %v2736_v62 = vadd.f32 %v2735_v59, %v2734_v60 }
 0xb2f   : > { %3464 = vtanh.f32 %v2736_v62 }
 0xb35   : > { %v3465_v0 = vpop.eup %3464 }
 0xb36   : > { %v2739_v17 = vmul.f32 %v3465_v0, %v2738_v54  ;;  %v2892_v54 = vpop.xlane.xlu2 %2891 }
 0xb38   : > { %v2741_v10 = vadd.f32 %v2740_v35, %v2739_v17  ;;  %v2895_v17 = vpop.xlane.xlu0 %2894  ;;  %v2889_v35 = vpop.xlane.xlu1 %2888 }
 0xb3a   : > { %v2742_v13 = vsel %vm4299_vm5, %v2741_v10, %v4627_v25  ;;  %v2912_v10 = vstv %s2911_s26 }
 0xb3b   : > { %2744 = vst.msk [vmem:[#allocation2 + $0x6] sm:$0x1] %vm484_vm0, %v2742_v13 }
 0xb3c   : > { %2743 = vst.msk [vmem:[#allocation6] sm:$0x1] %vm484_vm0, %v2742_v13  ;;  %v2914_v13 = vadd.f32 %v2912_v10, %v2892_v54 }
 0xb3e   : > { %v2898_v0 = vpop.xlane.xlu2 %2897 }
 0xb3f   : > { %v2916_v1 = vadd.f32 %v2912_v10, %v2898_v0 }
 0xb42   : > { %v2868_v14 = vld [vmem:[#allocation2 + $0x6] sm:$0x1] }
 0xb43   : > { %v4650_v20 = vld [vmem:[#allocation6] sm:$0x1]  ;;  %v2876_v40 = vsel %vm4299_vm5, %v2868_v14, -1.0 }
 0xb44   : > { %3207 = vmatmul.msk.f32.vlgmr.msra.gmra.mxu3 %vm4762_vm13, %v4650_v20  ;;  %3208 = vmatmul.msk.f32.vlgmr.msrb.gmra.mxu0 %vm4763_vm15, %v4650_v20  ;;  %v2885_v48 = vmul.f32 %v4470_v2, %v2876_v40  ;;  %v2904_v40 = vpop.xlane.xlu0 %2903  ;;  %vm2945_vm13 = vcmask 1046534   ;;  %vm2948_vm15 = vcmask 1047559  }
 0xb45   : > { %3209 = vmatmul.msk.f32.vlgmr.msrb.gmra.mxu1 %vm4759_vm2, %v4650_v20  ;;  %vm2983_vm2 = vcmask 57344  }
 0xb46   : > { %v2905_v53 = vsel %vm484_vm0, %v2885_v48, 0.0  ;;  %v2901_v14 = vpop.xlane.xlu2 %2900 }
 0xb47   : > { %2906 = vadd.xlane.f32.xlu1 %v2905_v53  ;;  %v2917_v53 = vadd.f32 %v2912_v10, %v2901_v14 }
 0xbba   : > { %v2907_v48 = vpop.xlane.xlu1 %2906 }
 0xbc1   : > { %v2786_v55 = vpop.f32.mrf.mxu0 }
 0xbc2   : > { %v2787_v16 = vadd.f32 %v3488_v31, %v2786_v55  ;;  %v2806_v39 = vpop.f32.mrf.mxu1  ;;  %v2929_v55 = vrot.slane %v2914_v13, 7  ;;  %v2918_v31 = vadd.f32 %v2912_v10, %v2904_v40 }
 0xbc3   : > { %v2807_v24 = vadd.f32 %v3489_v8, %v2806_v39 }
 0xbc4   : > { %v2831_v51 = vadd.f32 %v2830_v7, %v2787_v16  ;;  %v2919_v7 = vadd.f32 %v2912_v10, %v2907_v48 }
 0xbc6   : > { %v3211_v36 = vmul.f32 -1.442695, %v2831_v51  ;;  %v2913_v51 = vadd.f32 %v2912_v10, %v2889_v35 }
 0xbc7   : > { %v2766_v23 = vpop.f32.mrf.mxu3 }
 0xbc8   : > { %3466 = vpow2.f32 %v3211_v36  ;;  %v2767_v25 = vadd.f32 %v4639_v44, %v2766_v23  ;;  %v2935_v36 = vrot.slane %v2916_v1, 5  ;;  %v2938_v23 = vrot.slane %v2917_v53, 4 }
 0xbca   : > { %v2810_v28 = vadd.f32 %v2809_v26, %v2767_v25  ;;  %v2941_v26 = vrot.slane %v2918_v31, 3 }
 0xbcc   : > { %v3210_v38 = vmul.f32 -1.442695, %v2810_v28 }
 0xbce   : > { %v3467_v2 = vpop.eup %3466  ;;  %3468 = vpow2.f32 %v3210_v38  ;;  %v2944_v38 = vrot.slane %v2919_v7, 2 }
 0xbcf   : > { %v2835_v19 = vadd.f32 1.0, %v3467_v2 }
 0xbd1   : > { %3470 = vrcp.f32 %v2835_v19  ;;  %v2847_v9 = vand.u32 2147483648, %v2835_v19  ;;  %vm2841_vm4 = vweird.f32 %v2835_v19  ;;  %v2845_v6 = vand.u32 2147483647, %v2835_v19 }
 0xbd3   : > { %v2848_v15 = vor.u32 1.1754944e-38, %v2847_v9  ;;  %vm2846_vm10 = vcmp.eq.f32.partialorder %v2845_v6, 8.507059e+37 }
 0xbd4   : > { %v3469_v30 = vpop.eup %3468 }
 0xbd5   : > { %v2814_v47 = vadd.f32 1.0, %v3469_v30 }
 0xbd7   : > { %3472 = vrcp.f32 %v2814_v47  ;;  %v3471_v41 = vpop.eup %3470  ;;  %v2826_v32 = vand.u32 2147483648, %v2814_v47  ;;  %v2824_v44 = vand.u32 2147483647, %v2814_v47  ;;  %vm2820_vm11 = vweird.f32 %v2814_v47 }
 0xbd8   : > { %v2837_v42 = vmul.f32 %v3471_v41, %v2835_v19  ;;  %vm2842_vm7 = vweird.f32 %v3471_v41 }
 0xbd9   : > { %v2827_v52 = vor.u32 1.1754944e-38, %v2826_v32  ;;  %vm2825_vm3 = vcmp.eq.f32.partialorder %v2824_v44, 8.507059e+37  ;;  %vm2843_vm6 = vmor %vm2841_vm4, %vm2842_vm7 }
 0xbda   : > { %v2838_v34 = vsub.f32 1.0, %v2837_v42 }
 0xbdc   : > { %v2839_v33 = vmul.f32 %v3471_v41, %v2838_v34 }
 0xbdd   : > { %v3473_v43 = vpop.eup %3472 }
 0xbde   : > { %v2816_v29 = vmul.f32 %v3473_v43, %v2814_v47  ;;  %vm2821_vm5 = vweird.f32 %v3473_v43  ;;  %v2840_v50 = vadd.f32 %v3471_v41, %v2839_v33 }
 0xbdf   : > { %vm2822_vm8 = vmor %vm2820_vm11, %vm2821_vm5 }
 0xbe0   : > { %v2817_v4 = vsub.f32 1.0, %v2816_v29  ;;  %v2844_v18 = vsel %vm2843_vm6, %v3471_v41, %v2840_v50 }
 0xbe1   : > { %v2849_v61 = vsel %vm2846_vm10, %v2848_v15, %v2844_v18 }
 0xbe2   : > { %v2818_v45 = vmul.f32 %v3473_v43, %v2817_v4  ;;  %v2855_v58 = vsub.f32 1.0, %v2849_v61  ;;  %v2857_v27 = vmul.f32 %v2849_v61, %v4650_v20 }
 0xbe4   : > { %v2819_v57 = vadd.f32 %v3473_v43, %v2818_v45 }
 0xbe6   : > { %v2823_v46 = vsel %vm2822_vm8, %v3473_v43, %v2819_v57 }
 0xbe7   : > { %v2828_v3 = vsel %vm2825_vm3, %v2827_v52, %v2823_v46 }
 0xbe8   : > { %v2852_v11 = vmul.f32 %v2828_v3, %v2807_v24 }
 0xbea   : > { %v2853_v56 = vadd.f32 %v2852_v11, %v2851_v12 }
 0xbec   : > { %3474 = vtanh.f32 %v2853_v56 }
 0xbf2   : > { %v3475_v22 = vpop.eup %3474 }
 0xbf3   : > { %v2856_v21 = vmul.f32 %v3475_v22, %v2855_v58 }
 0xbf5   : > { %v2858_v59 = vadd.f32 %v2857_v27, %v2856_v21 }
 0xbf7   : > { %v2859_v37 = vsel %vm4341_vm9, %v2858_v59, %v4650_v20  ;;  %v2915_v20 = vadd.f32 %v2912_v10, %v2895_v17 }
 0xbf8   : > { %2860 = vst.msk [vmem:[#allocation6] sm:$0x1] %vm484_vm0, %v2859_v37 }
 0xbf9   : > { %2861 = vst.msk [vmem:[#allocation2 + $0x7] sm:$0x1] %vm484_vm0, %v2859_v37  ;;  %v2932_v16 = vrot.slane %v2915_v20, 6 }
 0xc00   : > { %v2869_v60 = vld [vmem:[#allocation2 + $0x7] sm:$0x1] }
 0xc01   : > { %v2877_v62 = vsel %vm4341_vm9, %v2869_v60, -1.0  ;;  %vm2930_vm9 = vcmask 1041409  }
 0xc02   : > { %v2886_v5 = vmul.f32 %v3490_v63, %v2877_v62  ;;  %v2931_v25 = vsel %vm2930_vm9, %v2929_v55, %v2913_v51 }
 0xc04   : > { %v2908_v49 = vsel %vm484_vm0, %v2886_v5, 0.0  ;;  %vm2933_vm0 = vcmask 1042434  }
 0xc05   : > { %2909 = vadd.xlane.f32.xlu2 %v2908_v49  ;;  %v2934_v28 = vsel %vm2933_vm0, %v2932_v16, %v2931_v25 }
 0xc06   : > { %v2937_v19 = vsel %vm2936_vm1, %v2935_v36, %v2934_v28 }
 0xc07   : > { %v2940_v47 = vsel %vm2939_vm12, %v2938_v23, %v2937_v19 }
 0xc08   : > { %v2943_v41 = vsel %vm2942_vm14, %v2941_v26, %v2940_v47 }
 0xc09   : > { %v2946_v43 = vsel %vm2945_vm13, %v2944_v38, %v2943_v41 }
 0xc78   : > { %v2910_v2 = vpop.xlane.xlu2 %2909 }
 0xc79   : > { %v2920_v30 = vadd.f32 %v2912_v10, %v2910_v2 }
 0xc7b   : > { %v2947_v42 = vrot.slane %v2920_v30, 1 }
 0xc7d   : > { %v2949_v29 = vsel %vm2948_vm15, %v2947_v42, %v2946_v43 }
 0xc7e   : > { %2951 = vxpose.xlu0.b32.start.end [1/1] (short) (narrow) %v2949_v29, 8 }
 0xd22   : > { %v2967_v34 = vpop.trf.xlu0 }
 0xd23   : > { %2984 = vst.msk [vmem:[%s401_s2] sm:$0x1] %vm2983_vm2, %v2967_v34 }
 0xd24   : > { %3668 = shalt.err (!%p3665_p12)
}
 0xd25   : > { %3232 = dma.vmem_to_hbm [thread:$0]  (%p3865_p3), %s2997_s16, 16, %s2999_s12, %s2986_s17  }
 0xd26 PF: > { %s3010_s19 = sand.u32 1, %s3703_s29   ;;  %p4764_p13 = scmp.ge.s32.totalorder %s3715_s10, 2 }
 0xd27   : > { %s3011_s26 = scalar_lea.sflag [#allocation10], %s3010_s19 }
 0xd28   : > { %p3252_p0 = pnand %p4764_p13, %p3810_p6 }
 0xd2a   : > { %p3253_p5 = pneg %p3252_p0 }
 0xd2c   : > { %3698 = dma.done.wait (%p3253_p5), %s3011_s26, 16  }
 0xd2d   : > { %3700 = vsyncadd (%p3253_p5), %s3011_s26, 4294967280  ;;  %p24_p7 = scmp.ge.s32.totalorder %s3855_s14, 4   ;;  %s4765_s29 = smov %s3707_s30 }
 0xd2e   : > { %s4766_s30 = smov %s3711_s9  ;;  %s4767_s9 = smov %s3871_s25 }
 0xd2f   : > { %s4768_s10 = smov %s3855_s14  ;;  %26 = sbr.rel (!%p24_p7) target bundleno = 10 (0xa), region = 206 }
 0xd34   :  { %3016 = vsyncpa [#allocation9], 1 }
 0xd35   :  { %3018 = vsyncpa [#allocation9 + $0x1], 1 }
 0xd36   :  { %3019 = vsyncpa [#allocation12], 1 }
 0xd37   :  { %3020 = vsyncpa [#allocation15], 1 }
 0xd38   :  { %3021 = vsyncpa [#allocation10], 1 }
 0xd39   :  { %3023 = vsyncpa [#allocation10 + $0x1], 1 }

</bundles_post_ra>
